<compile_context>
chip_gen: v7x
topology: tpu7x:2x2x1
jax: 0.10.0
libtpu: 0.0.40
codegen_flags: <defaults>
</compile_context>

<pallas_src>
import jax
import jax.numpy as jnp
from jax.experimental import pallas as pl
from jax.experimental.pallas import tpu as pltpu

EPS = 1e-5
LANE = 128


def _round_up(v, m):
    return (v + m - 1) // m * m


# --------------------------------------------------------------------------------------
# Pass 1: conv1 (3x3, stride 1, pad 1, dx folded into K) + bn1 partial stats
# --------------------------------------------------------------------------------------
def _conv1_kernel(x_ref, w1_ref, y1_ref, st1_ref, cat_ref):
    Hp, Wp, Ci = x_ref.shape            # (H+2, W+2, Ci), halo padded host-side
    H, W = Hp - 2, Wp - 2
    P = H * W
    K = 3 * Ci
    Co = y1_ref.shape[-1]

    # Build the dx-folded operand ONCE per grid step: three column-shifted copies of the
    # padded plane, placed side by side along the lane axis (lane-aligned dense stores).
    # Only the dx=1,2 slices are sublane-unaligned copies.
    cat_ref[:, :, 0:Ci] = x_ref[:, 0:W, :]
    cat_ref[:, :, Ci:2 * Ci] = x_ref[:, 1:W + 1, :]
    cat_ref[:, :, 2 * Ci:K] = x_ref[:, 2:W + 2, :]

    # 3 MXU matmuls with K = 3*Ci; the dy slices are leading-axis views (free).
    # Accumulate in a traced f32 value -> single store, no VMEM read-modify-write.
    acc = jnp.dot(cat_ref[0:H].reshape(P, K), w1_ref[0],
                  preferred_element_type=jnp.float32)
    acc = acc + jnp.dot(cat_ref[1:H + 1].reshape(P, K), w1_ref[1],
                        preferred_element_type=jnp.float32)
    acc = acc + jnp.dot(cat_ref[2:H + 2].reshape(P, K), w1_ref[2],
                        preferred_element_type=jnp.float32)

    y1b = acc.astype(y1_ref.dtype)
    y1_ref[...] = y1b.reshape(H, W, Co)

    # bn1 partial stats (sum, sumsq) on the rounded values pass 2 will read back.
    yf = y1b.astype(jnp.float32)
    st1_ref[...] = jnp.concatenate(
        [jnp.sum(yf, axis=0, keepdims=True),
         jnp.sum(yf * yf, axis=0, keepdims=True)], axis=0)


# --------------------------------------------------------------------------------------
# Pass 2: bn1 (folded scale/bias) + relu + conv2 (3x3, dx folded) + bn2 partial stats
# --------------------------------------------------------------------------------------
def _conv2_kernel(y1_ref, s1_ref, b1_ref, w2_ref, y2_ref, st2_ref, cat_ref):
    H, W, Co = y1_ref.shape
    P = H * W
    K = 3 * Co

    # bn1 folded into one FMA (scale/bias precomputed in the wrapper), then relu.
    h1 = jnp.maximum(y1_ref[...].astype(jnp.float32) * s1_ref[...] + b1_ref[...], 0.0)
    h1 = h1.astype(cat_ref.dtype)

    # dx-folded operand.  Interior rows are written with full-width, lane-aligned dense
    # stores; only the top/bottom halo rows are zeroed (no narrow column stores).
    zc = jnp.zeros((H, 1, Co), cat_ref.dtype)
    zr = jnp.zeros((1, W, K), cat_ref.dtype)
    cat_ref[0:1] = zr
    cat_ref[H + 1:H + 2] = zr
    cat_ref[1:H + 1, :, 0:Co] = jnp.concatenate([zc, h1[:, 0:W - 1, :]], axis=1)
    cat_ref[1:H + 1, :, Co:2 * Co] = h1
    cat_ref[1:H + 1, :, 2 * Co:K] = jnp.concatenate([h1[:, 1:W, :], zc], axis=1)

    acc = jnp.dot(cat_ref[0:H].reshape(P, K), w2_ref[0],
                  preferred_element_type=jnp.float32)
    acc = acc + jnp.dot(cat_ref[1:H + 1].reshape(P, K), w2_ref[1],
                        preferred_element_type=jnp.float32)
    acc = acc + jnp.dot(cat_ref[2:H + 2].reshape(P, K), w2_ref[2],
                        preferred_element_type=jnp.float32)

    y2b = acc.astype(y2_ref.dtype)
    y2_ref[...] = y2b.reshape(H, W, Co)
    yf = y2b.astype(jnp.float32)
    st2_ref[...] = jnp.concatenate(
        [jnp.sum(yf, axis=0, keepdims=True),
         jnp.sum(yf * yf, axis=0, keepdims=True)], axis=0)


# --------------------------------------------------------------------------------------
# Pass 3 (epilogue): bn2 (folded scale/bias) + shortcut + relu, several batch elems/step
# --------------------------------------------------------------------------------------
def _epilogue_identity_kernel(y2_ref, x_ref, s2_ref, b2_ref, out_ref):
    B, H, W, Co = y2_ref.shape
    P = B * H * W
    h = y2_ref[...].reshape(P, Co).astype(jnp.float32) * s2_ref[...] + b2_ref[...]
    res = x_ref[...].reshape(P, Co).astype(jnp.float32)       # exact f32 identity residual
    out_ref[...] = jnp.maximum(h + res, 0.0).reshape(B, H, W, Co)


def _epilogue_shortcut_kernel(y2_ref, x_ref, ws_ref, s2_ref, b2_ref, out_ref):
    B, H, W, Co = y2_ref.shape
    Ci = x_ref.shape[-1]
    P = B * H * W
    h = y2_ref[...].reshape(P, Co).astype(jnp.float32) * s2_ref[...] + b2_ref[...]
    # 1x1 shortcut matmul hides under this pass's HBM traffic (MXU otherwise idle here).
    sc = jnp.dot(x_ref[...].reshape(P, Ci), ws_ref[...],
                 preferred_element_type=jnp.float32)
    out_ref[...] = jnp.maximum(h + sc, 0.0).reshape(B, H, W, Co)


# --------------------------------------------------------------------------------------
# Wrapper
# --------------------------------------------------------------------------------------
def _fold_bn(stats, gamma, beta, count):
    """stats: (N, 2, C) per-block (sum, sumsq). Returns folded (scale, bias) as (1, C) f32."""
    s = jnp.sum(stats[:, 0, :], axis=0)
    sq = jnp.sum(stats[:, 1, :], axis=0)
    mean = s / count
    var = jnp.maximum(sq / count - mean * mean, 0.0)     # biased variance (BatchNorm2d)
    scale = gamma * jax.lax.rsqrt(var + EPS)
    bias = beta - mean * scale
    return scale.reshape(1, -1), bias.reshape(1, -1)


def _epilogue_batch_tile(N, H, W, Ci, Co, budget_bytes=4 << 20):
    per = H * W * (2 * Co + 4 * max(Ci, Co) + 4 * Co)    # y2 + shortcut input + f32 out
    b = max(1, min(N, budget_bytes // max(per, 1)))
    while b > 1 and N % b:
        b -= 1
    return b


def basic_block_pallas(x_nchw, params):
    """x_nchw: (N, Cin, H, W) float32. Returns (N, Cout, H, W) float32."""
    w1, w2, ws, g1, b1, g2, b2 = params
    N, Cin, H, W = x_nchw.shape
    Cout = w1.shape[0]
    Ci = _round_up(Cin, LANE)     # lane-padded input channels
    Co = _round_up(Cout, LANE)    # lane-padded output channels
    P = N * H * W
    identity_sc = (Cin == Cout)

    # ---- host-side layout prep: NCHW -> NHWC, halo pad, lane-pad channels, bf16 operands
    x_nhwc = jnp.transpose(x_nchw, (0, 2, 3, 1)).astype(jnp.float32)
    x_pad = jnp.pad(x_nhwc, ((0, 0), (1, 1), (1, 1), (0, Ci - Cin))).astype(jnp.bfloat16)

    # dx-folded conv weights: (3, 3*C, Co) with index [dy, dx*C + ci, co]
    w1_cat = jnp.pad(jnp.transpose(w1, (2, 3, 1, 0)),
                     ((0, 0), (0, 0), (0, Ci - Cin), (0, Co - Cout)))
    w1_cat = w1_cat.reshape(3, 3 * Ci, Co).astype(jnp.bfloat16)
    w2_cat = jnp.pad(jnp.transpose(w2, (2, 3, 1, 0)),
                     ((0, 0), (0, 0), (0, Co - Cout), (0, Co - Cout)))
    w2_cat = w2_cat.reshape(3, 3 * Co, Co).astype(jnp.bfloat16)

    g1p = jnp.pad(g1, (0, Co - Cout)); b1p = jnp.pad(b1, (0, Co - Cout))
    g2p = jnp.pad(g2, (0, Co - Cout)); b2p = jnp.pad(b2, (0, Co - Cout))

    cparams = pltpu.CompilerParams(
        dimension_semantics=("parallel",),
        vmem_limit_bytes=32 * 1024 * 1024)   # raise v5e's 16 MiB default; safe on v6e/v7x

    # ---- pass 1: conv1 + bn1 partial stats --------------------------------------------
    y1, st1 = pl.pallas_call(
        _conv1_kernel,
        grid=(N,),
        in_specs=[
            pl.BlockSpec((None, H + 2, W + 2, Ci), lambda n: (n, 0, 0, 0)),
            pl.BlockSpec((3, 3 * Ci, Co), lambda n: (0, 0, 0)),
        ],
        out_specs=(
            pl.BlockSpec((None, H, W, Co), lambda n: (n, 0, 0, 0)),
            pl.BlockSpec((None, 2, Co), lambda n: (n, 0, 0)),
        ),
        out_shape=(
            jax.ShapeDtypeStruct((N, H, W, Co), jnp.bfloat16),   # raw conv1 output
            jax.ShapeDtypeStruct((N, 2, Co), jnp.float32),       # bn1 partial stats
        ),
        scratch_shapes=[pltpu.VMEM((H + 2, W, 3 * Ci), jnp.bfloat16)],
        compiler_params=cparams,
    )(x_pad, w1_cat)

    scale1, bias1 = _fold_bn(st1, g1p, b1p, P)

    # ---- pass 2: bn1 FMA + relu + conv2 + bn2 partial stats ----------------------------
    y2, st2 = pl.pallas_call(
        _conv2_kernel,
        grid=(N,),
        in_specs=[
            pl.BlockSpec((None, H, W, Co), lambda n: (n, 0, 0, 0)),
            pl.BlockSpec((1, Co), lambda n: (0, 0)),
            pl.BlockSpec((1, Co), lambda n: (0, 0)),
            pl.BlockSpec((3, 3 * Co, Co), lambda n: (0, 0, 0)),
        ],
        out_specs=(
            pl.BlockSpec((None, H, W, Co), lambda n: (n, 0, 0, 0)),
            pl.BlockSpec((None, 2, Co), lambda n: (n, 0, 0)),
        ),
        out_shape=(
            jax.ShapeDtypeStruct((N, H, W, Co), jnp.bfloat16),   # raw conv2 output
            jax.ShapeDtypeStruct((N, 2, Co), jnp.float32),       # bn2 partial stats
        ),
        scratch_shapes=[pltpu.VMEM((H + 2, W, 3 * Co), jnp.bfloat16)],
        compiler_params=cparams,
    )(y1, scale1, bias1, w2_cat)

    scale2, bias2 = _fold_bn(st2, g2p, b2p, P)

    # ---- pass 3: bn2 FMA + shortcut + relu (batched blocks, bandwidth-bound) -----------
    B3 = _epilogue_batch_tile(N, H, W, Ci, Co)
    grid3 = (N // B3,)

    if identity_sc:
        # exact f32 residual (no bf16 cast, no identity matmul): lane-padded NHWC x
        x_sc = jnp.pad(x_nhwc, ((0, 0), (0, 0), (0, 0), (0, Co - Cin))).astype(jnp.float32)
        out = pl.pallas_call(
            _epilogue_identity_kernel,
            grid=grid3,
            in_specs=[
                pl.BlockSpec((B3, H, W, Co), lambda n: (n, 0, 0, 0)),
                pl.BlockSpec((B3, H, W, Co), lambda n: (n, 0, 0, 0)),
                pl.BlockSpec((1, Co), lambda n: (0, 0)),
                pl.BlockSpec((1, Co), lambda n: (0, 0)),
            ],
            out_specs=pl.BlockSpec((B3, H, W, Co), lambda n: (n, 0, 0, 0)),
            out_shape=jax.ShapeDtypeStruct((N, H, W, Co), jnp.float32),
            compiler_params=cparams,
        )(y2, x_sc, scale2, bias2)
    else:
        # 1x1 projection shortcut computed here (MXU idle in this memory-bound pass)
        x_sc = jnp.pad(x_nhwc, ((0, 0), (0, 0), (0, 0), (0, Ci - Cin))).astype(jnp.bfloat16)
        ws_mat = jnp.pad(jnp.transpose(ws[:, :, 0, 0], (1, 0)),
                         ((0, Ci - Cin), (0, Co - Cout))).astype(jnp.bfloat16)
        out = pl.pallas_call(
            _epilogue_shortcut_kernel,
            grid=grid3,
            in_specs=[
                pl.BlockSpec((B3, H, W, Co), lambda n: (n, 0, 0, 0)),
                pl.BlockSpec((B3, H, W, Ci), lambda n: (n, 0, 0, 0)),
                pl.BlockSpec((Ci, Co), lambda n: (0, 0)),
                pl.BlockSpec((1, Co), lambda n: (0, 0)),
                pl.BlockSpec((1, Co), lambda n: (0, 0)),
            ],
            out_specs=pl.BlockSpec((B3, H, W, Co), lambda n: (n, 0, 0, 0)),
            out_shape=jax.ShapeDtypeStruct((N, H, W, Co), jnp.float32),
            compiler_params=cparams,
        )(y2, x_sc, ws_mat, scale2, bias2)

    # strip channel padding, back to NCHW
    return jnp.transpose(out[..., :Cout], (0, 3, 1, 2))


# --------------------------------------------------------------------------------------
# Pure-JAX f32 reference matching the PyTorch forward (training-mode BN)
# --------------------------------------------------------------------------------------
def basic_block_reference(x_nchw, params):
    w1, w2, ws, g1, b1, g2, b2 = params

    def conv(x, w, pad):
        return jax.lax.conv_general_dilated(
            x, w, window_strides=(1, 1), padding=((pad, pad), (pad, pad)),
            dimension_numbers=("NCHW", "OIHW", "NCHW"))

    def bn(x, g, b):
        m = jnp.mean(x, axis=(0, 2, 3), keepdims=True)
        v = jnp.mean((x - m) ** 2, axis=(0, 2, 3), keepdims=True)
        return (x - m) * jax.lax.rsqrt(v + EPS) * g.reshape(1, -1, 1, 1) + b.reshape(1, -1, 1, 1)

    out = jax.nn.relu(bn(conv(x_nchw, w1, 1), g1, b1))
    out = bn(conv(out, w2, 1), g2, b2)
    if w1.shape[1] != w1.shape[0]:          # inplanes != outplanes -> 1x1 shortcut conv
        out = out + conv(x_nchw, ws, 0)
    else:
        out = out + x_nchw
    return jax.nn.relu(out)


if __name__ == "__main__":
    def run_case(key, N, Cin, Cout, H, W):
        ks = jax.random.split(key, 8)
        x = jax.random.normal(ks[0], (N, Cin, H, W), jnp.float32)
        # Deterministic synthetic parameters (shapes from the module's __init__).
        w1 = 0.1 * jax.random.normal(ks[1], (Cout, Cin, 3, 3), jnp.float32)   # conv1
        w2 = 0.1 * jax.random.normal(ks[2], (Cout, Cout, 3, 3), jnp.float32)  # conv2
        ws = 0.1 * jax.random.normal(ks[3], (Cout, Cin, 1, 1), jnp.float32)   # shortcuts
        g1 = 1.0 + 0.1 * jax.random.normal(ks[4], (Cout,), jnp.float32)
        b1 = 0.1 * jax.random.normal(ks[5], (Cout,), jnp.float32)
        g2 = 1.0 + 0.1 * jax.random.normal(ks[6], (Cout,), jnp.float32)
        b2 = 0.1 * jax.random.normal(ks[7], (Cout,), jnp.float32)
        params = (w1, w2, ws, g1, b1, g2, b2)

        out = jax.block_until_ready(jax.jit(basic_block_pallas)(x, params))
        ref = jax.block_until_ready(basic_block_reference(x, params))

        assert out.shape == (N, Cout, H, W)
        # bf16 MXU operands (f32 accumulation / BN) vs f32 reference -> ~1e-2-scale diffs
        err = float(jnp.max(jnp.abs(out - ref)))
        assert jnp.allclose(out, ref, atol=7e-2, rtol=5e-2), f"max abs err = {err}"

    key = jax.random.PRNGKey(0)
    k_proj, k_id = jax.random.split(key)
    run_case(k_proj, N=2, Cin=4, Cout=8, H=16, W=16)   # projection (1x1 conv) shortcut
    run_case(k_id, N=2, Cin=8, Cout=8, H=16, W=16)     # identity shortcut
    print("KERNEL_OK")
</pallas_src>

<mosaic_0001>
module attributes {stable_mosaic.version = 11 : i64} {
  func.func @_conv1_kernel(%arg0: i32, %arg1: memref<1x18x18x128xbf16, #tpu.memory_space<vmem>>, %arg2: memref<3x384x128xbf16, #tpu.memory_space<vmem>>, %arg3: memref<1x16x16x128xbf16, #tpu.memory_space<vmem>>, %arg4: memref<1x2x128xf32, #tpu.memory_space<vmem>>, %arg5: memref<18x16x384xbf16, #tpu.memory_space<vmem>>) attributes {dimension_semantics = [#tpu.dimension_semantics<parallel>], iteration_bounds = array<i64: 2>, scalar_prefetch = 0 : i64, scratch_operands = 1 : i64, tpu.core_type = #tpu.core_type<tc>, window_params = [{transform_indices = @transform_0, window_bounds = array<i64: 1, 18, 18, 128>}, {pipeline_mode = #tpu.pipeline_mode<synchronous>, transform_indices = @transform_1, window_bounds = array<i64: 3, 384, 128>}, {transform_indices = @transform_2, window_bounds = array<i64: 1, 16, 16, 128>}, {transform_indices = @transform_3, window_bounds = array<i64: 1, 2, 128>}]} {
    %c0 = arith.constant 0 : index
    %c0_0 = arith.constant 0 : index
    %c0_1 = arith.constant 0 : index
    %c0_2 = arith.constant 0 : index
    %0 = vector.load %arg1[%c0, %c0_0, %c0_1, %c0_2] : memref<1x18x18x128xbf16, #tpu.memory_space<vmem>>, vector<1x18x16x128xbf16>
    %1 = vector.shape_cast %0 : vector<1x18x16x128xbf16> to vector<18x16x128xbf16>
    %c0_3 = arith.constant 0 : index
    %c0_4 = arith.constant 0 : index
    %c0_5 = arith.constant 0 : index
    %2 = vector.load %arg5[%c0_3, %c0_4, %c0_5] : memref<18x16x384xbf16, #tpu.memory_space<vmem>>, vector<18x16x128xbf16>
    tpu.vector_store %arg5[%c0_3, %c0_4, %c0_5], %1 {strides = array<i32>} : memref<18x16x384xbf16, #tpu.memory_space<vmem>>, vector<18x16x128xbf16>,
    %c0_6 = arith.constant 0 : index
    %c0_7 = arith.constant 0 : index
    %c1 = arith.constant 1 : index
    %c0_8 = arith.constant 0 : index
    %3 = vector.load %arg1[%c0_6, %c0_7, %c1, %c0_8] : memref<1x18x18x128xbf16, #tpu.memory_space<vmem>>, vector<1x18x16x128xbf16>
    %4 = vector.shape_cast %3 : vector<1x18x16x128xbf16> to vector<18x16x128xbf16>
    %c0_9 = arith.constant 0 : index
    %c0_10 = arith.constant 0 : index
    %c128 = arith.constant 128 : index
    %5 = vector.load %arg5[%c0_9, %c0_10, %c128] : memref<18x16x384xbf16, #tpu.memory_space<vmem>>, vector<18x16x128xbf16>
    tpu.vector_store %arg5[%c0_9, %c0_10, %c128], %4 {strides = array<i32>} : memref<18x16x384xbf16, #tpu.memory_space<vmem>>, vector<18x16x128xbf16>,
    %c0_11 = arith.constant 0 : index
    %c0_12 = arith.constant 0 : index
    %c2 = arith.constant 2 : index
    %c0_13 = arith.constant 0 : index
    %6 = vector.load %arg1[%c0_11, %c0_12, %c2, %c0_13] : memref<1x18x18x128xbf16, #tpu.memory_space<vmem>>, vector<1x18x16x128xbf16>
    %7 = vector.shape_cast %6 : vector<1x18x16x128xbf16> to vector<18x16x128xbf16>
    %c0_14 = arith.constant 0 : index
    %c0_15 = arith.constant 0 : index
    %c256 = arith.constant 256 : index
    %8 = vector.load %arg5[%c0_14, %c0_15, %c256] : memref<18x16x384xbf16, #tpu.memory_space<vmem>>, vector<18x16x128xbf16>
    tpu.vector_store %arg5[%c0_14, %c0_15, %c256], %7 {strides = array<i32>} : memref<18x16x384xbf16, #tpu.memory_space<vmem>>, vector<18x16x128xbf16>,
    %c0_16 = arith.constant 0 : index
    %c0_17 = arith.constant 0 : index
    %c0_18 = arith.constant 0 : index
    %9 = vector.load %arg5[%c0_16, %c0_17, %c0_18] : memref<18x16x384xbf16, #tpu.memory_space<vmem>>, vector<16x16x384xbf16>
    %10 = vector.shape_cast %9 : vector<16x16x384xbf16> to vector<256x384xbf16>
    %c0_19 = arith.constant 0 : index
    %c0_20 = arith.constant 0 : index
    %c0_21 = arith.constant 0 : index
    %11 = vector.load %arg2[%c0_19, %c0_20, %c0_21] : memref<3x384x128xbf16, #tpu.memory_space<vmem>>, vector<1x384x128xbf16>
    %12 = vector.shape_cast %11 : vector<1x384x128xbf16> to vector<384x128xbf16>
    %cst = arith.constant dense<0.000000e+00> : vector<256x128xf32>
    %13 = tpu.matmul %10, %12, %cst {dimension_numbers = #tpu.dot_dimension_numbers<[1], [0], [0], [1], [0, 0, 1, 1], [], []>} : vector<256x384xbf16>, vector<384x128xbf16>, vector<256x128xf32> -> vector<256x128xf32>
    %c1_22 = arith.constant 1 : index
    %c0_23 = arith.constant 0 : index
    %c0_24 = arith.constant 0 : index
    %14 = vector.load %arg5[%c1_22, %c0_23, %c0_24] : memref<18x16x384xbf16, #tpu.memory_space<vmem>>, vector<16x16x384xbf16>
    %15 = vector.shape_cast %14 : vector<16x16x384xbf16> to vector<256x384xbf16>
    %c1_25 = arith.constant 1 : index
    %c0_26 = arith.constant 0 : index
    %c0_27 = arith.constant 0 : index
    %16 = vector.load %arg2[%c1_25, %c0_26, %c0_27] : memref<3x384x128xbf16, #tpu.memory_space<vmem>>, vector<1x384x128xbf16>
    %17 = vector.shape_cast %16 : vector<1x384x128xbf16> to vector<384x128xbf16>
    %cst_28 = arith.constant dense<0.000000e+00> : vector<256x128xf32>
    %18 = tpu.matmul %15, %17, %cst_28 {dimension_numbers = #tpu.dot_dimension_numbers<[1], [0], [0], [1], [0, 0, 1, 1], [], []>} : vector<256x384xbf16>, vector<384x128xbf16>, vector<256x128xf32> -> vector<256x128xf32>
    %19 = arith.addf %13, %18 : vector<256x128xf32>
    %c2_29 = arith.constant 2 : index
    %c0_30 = arith.constant 0 : index
    %c0_31 = arith.constant 0 : index
    %20 = vector.load %arg5[%c2_29, %c0_30, %c0_31] : memref<18x16x384xbf16, #tpu.memory_space<vmem>>, vector<16x16x384xbf16>
    %21 = vector.shape_cast %20 : vector<16x16x384xbf16> to vector<256x384xbf16>
    %c2_32 = arith.constant 2 : index
    %c0_33 = arith.constant 0 : index
    %c0_34 = arith.constant 0 : index
    %22 = vector.load %arg2[%c2_32, %c0_33, %c0_34] : memref<3x384x128xbf16, #tpu.memory_space<vmem>>, vector<1x384x128xbf16>
    %23 = vector.shape_cast %22 : vector<1x384x128xbf16> to vector<384x128xbf16>
    %cst_35 = arith.constant dense<0.000000e+00> : vector<256x128xf32>
    %24 = tpu.matmul %21, %23, %cst_35 {dimension_numbers = #tpu.dot_dimension_numbers<[1], [0], [0], [1], [0, 0, 1, 1], [], []>} : vector<256x384xbf16>, vector<384x128xbf16>, vector<256x128xf32> -> vector<256x128xf32>
    %25 = arith.addf %19, %24 : vector<256x128xf32>
    %26 = arith.truncf %25 : vector<256x128xf32> to vector<256x128xbf16>
    %27 = vector.shape_cast %26 : vector<256x128xbf16> to vector<16x16x128xbf16>
    %c0_36 = arith.constant 0 : index
    %c0_37 = arith.constant 0 : index
    %c0_38 = arith.constant 0 : index
    %c0_39 = arith.constant 0 : index
    %28 = vector.load %arg3[%c0_36, %c0_37, %c0_38, %c0_39] : memref<1x16x16x128xbf16, #tpu.memory_space<vmem>>, vector<1x16x16x128xbf16>
    %29 = vector.shape_cast %28 : vector<1x16x16x128xbf16> to vector<16x16x128xbf16>
    %30 = vector.shape_cast %27 : vector<16x16x128xbf16> to vector<1x16x16x128xbf16>
    tpu.vector_store %arg3[%c0_36, %c0_37, %c0_38, %c0_39], %30 {strides = array<i32>} : memref<1x16x16x128xbf16, #tpu.memory_space<vmem>>, vector<1x16x16x128xbf16>,
    %31 = arith.extf %26 : vector<256x128xbf16> to vector<256x128xf32>
    %cst_40 = arith.constant dense<0.000000e+00> : vector<128xf32>
    %32 = vector.multi_reduction <add>, %31, %cst_40 [0] : vector<256x128xf32> to vector<128xf32>
    %33 = vector.shape_cast %32 : vector<128xf32> to vector<1x128xf32>
    %34 = arith.mulf %31, %31 : vector<256x128xf32>
    %cst_41 = arith.constant dense<0.000000e+00> : vector<128xf32>
    %35 = vector.multi_reduction <add>, %34, %cst_41 [0] : vector<256x128xf32> to vector<128xf32>
    %36 = vector.shape_cast %35 : vector<128xf32> to vector<1x128xf32>
    %37 = tpu.concatenate %33, %36 in 0 : vector<1x128xf32>, vector<1x128xf32> -> vector<2x128xf32>
    %c0_42 = arith.constant 0 : index
    %c0_43 = arith.constant 0 : index
    %c0_44 = arith.constant 0 : index
    %38 = vector.load %arg4[%c0_42, %c0_43, %c0_44] : memref<1x2x128xf32, #tpu.memory_space<vmem>>, vector<1x2x128xf32>
    %39 = vector.shape_cast %38 : vector<1x2x128xf32> to vector<2x128xf32>
    %40 = vector.shape_cast %37 : vector<2x128xf32> to vector<1x2x128xf32>
    tpu.vector_store %arg4[%c0_42, %c0_43, %c0_44], %40 {strides = array<i32>} : memref<1x2x128xf32, #tpu.memory_space<vmem>>, vector<1x2x128xf32>,
    return
  }
  func.func @transform_0(%arg0: i32) -> (i32, i32, i32, i32) {
    %c0_i32 = arith.constant 0 : i32
    %c0_i32_0 = arith.constant 0 : i32
    %c0_i32_1 = arith.constant 0 : i32
    %c0_i32_2 = arith.constant 0 : i32
    return %arg0, %c0_i32, %c0_i32_0, %c0_i32_1 : i32, i32, i32, i32
  }
  func.func @transform_1(%arg0: i32) -> (i32, i32, i32) {
    %c0_i32 = arith.constant 0 : i32
    %c0_i32_0 = arith.constant 0 : i32
    %c0_i32_1 = arith.constant 0 : i32
    %c0_i32_2 = arith.constant 0 : i32
    return %c0_i32, %c0_i32_0, %c0_i32_1 : i32, i32, i32
  }
  func.func @transform_2(%arg0: i32) -> (i32, i32, i32, i32) {
    %c0_i32 = arith.constant 0 : i32
    %c0_i32_0 = arith.constant 0 : i32
    %c0_i32_1 = arith.constant 0 : i32
    %c0_i32_2 = arith.constant 0 : i32
    return %arg0, %c0_i32, %c0_i32_0, %c0_i32_1 : i32, i32, i32, i32
  }
  func.func @transform_3(%arg0: i32) -> (i32, i32, i32) {
    %c0_i32 = arith.constant 0 : i32
    %c0_i32_0 = arith.constant 0 : i32
    %c0_i32_1 = arith.constant 0 : i32
    return %arg0, %c0_i32, %c0_i32_0 : i32, i32, i32
  }
}

module attributes {stable_mosaic.version = 11 : i64} {
  func.func @_conv2_kernel(%arg0: i32, %arg1: memref<1x16x16x128xbf16, #tpu.memory_space<vmem>>, %arg2: memref<1x128xf32, #tpu.memory_space<vmem>>, %arg3: memref<1x128xf32, #tpu.memory_space<vmem>>, %arg4: memref<3x384x128xbf16, #tpu.memory_space<vmem>>, %arg5: memref<1x16x16x128xbf16, #tpu.memory_space<vmem>>, %arg6: memref<1x2x128xf32, #tpu.memory_space<vmem>>, %arg7: memref<18x16x384xbf16, #tpu.memory_space<vmem>>) attributes {dimension_semantics = [#tpu.dimension_semantics<parallel>], iteration_bounds = array<i64: 2>, scalar_prefetch = 0 : i64, scratch_operands = 1 : i64, tpu.core_type = #tpu.core_type<tc>, window_params = [{transform_indices = @transform_0, window_bounds = array<i64: 1, 16, 16, 128>}, {pipeline_mode = #tpu.pipeline_mode<synchronous>, transform_indices = @transform_1, window_bounds = array<i64: 1, 128>}, {pipeline_mode = #tpu.pipeline_mode<synchronous>, transform_indices = @transform_2, window_bounds = array<i64: 1, 128>}, {pipeline_mode = #tpu.pipeline_mode<synchronous>, transform_indices = @transform_3, window_bounds = array<i64: 3, 384, 128>}, {transform_indices = @transform_4, window_bounds = array<i64: 1, 16, 16, 128>}, {transform_indices = @transform_5, window_bounds = array<i64: 1, 2, 128>}]} {
    %c0 = arith.constant 0 : index
    %c0_0 = arith.constant 0 : index
    %c0_1 = arith.constant 0 : index
    %c0_2 = arith.constant 0 : index
    %0 = vector.load %arg1[%c0, %c0_0, %c0_1, %c0_2] : memref<1x16x16x128xbf16, #tpu.memory_space<vmem>>, vector<1x16x16x128xbf16>
    %1 = vector.shape_cast %0 : vector<1x16x16x128xbf16> to vector<16x16x128xbf16>
    %2 = arith.extf %1 : vector<16x16x128xbf16> to vector<16x16x128xf32>
    %c0_3 = arith.constant 0 : index
    %c0_4 = arith.constant 0 : index
    %3 = vector.load %arg2[%c0_3, %c0_4] : memref<1x128xf32, #tpu.memory_space<vmem>>, vector<1x128xf32>
    %4 = vector.shape_cast %3 : vector<1x128xf32> to vector<1x1x128xf32>
    %5 = vector.broadcast %4 : vector<1x1x128xf32> to vector<16x16x128xf32>
    %6 = arith.mulf %2, %5 : vector<16x16x128xf32>
    %c0_5 = arith.constant 0 : index
    %c0_6 = arith.constant 0 : index
    %7 = vector.load %arg3[%c0_5, %c0_6] : memref<1x128xf32, #tpu.memory_space<vmem>>, vector<1x128xf32>
    %8 = vector.shape_cast %7 : vector<1x128xf32> to vector<1x1x128xf32>
    %9 = vector.broadcast %8 : vector<1x1x128xf32> to vector<16x16x128xf32>
    %10 = arith.addf %6, %9 : vector<16x16x128xf32>
    %cst = arith.constant 0.000000e+00 : f32
    %11 = vector.broadcast %cst : f32 to vector<16x16x128xf32>
    %12 = arith.maximumf %10, %11 : vector<16x16x128xf32>
    %13 = arith.truncf %12 : vector<16x16x128xf32> to vector<16x16x128xbf16>
    %cst_7 = arith.constant 0.000000e+00 : bf16
    %14 = vector.broadcast %cst_7 : bf16 to vector<16x1x128xbf16>
    %cst_8 = arith.constant 0.000000e+00 : bf16
    %15 = vector.broadcast %cst_8 : bf16 to vector<1x16x384xbf16>
    %c0_9 = arith.constant 0 : index
    %c0_10 = arith.constant 0 : index
    %c0_11 = arith.constant 0 : index
    %16 = vector.load %arg7[%c0_9, %c0_10, %c0_11] : memref<18x16x384xbf16, #tpu.memory_space<vmem>>, vector<1x16x384xbf16>
    tpu.vector_store %arg7[%c0_9, %c0_10, %c0_11], %15 {strides = array<i32>} : memref<18x16x384xbf16, #tpu.memory_space<vmem>>, vector<1x16x384xbf16>,
    %c17 = arith.constant 17 : index
    %c0_12 = arith.constant 0 : index
    %c0_13 = arith.constant 0 : index
    %17 = vector.load %arg7[%c17, %c0_12, %c0_13] : memref<18x16x384xbf16, #tpu.memory_space<vmem>>, vector<1x16x384xbf16>
    tpu.vector_store %arg7[%c17, %c0_12, %c0_13], %15 {strides = array<i32>} : memref<18x16x384xbf16, #tpu.memory_space<vmem>>, vector<1x16x384xbf16>,
    %18 = vector.extract_strided_slice %13 {offsets = [0, 0, 0], sizes = [16, 15, 128], strides = [1, 1, 1]} : vector<16x16x128xbf16> to vector<16x15x128xbf16>
    %19 = tpu.concatenate %14, %18 in 1 : vector<16x1x128xbf16>, vector<16x15x128xbf16> -> vector<16x16x128xbf16>
    %c1 = arith.constant 1 : index
    %c0_14 = arith.constant 0 : index
    %c0_15 = arith.constant 0 : index
    %20 = vector.load %arg7[%c1, %c0_14, %c0_15] : memref<18x16x384xbf16, #tpu.memory_space<vmem>>, vector<16x16x128xbf16>
    tpu.vector_store %arg7[%c1, %c0_14, %c0_15], %19 {strides = array<i32>} : memref<18x16x384xbf16, #tpu.memory_space<vmem>>, vector<16x16x128xbf16>,
    %c1_16 = arith.constant 1 : index
    %c0_17 = arith.constant 0 : index
    %c128 = arith.constant 128 : index
    %21 = vector.load %arg7[%c1_16, %c0_17, %c128] : memref<18x16x384xbf16, #tpu.memory_space<vmem>>, vector<16x16x128xbf16>
    tpu.vector_store %arg7[%c1_16, %c0_17, %c128], %13 {strides = array<i32>} : memref<18x16x384xbf16, #tpu.memory_space<vmem>>, vector<16x16x128xbf16>,
    %22 = vector.extract_strided_slice %13 {offsets = [0, 1, 0], sizes = [16, 15, 128], strides = [1, 1, 1]} : vector<16x16x128xbf16> to vector<16x15x128xbf16>
    %23 = tpu.concatenate %22, %14 in 1 : vector<16x15x128xbf16>, vector<16x1x128xbf16> -> vector<16x16x128xbf16>
    %c1_18 = arith.constant 1 : index
    %c0_19 = arith.constant 0 : index
    %c256 = arith.constant 256 : index
    %24 = vector.load %arg7[%c1_18, %c0_19, %c256] : memref<18x16x384xbf16, #tpu.memory_space<vmem>>, vector<16x16x128xbf16>
    tpu.vector_store %arg7[%c1_18, %c0_19, %c256], %23 {strides = array<i32>} : memref<18x16x384xbf16, #tpu.memory_space<vmem>>, vector<16x16x128xbf16>,
    %c0_20 = arith.constant 0 : index
    %c0_21 = arith.constant 0 : index
    %c0_22 = arith.constant 0 : index
    %25 = vector.load %arg7[%c0_20, %c0_21, %c0_22] : memref<18x16x384xbf16, #tpu.memory_space<vmem>>, vector<16x16x384xbf16>
    %26 = vector.shape_cast %25 : vector<16x16x384xbf16> to vector<256x384xbf16>
    %c0_23 = arith.constant 0 : index
    %c0_24 = arith.constant 0 : index
    %c0_25 = arith.constant 0 : index
    %27 = vector.load %arg4[%c0_23, %c0_24, %c0_25] : memref<3x384x128xbf16, #tpu.memory_space<vmem>>, vector<1x384x128xbf16>
    %28 = vector.shape_cast %27 : vector<1x384x128xbf16> to vector<384x128xbf16>
    %cst_26 = arith.constant dense<0.000000e+00> : vector<256x128xf32>
    %29 = tpu.matmul %26, %28, %cst_26 {dimension_numbers = #tpu.dot_dimension_numbers<[1], [0], [0], [1], [0, 0, 1, 1], [], []>} : vector<256x384xbf16>, vector<384x128xbf16>, vector<256x128xf32> -> vector<256x128xf32>
    %c1_27 = arith.constant 1 : index
    %c0_28 = arith.constant 0 : index
    %c0_29 = arith.constant 0 : index
    %30 = vector.load %arg7[%c1_27, %c0_28, %c0_29] : memref<18x16x384xbf16, #tpu.memory_space<vmem>>, vector<16x16x384xbf16>
    %31 = vector.shape_cast %30 : vector<16x16x384xbf16> to vector<256x384xbf16>
    %c1_30 = arith.constant 1 : index
    %c0_31 = arith.constant 0 : index
    %c0_32 = arith.constant 0 : index
    %32 = vector.load %arg4[%c1_30, %c0_31, %c0_32] : memref<3x384x128xbf16, #tpu.memory_space<vmem>>, vector<1x384x128xbf16>
    %33 = vector.shape_cast %32 : vector<1x384x128xbf16> to vector<384x128xbf16>
    %cst_33 = arith.constant dense<0.000000e+00> : vector<256x128xf32>
    %34 = tpu.matmul %31, %33, %cst_33 {dimension_numbers = #tpu.dot_dimension_numbers<[1], [0], [0], [1], [0, 0, 1, 1], [], []>} : vector<256x384xbf16>, vector<384x128xbf16>, vector<256x128xf32> -> vector<256x128xf32>
    %35 = arith.addf %29, %34 : vector<256x128xf32>
    %c2 = arith.constant 2 : index
    %c0_34 = arith.constant 0 : index
    %c0_35 = arith.constant 0 : index
    %36 = vector.load %arg7[%c2, %c0_34, %c0_35] : memref<18x16x384xbf16, #tpu.memory_space<vmem>>, vector<16x16x384xbf16>
    %37 = vector.shape_cast %36 : vector<16x16x384xbf16> to vector<256x384xbf16>
    %c2_36 = arith.constant 2 : index
    %c0_37 = arith.constant 0 : index
    %c0_38 = arith.constant 0 : index
    %38 = vector.load %arg4[%c2_36, %c0_37, %c0_38] : memref<3x384x128xbf16, #tpu.memory_space<vmem>>, vector<1x384x128xbf16>
    %39 = vector.shape_cast %38 : vector<1x384x128xbf16> to vector<384x128xbf16>
    %cst_39 = arith.constant dense<0.000000e+00> : vector<256x128xf32>
    %40 = tpu.matmul %37, %39, %cst_39 {dimension_numbers = #tpu.dot_dimension_numbers<[1], [0], [0], [1], [0, 0, 1, 1], [], []>} : vector<256x384xbf16>, vector<384x128xbf16>, vector<256x128xf32> -> vector<256x128xf32>
    %41 = arith.addf %35, %40 : vector<256x128xf32>
    %42 = arith.truncf %41 : vector<256x128xf32> to vector<256x128xbf16>
    %43 = vector.shape_cast %42 : vector<256x128xbf16> to vector<16x16x128xbf16>
    %c0_40 = arith.constant 0 : index
    %c0_41 = arith.constant 0 : index
    %c0_42 = arith.constant 0 : index
    %c0_43 = arith.constant 0 : index
    %44 = vector.load %arg5[%c0_40, %c0_41, %c0_42, %c0_43] : memref<1x16x16x128xbf16, #tpu.memory_space<vmem>>, vector<1x16x16x128xbf16>
    %45 = vector.shape_cast %44 : vector<1x16x16x128xbf16> to vector<16x16x128xbf16>
    %46 = vector.shape_cast %43 : vector<16x16x128xbf16> to vector<1x16x16x128xbf16>
    tpu.vector_store %arg5[%c0_40, %c0_41, %c0_42, %c0_43], %46 {strides = array<i32>} : memref<1x16x16x128xbf16, #tpu.memory_space<vmem>>, vector<1x16x16x128xbf16>,
    %47 = arith.extf %42 : vector<256x128xbf16> to vector<256x128xf32>
    %cst_44 = arith.constant dense<0.000000e+00> : vector<128xf32>
    %48 = vector.multi_reduction <add>, %47, %cst_44 [0] : vector<256x128xf32> to vector<128xf32>
    %49 = vector.shape_cast %48 : vector<128xf32> to vector<1x128xf32>
    %50 = arith.mulf %47, %47 : vector<256x128xf32>
    %cst_45 = arith.constant dense<0.000000e+00> : vector<128xf32>
    %51 = vector.multi_reduction <add>, %50, %cst_45 [0] : vector<256x128xf32> to vector<128xf32>
    %52 = vector.shape_cast %51 : vector<128xf32> to vector<1x128xf32>
    %53 = tpu.concatenate %49, %52 in 0 : vector<1x128xf32>, vector<1x128xf32> -> vector<2x128xf32>
    %c0_46 = arith.constant 0 : index
    %c0_47 = arith.constant 0 : index
    %c0_48 = arith.constant 0 : index
    %54 = vector.load %arg6[%c0_46, %c0_47, %c0_48] : memref<1x2x128xf32, #tpu.memory_space<vmem>>, vector<1x2x128xf32>
    %55 = vector.shape_cast %54 : vector<1x2x128xf32> to vector<2x128xf32>
    %56 = vector.shape_cast %53 : vector<2x128xf32> to vector<1x2x128xf32>
    tpu.vector_store %arg6[%c0_46, %c0_47, %c0_48], %56 {strides = array<i32>} : memref<1x2x128xf32, #tpu.memory_space<vmem>>, vector<1x2x128xf32>,
    return
  }
  func.func @transform_0(%arg0: i32) -> (i32, i32, i32, i32) {
    %c0_i32 = arith.constant 0 : i32
    %c0_i32_0 = arith.constant 0 : i32
    %c0_i32_1 = arith.constant 0 : i32
    %c0_i32_2 = arith.constant 0 : i32
    return %arg0, %c0_i32, %c0_i32_0, %c0_i32_1 : i32, i32, i32, i32
  }
  func.func @transform_1(%arg0: i32) -> (i32, i32) {
    %c0_i32 = arith.constant 0 : i32
    %c0_i32_0 = arith.constant 0 : i32
    %c0_i32_1 = arith.constant 0 : i32
    return %c0_i32, %c0_i32_0 : i32, i32
  }
  func.func @transform_2(%arg0: i32) -> (i32, i32) {
    %c0_i32 = arith.constant 0 : i32
    %c0_i32_0 = arith.constant 0 : i32
    %c0_i32_1 = arith.constant 0 : i32
    return %c0_i32, %c0_i32_0 : i32, i32
  }
  func.func @transform_3(%arg0: i32) -> (i32, i32, i32) {
    %c0_i32 = arith.constant 0 : i32
    %c0_i32_0 = arith.constant 0 : i32
    %c0_i32_1 = arith.constant 0 : i32
    %c0_i32_2 = arith.constant 0 : i32
    return %c0_i32, %c0_i32_0, %c0_i32_1 : i32, i32, i32
  }
  func.func @transform_4(%arg0: i32) -> (i32, i32, i32, i32) {
    %c0_i32 = arith.constant 0 : i32
    %c0_i32_0 = arith.constant 0 : i32
    %c0_i32_1 = arith.constant 0 : i32
    %c0_i32_2 = arith.constant 0 : i32
    return %arg0, %c0_i32, %c0_i32_0, %c0_i32_1 : i32, i32, i32, i32
  }
  func.func @transform_5(%arg0: i32) -> (i32, i32, i32) {
    %c0_i32 = arith.constant 0 : i32
    %c0_i32_0 = arith.constant 0 : i32
    %c0_i32_1 = arith.constant 0 : i32
    return %arg0, %c0_i32, %c0_i32_0 : i32, i32, i32
  }
}

module attributes {stable_mosaic.version = 11 : i64} {
  func.func @_epilogue_shortcut_kernel(%arg0: i32, %arg1: memref<2x16x16x128xbf16, #tpu.memory_space<vmem>>, %arg2: memref<2x16x16x128xbf16, #tpu.memory_space<vmem>>, %arg3: memref<128x128xbf16, #tpu.memory_space<vmem>>, %arg4: memref<1x128xf32, #tpu.memory_space<vmem>>, %arg5: memref<1x128xf32, #tpu.memory_space<vmem>>, %arg6: memref<2x16x16x128xf32, #tpu.memory_space<vmem>>) attributes {dimension_semantics = [#tpu.dimension_semantics<parallel>], iteration_bounds = array<i64: 1>, scalar_prefetch = 0 : i64, scratch_operands = 0 : i64, tpu.core_type = #tpu.core_type<tc>, window_params = [{transform_indices = @transform_0, window_bounds = array<i64: 2, 16, 16, 128>}, {transform_indices = @transform_1, window_bounds = array<i64: 2, 16, 16, 128>}, {pipeline_mode = #tpu.pipeline_mode<synchronous>, transform_indices = @transform_2, window_bounds = array<i64: 128, 128>}, {pipeline_mode = #tpu.pipeline_mode<synchronous>, transform_indices = @transform_3, window_bounds = array<i64: 1, 128>}, {pipeline_mode = #tpu.pipeline_mode<synchronous>, transform_indices = @transform_4, window_bounds = array<i64: 1, 128>}, {transform_indices = @transform_5, window_bounds = array<i64: 2, 16, 16, 128>}]} {
    %c0 = arith.constant 0 : index
    %c0_0 = arith.constant 0 : index
    %c0_1 = arith.constant 0 : index
    %c0_2 = arith.constant 0 : index
    %0 = vector.load %arg1[%c0, %c0_0, %c0_1, %c0_2] : memref<2x16x16x128xbf16, #tpu.memory_space<vmem>>, vector<2x16x16x128xbf16>
    %1 = vector.shape_cast %0 : vector<2x16x16x128xbf16> to vector<512x128xbf16>
    %2 = arith.extf %1 : vector<512x128xbf16> to vector<512x128xf32>
    %c0_3 = arith.constant 0 : index
    %c0_4 = arith.constant 0 : index
    %3 = vector.load %arg4[%c0_3, %c0_4] : memref<1x128xf32, #tpu.memory_space<vmem>>, vector<1x128xf32>
    %4 = vector.broadcast %3 : vector<1x128xf32> to vector<512x128xf32>
    %5 = arith.mulf %2, %4 : vector<512x128xf32>
    %c0_5 = arith.constant 0 : index
    %c0_6 = arith.constant 0 : index
    %6 = vector.load %arg5[%c0_5, %c0_6] : memref<1x128xf32, #tpu.memory_space<vmem>>, vector<1x128xf32>
    %7 = vector.broadcast %6 : vector<1x128xf32> to vector<512x128xf32>
    %8 = arith.addf %5, %7 : vector<512x128xf32>
    %c0_7 = arith.constant 0 : index
    %c0_8 = arith.constant 0 : index
    %c0_9 = arith.constant 0 : index
    %c0_10 = arith.constant 0 : index
    %9 = vector.load %arg2[%c0_7, %c0_8, %c0_9, %c0_10] : memref<2x16x16x128xbf16, #tpu.memory_space<vmem>>, vector<2x16x16x128xbf16>
    %10 = vector.shape_cast %9 : vector<2x16x16x128xbf16> to vector<512x128xbf16>
    %c0_11 = arith.constant 0 : index
    %c0_12 = arith.constant 0 : index
    %11 = vector.load %arg3[%c0_11, %c0_12] : memref<128x128xbf16, #tpu.memory_space<vmem>>, vector<128x128xbf16>
    %cst = arith.constant dense<0.000000e+00> : vector<512x128xf32>
    %12 = tpu.matmul %10, %11, %cst {dimension_numbers = #tpu.dot_dimension_numbers<[1], [0], [0], [1], [0, 0, 1, 1], [], []>} : vector<512x128xbf16>, vector<128x128xbf16>, vector<512x128xf32> -> vector<512x128xf32>
    %13 = arith.addf %8, %12 : vector<512x128xf32>
    %cst_13 = arith.constant 0.000000e+00 : f32
    %14 = vector.broadcast %cst_13 : f32 to vector<512x128xf32>
    %15 = arith.maximumf %13, %14 : vector<512x128xf32>
    %16 = vector.shape_cast %15 : vector<512x128xf32> to vector<2x16x16x128xf32>
    %c0_14 = arith.constant 0 : index
    %c0_15 = arith.constant 0 : index
    %c0_16 = arith.constant 0 : index
    %c0_17 = arith.constant 0 : index
    %17 = vector.load %arg6[%c0_14, %c0_15, %c0_16, %c0_17] : memref<2x16x16x128xf32, #tpu.memory_space<vmem>>, vector<2x16x16x128xf32>
    tpu.vector_store %arg6[%c0_14, %c0_15, %c0_16, %c0_17], %16 {strides = array<i32>} : memref<2x16x16x128xf32, #tpu.memory_space<vmem>>, vector<2x16x16x128xf32>,
    return
  }
  func.func @transform_0(%arg0: i32) -> (i32, i32, i32, i32) {
    %c0_i32 = arith.constant 0 : i32
    %c0_i32_0 = arith.constant 0 : i32
    %c0_i32_1 = arith.constant 0 : i32
    %c0_i32_2 = arith.constant 0 : i32
    return %arg0, %c0_i32, %c0_i32_0, %c0_i32_1 : i32, i32, i32, i32
  }
  func.func @transform_1(%arg0: i32) -> (i32, i32, i32, i32) {
    %c0_i32 = arith.constant 0 : i32
    %c0_i32_0 = arith.constant 0 : i32
    %c0_i32_1 = arith.constant 0 : i32
    %c0_i32_2 = arith.constant 0 : i32
    return %arg0, %c0_i32, %c0_i32_0, %c0_i32_1 : i32, i32, i32, i32
  }
  func.func @transform_2(%arg0: i32) -> (i32, i32) {
    %c0_i32 = arith.constant 0 : i32
    %c0_i32_0 = arith.constant 0 : i32
    %c0_i32_1 = arith.constant 0 : i32
    return %c0_i32, %c0_i32_0 : i32, i32
  }
  func.func @transform_3(%arg0: i32) -> (i32, i32) {
    %c0_i32 = arith.constant 0 : i32
    %c0_i32_0 = arith.constant 0 : i32
    %c0_i32_1 = arith.constant 0 : i32
    return %c0_i32, %c0_i32_0 : i32, i32
  }
  func.func @transform_4(%arg0: i32) -> (i32, i32) {
    %c0_i32 = arith.constant 0 : i32
    %c0_i32_0 = arith.constant 0 : i32
    %c0_i32_1 = arith.constant 0 : i32
    return %c0_i32, %c0_i32_0 : i32, i32
  }
  func.func @transform_5(%arg0: i32) -> (i32, i32, i32, i32) {
    %c0_i32 = arith.constant 0 : i32
    %c0_i32_0 = arith.constant 0 : i32
    %c0_i32_1 = arith.constant 0 : i32
    %c0_i32_2 = arith.constant 0 : i32
    return %arg0, %c0_i32, %c0_i32_0, %c0_i32_1 : i32, i32, i32, i32
  }
}

</mosaic_0001>

<bundles_post_ra>
// kernel: basic_block_pallas.5
= control target key start
LH: loop header
LB: loop body
LE: loop exit
PB: predicated region body
PF: predicated region fallthrough
CT: control target
= control target key end

     0   :  { %s2261_s2 = inlined_call_operand.vmem [shape: bf16[128,128], index: 2, kind: input, shape index: {}]   ;;  %s2262_s1 = inlined_call_operand.vmem [shape: bf16[2,16,16,128], index: 1, kind: input, shape index: {}]   ;;  %s2263_s0 = inlined_call_operand.vmem [shape: bf16[2,16,16,128], index: 0, kind: input, shape index: {}]   ;;  %s2264_s3 = inlined_call_operand.vmem [shape: f32[1,128], index: 3, kind: input, shape index: {}]   ;;  %s2265_s4 = inlined_call_operand.vmem [shape: f32[1,128], index: 4, kind: input, shape index: {}]   ;;  %s2266_s5 = inlined_call_operand.vmem [shape: f32[2,16,16,128], index: 5, kind: output, shape index: {}]  }
   0x1   :  { %v1433_v0 = vld [vmem:[%s2261_s2] sm:$0xff]   ;;  %v1434_v1 = vld [vmem:[%s2261_s2 + $0x8] sm:$0xff]   ;;  %v1435_v2 = vld [vmem:[%s2261_s2 + $0x10] sm:$0xff]  }
   0x2   :  { %1337 = vmatprep.subr.bf16.mxu0 %v1433_v0  ;;  %1417 = vmatprep.subr.bf16.mxu1 %v1433_v0  ;;  %v1436_v3 = vld [vmem:[%s2261_s2 + $0x18] sm:$0xff]   ;;  %v1441_v4 = vld [vmem:[%s2262_s1] sm:$0xff]   ;;  %v1438_v7 = vld [vmem:[%s2261_s2 + $0x28] sm:$0xff]  }
   0x3   :  { %1338 = vmatpush3.bf16.msra.mxu0 %v1433_v0  ;;  %1425 = vmatpush3.bf16.msra.mxu1 %v1433_v0  ;;  %v1442_v5 = vld [vmem:[%s2262_s1 + $0x80] sm:$0xff]   ;;  %v1439_v8 = vld [vmem:[%s2261_s2 + $0x30] sm:$0xff]   ;;  %v1440_v9 = vld [vmem:[%s2261_s2 + $0x38] sm:$0xff]  }
   0x4   :  { %1339 = vmatprep.subr.bf16.mxu0 %v1434_v1  ;;  %1418 = vmatprep.subr.bf16.mxu1 %v1434_v1  ;;  %v1437_v6 = vld [vmem:[%s2261_s2 + $0x20] sm:$0xff]   ;;  %v1443_v10 = vld [vmem:[%s2262_s1 + $0x8] sm:$0xff]   ;;  %v1445_v12 = vld [vmem:[%s2262_s1 + $0x10] sm:$0xff]  }
   0x5   :  { %1353 = vmatprep.mubr.bf16.mxu0 %v1441_v4  ;;  %1385 = vmatprep.mubr.bf16.mxu1 %v1442_v5  ;;  %v1444_v11 = vld [vmem:[%s2262_s1 + $0x88] sm:$0xff]   ;;  %v1446_v13 = vld [vmem:[%s2262_s1 + $0x90] sm:$0xff]   ;;  %v1447_v14 = vld [vmem:[%s2262_s1 + $0x18] sm:$0xff]  }
   0x6   :  { %v1448_v15 = vld [vmem:[%s2262_s1 + $0x98] sm:$0xff]   ;;  %v1449_v16 = vld [vmem:[%s2262_s1 + $0x20] sm:$0xff]   ;;  %v1451_v18 = vld [vmem:[%s2262_s1 + $0x28] sm:$0xff]  }
   0x7   :  { %1340 = vmatpush3.bf16.msra.mxu0 %v1434_v1  ;;  %1426 = vmatpush3.bf16.msra.mxu1 %v1434_v1  ;;  %v1450_v17 = vld [vmem:[%s2262_s1 + $0xa0] sm:$0xff]   ;;  %v1452_v19 = vld [vmem:[%s2262_s1 + $0xa8] sm:$0xff]   ;;  %v1453_v20 = vld [vmem:[%s2262_s1 + $0x30] sm:$0xff]  }
   0x8   :  { %1341 = vmatprep.subr.bf16.mxu0 %v1435_v2  ;;  %1419 = vmatprep.subr.bf16.mxu1 %v1435_v2  ;;  %v1454_v21 = vld [vmem:[%s2262_s1 + $0xb0] sm:$0xff]   ;;  %v1455_v22 = vld [vmem:[%s2262_s1 + $0x38] sm:$0xff]   ;;  %v1457_v24 = vld [vmem:[%s2262_s1 + $0x40] sm:$0xff]  }
   0x9   :  { %v1456_v23 = vld [vmem:[%s2262_s1 + $0xb8] sm:$0xff]   ;;  %v1458_v25 = vld [vmem:[%s2262_s1 + $0xc0] sm:$0xff]   ;;  %v1459_v26 = vld [vmem:[%s2262_s1 + $0x48] sm:$0xff]  }
   0xa   :  { %v1460_v27 = vld [vmem:[%s2262_s1 + $0xc8] sm:$0xff]   ;;  %v1461_v28 = vld [vmem:[%s2262_s1 + $0x50] sm:$0xff]   ;;  %v1463_v30 = vld [vmem:[%s2262_s1 + $0x58] sm:$0xff]  }
   0xb   :  { %1342 = vmatpush3.bf16.msra.mxu0 %v1435_v2  ;;  %1427 = vmatpush3.bf16.msra.mxu1 %v1435_v2  ;;  %v1462_v29 = vld [vmem:[%s2262_s1 + $0xd0] sm:$0xff]   ;;  %v1464_v31 = vld [vmem:[%s2262_s1 + $0xd8] sm:$0xff]   ;;  %v1465_v32 = vld [vmem:[%s2262_s1 + $0x60] sm:$0xff]  }
   0xc   :  { %1343 = vmatprep.subr.bf16.mxu0 %v1436_v3  ;;  %1420 = vmatprep.subr.bf16.mxu1 %v1436_v3  ;;  %v1466_v33 = vld [vmem:[%s2262_s1 + $0xe0] sm:$0xff]   ;;  %v1467_v34 = vld [vmem:[%s2262_s1 + $0x68] sm:$0xff]   ;;  %v1469_v36 = vld [vmem:[%s2262_s1 + $0x70] sm:$0xff]  }
   0xd   :  { %v1468_v35 = vld [vmem:[%s2262_s1 + $0xe8] sm:$0xff]   ;;  %v1470_v37 = vld [vmem:[%s2262_s1 + $0xf0] sm:$0xff]   ;;  %v1471_v38 = vld [vmem:[%s2262_s1 + $0x78] sm:$0xff]  }
   0xe   :  { %v1472_v39 = vld [vmem:[%s2262_s1 + $0xf8] sm:$0xff]   ;;  %v1266_v40 = vld [vmem:[%s2263_s0 + $0x8] sm:$0xff]   ;;  %v1139_v42 = vld [vmem:[%s2263_s0] sm:$0xff]  }
   0xf   :  { %1344 = vmatpush3.bf16.msra.mxu0 %v1436_v3  ;;  %1428 = vmatpush3.bf16.msra.mxu1 %v1436_v3  ;;  %v1282_v41 = vld [vmem:[%s2263_s0 + $0x88] sm:$0xff]   ;;  %v1281_v43 = vld [vmem:[%s2263_s0 + $0x80] sm:$0xff]   ;;  %v1144_v44 = vunpack.c.l.bf16 %v1266_v40  ;;  %v1140_v47 = vunpack.c.l.bf16 %v1139_v42  ;;  %v1145_v49 = vunpack.c.h.bf16 %v1266_v40  ;;  %v1268_v51 = vld [vmem:[%s2263_s0 + $0x18] sm:$0xff]   ;;  %v1141_v53 = vunpack.c.h.bf16 %v1139_v42 }
  0x10   :  { %1345 = vmatprep.subr.bf16.mxu0 %v1437_v6  ;;  %1421 = vmatprep.subr.bf16.mxu1 %v1437_v6  ;;  %v1208_v45 = vunpack.c.l.bf16 %v1282_v41  ;;  %v1638_v46 = vld [vmem:[%s2264_s3] ss:$0 sm:$0xff]  ;;  %v1204_v48 = vunpack.c.l.bf16 %v1281_v43  ;;  %v1209_v50 = vunpack.c.h.bf16 %v1282_v41  ;;  %v1284_v52 = vld [vmem:[%s2263_s0 + $0x98] sm:$0xff]   ;;  %v1205_v54 = vunpack.c.h.bf16 %v1281_v43  ;;  %v1267_v59 = vld [vmem:[%s2263_s0 + $0x10] sm:$0xff]  }
  0x11   :  { %v158_v55 = vmul.f32 %v1144_v44, %v1638_v46  ;;  %v1152_v57 = vunpack.c.l.bf16 %v1268_v51  ;;  %v1216_v58 = vunpack.c.l.bf16 %v1284_v52  ;;  %v1283_v60 = vld [vmem:[%s2263_s0 + $0x90] sm:$0xff]   ;;  %v1657_v61 = vld [vmem:[%s2265_s4] ss:$0 sm:$0xff]  ;;  %v156_v62 = vmul.f32 %v1140_v47, %v1638_v46 }
  0x12   :  { %v190_v56 = vmul.f32 %v1208_v45, %v1638_v46  ;;  %v188_v63 = vmul.f32 %v1204_v48, %v1638_v46  ;;  %v159_v0 = vmul.f32 %v1145_v49, %v1638_v46  ;;  %v191_v1 = vmul.f32 %v1209_v50, %v1638_v46  ;;  %v1738_v49 = vld [vmem:[%s2263_s0 + $0x30] sm:$0xff]  }
  0x13   :  { %1346 = vmatpush3.bf16.msra.mxu0 %v1437_v6  ;;  %1429 = vmatpush3.bf16.msra.mxu1 %v1437_v6  ;;  %v157_v2 = vmul.f32 %v1141_v53, %v1638_v46  ;;  %v189_v3 = vmul.f32 %v1205_v54, %v1638_v46  ;;  %v1148_v4 = vunpack.c.l.bf16 %v1267_v59  ;;  %v1212_v5 = vunpack.c.l.bf16 %v1283_v60  ;;  %v1743_v50 = vld [vmem:[%s2263_s0 + $0xb0] sm:$0xff]  }
  0x14   :  { %1347 = vmatprep.subr.bf16.mxu0 %v1438_v7  ;;  %1422 = vmatprep.subr.bf16.mxu1 %v1438_v7  ;;  %v1666_v6 = vadd.f32 %v1657_v61, %v158_v55 }
  0x17   :  { %1348 = vmatpush3.bf16.msra.mxu0 %v1438_v7  ;;  %1430 = vmatpush3.bf16.msra.mxu1 %v1438_v7  ;;  %v1669_v7 = vadd.f32 %v1657_v61, %v190_v56 }
  0x18   :  { %1349 = vmatprep.subr.bf16.mxu0 %v1439_v8  ;;  %1423 = vmatprep.subr.bf16.mxu1 %v1439_v8 }
  0x1b   :  { %1350 = vmatpush3.bf16.msra.mxu0 %v1439_v8  ;;  %1431 = vmatpush3.bf16.msra.mxu1 %v1439_v8  ;;  %v162_v8 = vmul.f32 %v1152_v57, %v1638_v46 }
  0x1c   :  { %1351 = vmatprep.subr.bf16.mxu0 %v1440_v9  ;;  %1424 = vmatprep.subr.bf16.mxu1 %v1440_v9 }
  0x1f   :  { %1352 = vmatpush3.bf16.msra.mxu0 %v1440_v9  ;;  %1432 = vmatpush3.bf16.msra.mxu1 %v1440_v9  ;;  %v194_v9 = vmul.f32 %v1216_v58, %v1638_v46 }
  0x22   :  { %1354 = vmatmul.mubr.bf16.vlgmr.msra.gmra.mrb[0].mxu0 %v1443_v10  ;;  %1386 = vmatmul.mubr.bf16.vlgmr.msra.gmra.mrb[0].mxu1 %v1444_v11  ;;  %v1674_v10 = vadd.f32 %v1657_v61, %v156_v62  ;;  %v1677_v11 = vadd.f32 %v1657_v61, %v188_v63  ;;  %v1164_v62 = vunpack.c.l.bf16 %v1738_v49  ;;  %v1228_v63 = vunpack.c.l.bf16 %v1743_v50 }
  0x23   :  { %1357 = vmatprep.mubr.bf16.mxu0 %v1445_v12  ;;  %1389 = vmatprep.mubr.bf16.mxu1 %v1446_v13  ;;  %v1680_v12 = vadd.f32 %v1657_v61, %v159_v0  ;;  %v1683_v13 = vadd.f32 %v1657_v61, %v191_v1 }
  0x2a   :  { %1358 = vmatmul.mubr.bf16.gmra.mrb[4].mxu0 %v1447_v14  ;;  %1390 = vmatmul.mubr.bf16.gmra.mrb[4].mxu1 %v1448_v15  ;;  %v1270_v14 = vld [vmem:[%s2263_s0 + $0x28] sm:$0xff]  }
  0x2b   :  { %1361 = vmatprep.mubr.bf16.mxu0 %v1449_v16  ;;  %1393 = vmatprep.mubr.bf16.mxu1 %v1450_v17  ;;  %v1286_v15 = vld [vmem:[%s2263_s0 + $0xa8] sm:$0xff]   ;;  %v1692_v16 = vadd.f32 %v1657_v61, %v157_v2  ;;  %v1695_v17 = vadd.f32 %v1657_v61, %v189_v3 }
  0x32   :  { %1362 = vmatmul.mubr.bf16.gmra.mrb[8].mxu0 %v1451_v18  ;;  %1394 = vmatmul.mubr.bf16.gmra.mrb[8].mxu1 %v1452_v19  ;;  %v1153_v18 = vunpack.c.h.bf16 %v1268_v51  ;;  %v1217_v19 = vunpack.c.h.bf16 %v1284_v52 }
  0x33   :  { %1365 = vmatprep.mubr.bf16.mxu0 %v1453_v20  ;;  %1397 = vmatprep.mubr.bf16.mxu1 %v1454_v21  ;;  %v1269_v20 = vld [vmem:[%s2263_s0 + $0x20] sm:$0xff]  }
  0x34   :  { %v1285_v21 = vld [vmem:[%s2263_s0 + $0xa0] sm:$0xff]  }
  0x3a   :  { %1366 = vmatmul.mubr.bf16.gmra.mrb[12].mxu0 %v1455_v22  ;;  %1398 = vmatmul.mubr.bf16.gmra.mrb[12].mxu1 %v1456_v23  ;;  %v160_v22 = vmul.f32 %v1148_v4, %v1638_v46  ;;  %v192_v23 = vmul.f32 %v1212_v5, %v1638_v46 }
  0x3b   :  { %1369 = vmatprep.mubr.bf16.mxu0 %v1457_v24  ;;  %1401 = vmatprep.mubr.bf16.mxu1 %v1458_v25  ;;  %v1149_v24 = vunpack.c.h.bf16 %v1267_v59  ;;  %v1213_v25 = vunpack.c.h.bf16 %v1283_v60 }
  0x3c   :  { %v1724_v40 = vadd.f32 %v1657_v61, %v160_v22  ;;  %v1727_v41 = vadd.f32 %v1657_v61, %v192_v23 }
  0x3d   :  { %v161_v42 = vmul.f32 %v1149_v24, %v1638_v46  ;;  %v193_v43 = vmul.f32 %v1213_v25, %v1638_v46  ;;  %v168_v24 = vmul.f32 %v1164_v62, %v1638_v46  ;;  %v200_v25 = vmul.f32 %v1228_v63, %v1638_v46 }
  0x3f   :  { %v1758_v59 = vadd.f32 %v1657_v61, %v161_v42  ;;  %v1761_v60 = vadd.f32 %v1657_v61, %v193_v43  ;;  %v1827_v43 = vld [vmem:[%s2263_s0 + $0xc0] sm:$0xff]   ;;  %v1856_v62 = vadd.f32 %v1657_v61, %v168_v24  ;;  %v1859_v63 = vadd.f32 %v1657_v61, %v200_v25 }
  0x42   :  { %1370 = vmatmul.mubr.bf16.gmra.mrb[16].mxu0 %v1459_v26  ;;  %1402 = vmatmul.mubr.bf16.gmra.mrb[16].mxu1 %v1460_v27  ;;  %v1706_v26 = vadd.f32 %v1657_v61, %v162_v8  ;;  %v1709_v27 = vadd.f32 %v1657_v61, %v194_v9 }
  0x43   :  { %1373 = vmatprep.mubr.bf16.mxu0 %v1461_v28  ;;  %1405 = vmatprep.mubr.bf16.mxu1 %v1462_v29  ;;  %v1160_v28 = vunpack.c.l.bf16 %v1270_v14  ;;  %v1224_v29 = vunpack.c.l.bf16 %v1286_v15 }
  0x45   :  { %v166_v44 = vmul.f32 %v1160_v28, %v1638_v46  ;;  %v198_v45 = vmul.f32 %v1224_v29, %v1638_v46  ;;  %v1165_v28 = vunpack.c.h.bf16 %v1738_v49  ;;  %v1229_v29 = vunpack.c.h.bf16 %v1743_v50 }
  0x47   :  { %v1766_v0 = vadd.f32 %v1657_v61, %v166_v44  ;;  %v1769_v1 = vadd.f32 %v1657_v61, %v198_v45 }
  0x4a   :  { %1374 = vmatmul.mubr.bf16.gmra.mrb[20].mxu0 %v1463_v30  ;;  %1406 = vmatmul.mubr.bf16.gmra.mrb[20].mxu1 %v1464_v31  ;;  %v1156_v30 = vunpack.c.l.bf16 %v1269_v20  ;;  %v1220_v31 = vunpack.c.l.bf16 %v1285_v21 }
  0x4b   :  { %1377 = vmatprep.mubr.bf16.mxu0 %v1465_v32  ;;  %1409 = vmatprep.mubr.bf16.mxu1 %v1466_v33  ;;  %v1161_v32 = vunpack.c.h.bf16 %v1270_v14  ;;  %v1225_v33 = vunpack.c.h.bf16 %v1286_v15 }
  0x4c   :  { %v164_v51 = vmul.f32 %v1156_v30, %v1638_v46  ;;  %v196_v52 = vmul.f32 %v1220_v31, %v1638_v46 }
  0x4d   :  { %v167_v53 = vmul.f32 %v1161_v32, %v1638_v46  ;;  %v199_v54 = vmul.f32 %v1225_v33, %v1638_v46 }
  0x4e   :  { %v1774_v4 = vadd.f32 %v1657_v61, %v164_v51  ;;  %v1777_v5 = vadd.f32 %v1657_v61, %v196_v52 }
  0x4f   :  { %v1780_v8 = vadd.f32 %v1657_v61, %v167_v53  ;;  %v1783_v9 = vadd.f32 %v1657_v61, %v199_v54  ;;  %v1236_v54 = vunpack.c.l.bf16 %v1827_v43 }
  0x52   :  { %1378 = vmatmul.mubr.bf16.gmra.mrb[24].mxu0 %v1467_v34  ;;  %1410 = vmatmul.mubr.bf16.gmra.mrb[24].mxu1 %v1468_v35  ;;  %v1714_v34 = vld [vmem:[%s2263_s0 + $0x38] sm:$0xff]  }
  0x53   :  { %1381 = vmatprep.mubr.bf16.mxu0 %v1469_v36  ;;  %1413 = vmatprep.mubr.bf16.mxu1 %v1470_v37  ;;  %v1719_v35 = vld [vmem:[%s2263_s0 + $0xb8] sm:$0xff]   ;;  %v163_v36 = vmul.f32 %v1153_v18, %v1638_v46  ;;  %v195_v37 = vmul.f32 %v1217_v19, %v1638_v46  ;;  %v1168_v47 = vunpack.c.l.bf16 %v1714_v34  ;;  %v1169_v18 = vunpack.c.h.bf16 %v1714_v34 }
  0x54   :  { %v1232_v48 = vunpack.c.l.bf16 %v1719_v35  ;;  %v1233_v19 = vunpack.c.h.bf16 %v1719_v35 }
  0x55   :  { %v1750_v55 = vadd.f32 %v1657_v61, %v163_v36  ;;  %v1753_v56 = vadd.f32 %v1657_v61, %v195_v37  ;;  %v170_v2 = vmul.f32 %v1168_v47, %v1638_v46 }
  0x56   :  { %v202_v3 = vmul.f32 %v1232_v48, %v1638_v46 }
  0x57   :  { %v1810_v34 = vadd.f32 %v1657_v61, %v170_v2  ;;  %v169_v2 = vmul.f32 %v1165_v28, %v1638_v46 }
  0x58   :  { %v1813_v35 = vadd.f32 %v1657_v61, %v202_v3  ;;  %v201_v3 = vmul.f32 %v1229_v29, %v1638_v46 }
  0x5a   :  { %1382 = vmatmul.mubr.bf16.gmra.mrb[28].mxu0 %v1471_v38  ;;  %1414 = vmatmul.mubr.bf16.gmra.mrb[28].mxu1 %v1472_v39  ;;  %v1157_v38 = vunpack.c.h.bf16 %v1269_v20  ;;  %v1221_v39 = vunpack.c.h.bf16 %v1285_v21  ;;  %v1796_v20 = vld [vmem:[%s2263_s0 + $0x48] sm:$0xff]  }
  0x5b   :  { %v1801_v21 = vld [vmem:[%s2263_s0 + $0xc8] sm:$0xff]   ;;  %v1176_v42 = vunpack.c.l.bf16 %v1796_v20  ;;  %v1177_v24 = vunpack.c.h.bf16 %v1796_v20 }
  0x5c   :  { %v165_v57 = vmul.f32 %v1157_v38, %v1638_v46  ;;  %v197_v58 = vmul.f32 %v1221_v39, %v1638_v46  ;;  %v1241_v25 = vunpack.c.h.bf16 %v1801_v21 }
  0x5e   :  { %v1786_v14 = vadd.f32 %v1657_v61, %v165_v57  ;;  %v1789_v15 = vadd.f32 %v1657_v61, %v197_v58  ;;  %v171_v57 = vmul.f32 %v1169_v18, %v1638_v46  ;;  %v203_v58 = vmul.f32 %v1233_v19, %v1638_v46 }
  0xf5   :  { %v1355_v22 = vpop.f32.mrb[0].mxu0  ;;  %v1387_v23 = vpop.f32.mrb[0].mxu1 }
  0xf6   :  { %v902_v30 = vadd.f32 %v1355_v22, %v1666_v6  ;;  %v934_v31 = vadd.f32 %v1387_v23, %v1669_v7  ;;  %v645_v32 = vpop.f32.mrb[1].mxu0  ;;  %v773_v33 = vpop.f32.mrb[1].mxu1  ;;  %v1240_v6 = vunpack.c.l.bf16 %v1801_v21  ;;  %v1822_v7 = vld [vmem:[%s2263_s0 + $0x40] sm:$0xff]   ;;  %v174_v22 = vmul.f32 %v1176_v42, %v1638_v46 }
  0xf7   :  { %v900_v36 = vadd.f32 %v645_v32, %v1674_v10  ;;  %v932_v37 = vadd.f32 %v773_v33, %v1677_v11  ;;  %v1356_v38 = vpop.f32.mrb[2].mxu0  ;;  %v1388_v39 = vpop.f32.mrb[2].mxu1  ;;  %v204_v33 = vmul.f32 %v1236_v54, %v1638_v46  ;;  %v1173_v20 = vunpack.c.h.bf16 %v1822_v7  ;;  %v1941_v54 = vld [vmem:[%s2263_s0 + $0xd0] sm:$0xff]  }
  0xf8   :  { %v966_v44 = vmax.f32 %v902_v30, 0.0  ;;  %v998_v10 = vmax.f32 %v934_v31, 0.0  ;;  %v903_v11 = vadd.f32 %v1356_v38, %v1680_v12  ;;  %v935_v45 = vadd.f32 %v1388_v39, %v1683_v13  ;;  %v648_v47 = vpop.f32.mrb[3].mxu0  ;;  %v776_v48 = vpop.f32.mrb[3].mxu1 }
  0xf9   :  { %v964_v49 = vmax.f32 %v900_v36, 0.0  ;;  %v996_v50 = vmax.f32 %v932_v37, 0.0  ;;  %v901_v51 = vadd.f32 %v648_v47, %v1692_v16  ;;  %v933_v52 = vadd.f32 %v776_v48, %v1695_v17 }
  0xfa   :  { %1030 = vst [vmem:[%s2266_s5 + $0x10] sm:$0xff] %v966_v44  ;;  %1062 = vst [vmem:[%s2266_s5 + $0x110] sm:$0xff] %v998_v10  ;;  %v967_v53 = vmax.f32 %v903_v11, 0.0  ;;  %v999_v12 = vmax.f32 %v935_v45, 0.0  ;;  %v1172_v13 = vunpack.c.l.bf16 %v1822_v7  ;;  %v206_v23 = vmul.f32 %v1240_v6, %v1638_v46 }
  0xfb   :  { %1028 = vst [vmem:[%s2266_s5] sm:$0xff] %v964_v49  ;;  %1060 = vst [vmem:[%s2266_s5 + $0x100] sm:$0xff] %v996_v50  ;;  %v965_v16 = vmax.f32 %v901_v51, 0.0  ;;  %v997_v17 = vmax.f32 %v933_v52, 0.0  ;;  %v1237_v21 = vunpack.c.h.bf16 %v1827_v43  ;;  %v1895_v43 = vadd.f32 %v1657_v61, %v203_v58  ;;  %v1912_v49 = vld [vmem:[%s2263_s0 + $0x58] sm:$0xff]  }
  0xfc   :  { %1031 = vst [vmem:[%s2266_s5 + $0x18] sm:$0xff] %v967_v53  ;;  %1063 = vst [vmem:[%s2266_s5 + $0x118] sm:$0xff] %v999_v12  ;;  %v172_v32 = vmul.f32 %v1172_v13, %v1638_v46  ;;  %v1904_v47 = vadd.f32 %v1657_v61, %v169_v2  ;;  %v1907_v48 = vadd.f32 %v1657_v61, %v201_v3  ;;  %v1917_v50 = vld [vmem:[%s2263_s0 + $0xd8] sm:$0xff]   ;;  %v1936_v13 = vld [vmem:[%s2263_s0 + $0x50] sm:$0xff]  }
  0xfd   :  { %1029 = vst [vmem:[%s2266_s5 + $0x8] sm:$0xff] %v965_v16  ;;  %1061 = vst [vmem:[%s2266_s5 + $0x108] sm:$0xff] %v997_v17  ;;  %v1359_v18 = vpop.f32.mrb[4].mxu0  ;;  %v1391_v19 = vpop.f32.mrb[4].mxu1  ;;  %v1926_v51 = vadd.f32 %v1657_v61, %v174_v22  ;;  %v1929_v52 = vadd.f32 %v1657_v61, %v206_v23  ;;  %v175_v53 = vmul.f32 %v1177_v24, %v1638_v46  ;;  %v1184_v24 = vunpack.c.l.bf16 %v1912_v49 }
  0xfe   :  { %v906_v28 = vadd.f32 %v1359_v18, %v1706_v26  ;;  %v938_v29 = vadd.f32 %v1391_v19, %v1709_v27  ;;  %v661_v30 = vpop.f32.mrb[5].mxu0  ;;  %v789_v31 = vpop.f32.mrb[5].mxu1  ;;  %v207_v12 = vmul.f32 %v1241_v25, %v1638_v46  ;;  %v1953_v58 = vadd.f32 %v1657_v61, %v204_v33 }
  0xff   :  { %v904_v36 = vadd.f32 %v661_v30, %v1724_v40  ;;  %v936_v37 = vadd.f32 %v789_v31, %v1727_v41  ;;  %v1360_v38 = vpop.f32.mrb[6].mxu0  ;;  %v1392_v39 = vpop.f32.mrb[6].mxu1  ;;  %v173_v2 = vmul.f32 %v1173_v20, %v1638_v46  ;;  %v205_v3 = vmul.f32 %v1237_v21, %v1638_v46 }
 0x100   :  { %v970_v42 = vmax.f32 %v906_v28, 0.0  ;;  %v1002_v26 = vmax.f32 %v938_v29, 0.0  ;;  %v907_v27 = vadd.f32 %v1360_v38, %v1750_v55  ;;  %v939_v6 = vadd.f32 %v1392_v39, %v1753_v56  ;;  %v664_v44 = vpop.f32.mrb[7].mxu0  ;;  %v792_v10 = vpop.f32.mrb[7].mxu1 }
 0x101   :  { %v968_v11 = vmax.f32 %v904_v36, 0.0  ;;  %v1000_v45 = vmax.f32 %v936_v37, 0.0  ;;  %v905_v40 = vadd.f32 %v664_v44, %v1758_v59  ;;  %v937_v41 = vadd.f32 %v792_v10, %v1761_v60 }
 0x102   :  { %1034 = vst [vmem:[%s2266_s5 + $0x30] sm:$0xff] %v970_v42  ;;  %1066 = vst [vmem:[%s2266_s5 + $0x130] sm:$0xff] %v1002_v26  ;;  %v971_v7 = vmax.f32 %v907_v27, 0.0  ;;  %v1003_v55 = vmax.f32 %v939_v6, 0.0  ;;  %v1892_v56 = vadd.f32 %v1657_v61, %v171_v57  ;;  %v1950_v57 = vadd.f32 %v1657_v61, %v172_v32 }
 0x103   :  { %1032 = vst [vmem:[%s2266_s5 + $0x20] sm:$0xff] %v968_v11  ;;  %1064 = vst [vmem:[%s2266_s5 + $0x120] sm:$0xff] %v1000_v45  ;;  %v969_v59 = vmax.f32 %v905_v40, 0.0  ;;  %v1001_v60 = vmax.f32 %v937_v41, 0.0  ;;  %v1248_v25 = vunpack.c.l.bf16 %v1917_v50  ;;  %v1180_v32 = vunpack.c.l.bf16 %v1936_v13  ;;  %v2006_v40 = vld [vmem:[%s2263_s0 + $0x68] sm:$0xff]  }
 0x104   :  { %1035 = vst [vmem:[%s2266_s5 + $0x38] sm:$0xff] %v971_v7  ;;  %1067 = vst [vmem:[%s2266_s5 + $0x138] sm:$0xff] %v1003_v55  ;;  %v1244_v33 = vunpack.c.l.bf16 %v1941_v54  ;;  %v1984_v27 = vadd.f32 %v1657_v61, %v175_v53  ;;  %v1987_v6 = vadd.f32 %v1657_v61, %v207_v12  ;;  %v1996_v44 = vadd.f32 %v1657_v61, %v173_v2  ;;  %v2011_v41 = vld [vmem:[%s2263_s0 + $0xe8] sm:$0xff]  }
 0x105   :  { %1033 = vst [vmem:[%s2266_s5 + $0x28] sm:$0xff] %v969_v59  ;;  %1065 = vst [vmem:[%s2266_s5 + $0x128] sm:$0xff] %v1001_v60  ;;  %v1363_v16 = vpop.f32.mrb[8].mxu0  ;;  %v1395_v17 = vpop.f32.mrb[8].mxu1  ;;  %v210_v26 = vmul.f32 %v1248_v25, %v1638_v46  ;;  %v1999_v10 = vadd.f32 %v1657_v61, %v205_v3  ;;  %v1185_v11 = vunpack.c.h.bf16 %v1912_v49  ;;  %v1249_v45 = vunpack.c.h.bf16 %v1917_v50 }
 0x106   :  { %v910_v18 = vadd.f32 %v1363_v16, %v1766_v0  ;;  %v942_v19 = vadd.f32 %v1395_v17, %v1769_v1  ;;  %v677_v22 = vpop.f32.mrb[9].mxu0  ;;  %v805_v23 = vpop.f32.mrb[9].mxu1  ;;  %v176_v59 = vmul.f32 %v1180_v32, %v1638_v46  ;;  %v208_v60 = vmul.f32 %v1244_v33, %v1638_v46 }
 0x107   :  { %v908_v28 = vadd.f32 %v677_v22, %v1774_v4  ;;  %v940_v29 = vadd.f32 %v805_v23, %v1777_v5  ;;  %v1364_v30 = vpop.f32.mrb[10].mxu0  ;;  %v1396_v31 = vpop.f32.mrb[10].mxu1  ;;  %v1181_v49 = vunpack.c.h.bf16 %v1936_v13  ;;  %v1245_v50 = vunpack.c.h.bf16 %v1941_v54  ;;  %v2043_v23 = vld [vmem:[%s2263_s0 + $0xe0] sm:$0xff]  }
 0x108   :  { %v974_v36 = vmax.f32 %v910_v18, 0.0  ;;  %v1006_v0 = vmax.f32 %v942_v19, 0.0  ;;  %v911_v1 = vadd.f32 %v1364_v30, %v1780_v8  ;;  %v943_v37 = vadd.f32 %v1396_v31, %v1783_v9  ;;  %v680_v38 = vpop.f32.mrb[11].mxu0  ;;  %v808_v39 = vpop.f32.mrb[11].mxu1 }
 0x109   :  { %v972_v20 = vmax.f32 %v908_v28, 0.0  ;;  %v1004_v21 = vmax.f32 %v940_v29, 0.0  ;;  %v909_v4 = vadd.f32 %v680_v38, %v1786_v14  ;;  %v941_v5 = vadd.f32 %v808_v39, %v1789_v15 }
 0x10a   :  { %1038 = vst [vmem:[%s2266_s5 + $0x50] sm:$0xff] %v974_v36  ;;  %1070 = vst [vmem:[%s2266_s5 + $0x150] sm:$0xff] %v1006_v0  ;;  %v975_v42 = vmax.f32 %v911_v1, 0.0  ;;  %v1007_v8 = vmax.f32 %v943_v37, 0.0  ;;  %v178_v9 = vmul.f32 %v1184_v24, %v1638_v46  ;;  %v2029_v3 = vadd.f32 %v1657_v61, %v210_v26 }
 0x10b   :  { %1036 = vst [vmem:[%s2266_s5 + $0x40] sm:$0xff] %v972_v20  ;;  %1068 = vst [vmem:[%s2266_s5 + $0x140] sm:$0xff] %v1004_v21  ;;  %v973_v14 = vmax.f32 %v909_v4, 0.0  ;;  %v1005_v15 = vmax.f32 %v941_v5, 0.0  ;;  %v1192_v54 = vunpack.c.l.bf16 %v2006_v40  ;;  %v1252_v0 = vunpack.c.l.bf16 %v2043_v23 }
 0x10c   :  { %1039 = vst [vmem:[%s2266_s5 + $0x58] sm:$0xff] %v975_v42  ;;  %1071 = vst [vmem:[%s2266_s5 + $0x158] sm:$0xff] %v1007_v8  ;;  %v2026_v2 = vadd.f32 %v1657_v61, %v178_v9  ;;  %v179_v1 = vmul.f32 %v1185_v11, %v1638_v46  ;;  %v211_v37 = vmul.f32 %v1249_v45, %v1638_v46  ;;  %v1193_v9 = vunpack.c.h.bf16 %v2006_v40 }
 0x10d   :  { %1037 = vst [vmem:[%s2266_s5 + $0x48] sm:$0xff] %v973_v14  ;;  %1069 = vst [vmem:[%s2266_s5 + $0x148] sm:$0xff] %v1005_v15  ;;  %v1367_v7 = vpop.f32.mrb[12].mxu0  ;;  %v1399_v55 = vpop.f32.mrb[12].mxu1  ;;  %v2072_v38 = vadd.f32 %v1657_v61, %v176_v59  ;;  %v2075_v39 = vadd.f32 %v1657_v61, %v208_v60  ;;  %v177_v20 = vmul.f32 %v1181_v49, %v1638_v46  ;;  %v1257_v26 = vunpack.c.h.bf16 %v2011_v41 }
 0x10e   :  { %v914_v53 = vadd.f32 %v1367_v7, %v1810_v34  ;;  %v946_v12 = vadd.f32 %v1399_v55, %v1813_v35  ;;  %v693_v16 = vpop.f32.mrb[13].mxu0  ;;  %v821_v17 = vpop.f32.mrb[13].mxu1  ;;  %v1256_v34 = vunpack.c.l.bf16 %v2011_v41  ;;  %v2038_v35 = vld [vmem:[%s2263_s0 + $0x60] sm:$0xff]   ;;  %v209_v21 = vmul.f32 %v1245_v50, %v1638_v46 }
 0x10f   :  { %v912_v18 = vadd.f32 %v693_v16, %v1856_v62  ;;  %v944_v19 = vadd.f32 %v821_v17, %v1859_v63  ;;  %v1368_v22 = vpop.f32.mrb[14].mxu0  ;;  %v1400_v13 = vpop.f32.mrb[14].mxu1  ;;  %v182_v42 = vmul.f32 %v1192_v54, %v1638_v46  ;;  %v212_v55 = vmul.f32 %v1252_v0, %v1638_v46 }
 0x110   :  { %v978_v24 = vmax.f32 %v914_v53, 0.0  ;;  %v1010_v62 = vmax.f32 %v946_v12, 0.0  ;;  %v915_v63 = vadd.f32 %v1368_v22, %v1892_v56  ;;  %v947_v25 = vadd.f32 %v1400_v13, %v1895_v43  ;;  %v696_v28 = vpop.f32.mrb[15].mxu0  ;;  %v824_v29 = vpop.f32.mrb[15].mxu1 }
 0x111   :  { %v976_v30 = vmax.f32 %v912_v18, 0.0  ;;  %v1008_v31 = vmax.f32 %v944_v19, 0.0  ;;  %v913_v32 = vadd.f32 %v696_v28, %v1904_v47  ;;  %v945_v33 = vadd.f32 %v824_v29, %v1907_v48  ;;  %v2140_v28 = vld [vmem:[%s2263_s0 + $0x70] sm:$0xff]  }
 0x112   :  { %1042 = vst [vmem:[%s2266_s5 + $0x70] sm:$0xff] %v978_v24  ;;  %1074 = vst [vmem:[%s2266_s5 + $0x170] sm:$0xff] %v1010_v62  ;;  %v979_v36 = vmax.f32 %v915_v63, 0.0  ;;  %v1011_v56 = vmax.f32 %v947_v25, 0.0  ;;  %v1188_v43 = vunpack.c.l.bf16 %v2038_v35  ;;  %v214_v8 = vmul.f32 %v1256_v34, %v1638_v46  ;;  %v2145_v29 = vld [vmem:[%s2263_s0 + $0xf0] sm:$0xff]  }
 0x113   :  { %1040 = vst [vmem:[%s2266_s5 + $0x60] sm:$0xff] %v976_v30  ;;  %1072 = vst [vmem:[%s2266_s5 + $0x160] sm:$0xff] %v1008_v31  ;;  %v977_v47 = vmax.f32 %v913_v32, 0.0  ;;  %v1009_v48 = vmax.f32 %v945_v33, 0.0  ;;  %v1189_v40 = vunpack.c.h.bf16 %v2038_v35  ;;  %v1253_v41 = vunpack.c.h.bf16 %v2043_v23  ;;  %v2120_v35 = vld [vmem:[%s2263_s0 + $0x78] sm:$0xff]  }
 0x114   :  { %1043 = vst [vmem:[%s2266_s5 + $0x78] sm:$0xff] %v979_v36  ;;  %1075 = vst [vmem:[%s2266_s5 + $0x178] sm:$0xff] %v1011_v56  ;;  %v180_v7 = vmul.f32 %v1188_v43, %v1638_v46  ;;  %v282_v13 = vadd.f32 %v1657_v61, %v211_v37  ;;  %v248_v54 = vadd.f32 %v1657_v61, %v177_v20  ;;  %v2125_v23 = vld [vmem:[%s2263_s0 + $0xf8] sm:$0xff]  }
 0x115   :  { %1041 = vst [vmem:[%s2266_s5 + $0x68] sm:$0xff] %v977_v47  ;;  %1073 = vst [vmem:[%s2266_s5 + $0x168] sm:$0xff] %v1009_v48  ;;  %v1371_v4 = vpop.f32.mrb[16].mxu0  ;;  %v1403_v5 = vpop.f32.mrb[16].mxu1  ;;  %v280_v34 = vadd.f32 %v1657_v61, %v209_v21  ;;  %v253_v24 = vadd.f32 %v1657_v61, %v182_v42  ;;  %v285_v62 = vadd.f32 %v1657_v61, %v214_v8  ;;  %v1264_v37 = vunpack.c.l.bf16 %v2125_v23 }
 0x116   :  { %v918_v14 = vadd.f32 %v1371_v4, %v1926_v51  ;;  %v950_v15 = vadd.f32 %v1403_v5, %v1929_v52  ;;  %v709_v11 = vpop.f32.mrb[17].mxu0  ;;  %v837_v45 = vpop.f32.mrb[17].mxu1  ;;  %v183_v63 = vmul.f32 %v1193_v9, %v1638_v46  ;;  %v215_v25 = vmul.f32 %v1257_v26, %v1638_v46 }
 0x117   :  { %v916_v59 = vadd.f32 %v709_v11, %v1950_v57  ;;  %v948_v60 = vadd.f32 %v837_v45, %v1953_v58  ;;  %v1372_v49 = vpop.f32.mrb[18].mxu0  ;;  %v1404_v50 = vpop.f32.mrb[18].mxu1  ;;  %v251_v32 = vadd.f32 %v1657_v61, %v180_v7  ;;  %v283_v33 = vadd.f32 %v1657_v61, %v212_v55 }
 0x118   :  { %v982_v53 = vmax.f32 %v918_v14, 0.0  ;;  %v1014_v51 = vmax.f32 %v950_v15, 0.0  ;;  %v919_v52 = vadd.f32 %v1372_v49, %v1984_v27  ;;  %v951_v12 = vadd.f32 %v1404_v50, %v1987_v6  ;;  %v712_v16 = vpop.f32.mrb[19].mxu0  ;;  %v840_v17 = vpop.f32.mrb[19].mxu1 }
 0x119   :  { %v980_v18 = vmax.f32 %v916_v59, 0.0  ;;  %v1012_v19 = vmax.f32 %v948_v60, 0.0  ;;  %v917_v57 = vadd.f32 %v712_v16, %v1996_v44  ;;  %v949_v58 = vadd.f32 %v840_v17, %v1999_v10 }
 0x11a   :  { %1046 = vst [vmem:[%s2266_s5 + $0x90] sm:$0xff] %v982_v53  ;;  %1078 = vst [vmem:[%s2266_s5 + $0x190] sm:$0xff] %v1014_v51  ;;  %v983_v22 = vmax.f32 %v919_v52, 0.0  ;;  %v1015_v27 = vmax.f32 %v951_v12, 0.0  ;;  %v250_v6 = vadd.f32 %v1657_v61, %v179_v1  ;;  %v181_v36 = vmul.f32 %v1189_v40, %v1638_v46 }
 0x11b   :  { %1044 = vst [vmem:[%s2266_s5 + $0x80] sm:$0xff] %v980_v18  ;;  %1076 = vst [vmem:[%s2266_s5 + $0x180] sm:$0xff] %v1012_v19  ;;  %v981_v44 = vmax.f32 %v917_v57, 0.0  ;;  %v1013_v10 = vmax.f32 %v949_v58, 0.0  ;;  %v213_v56 = vmul.f32 %v1253_v41, %v1638_v46  ;;  %v1200_v1 = vunpack.c.l.bf16 %v2120_v35 }
 0x11c   :  { %1047 = vst [vmem:[%s2266_s5 + $0x98] sm:$0xff] %v983_v22  ;;  %1079 = vst [vmem:[%s2266_s5 + $0x198] sm:$0xff] %v1015_v27  ;;  %v1196_v42 = vunpack.c.l.bf16 %v2140_v28  ;;  %v1260_v8 = vunpack.c.l.bf16 %v2145_v29  ;;  %v1201_v59 = vunpack.c.h.bf16 %v2120_v35  ;;  %v1265_v60 = vunpack.c.h.bf16 %v2125_v23 }
 0x11d   :  { %1045 = vst [vmem:[%s2266_s5 + $0x88] sm:$0xff] %v981_v44  ;;  %1077 = vst [vmem:[%s2266_s5 + $0x188] sm:$0xff] %v1013_v10  ;;  %v1375_v30 = vpop.f32.mrb[20].mxu0  ;;  %v1407_v31 = vpop.f32.mrb[20].mxu1  ;;  %v1197_v40 = vunpack.c.h.bf16 %v2140_v28  ;;  %v1261_v41 = vunpack.c.h.bf16 %v2145_v29  ;;  %v254_v53 = vadd.f32 %v1657_v61, %v183_v63  ;;  %v286_v51 = vadd.f32 %v1657_v61, %v215_v25 }
 0x11e   :  { %v922_v43 = vadd.f32 %v1375_v30, %v2026_v2  ;;  %v954_v0 = vadd.f32 %v1407_v31, %v2029_v3  ;;  %v725_v47 = vpop.f32.mrb[21].mxu0  ;;  %v853_v48 = vpop.f32.mrb[21].mxu1  ;;  %v252_v52 = vadd.f32 %v1657_v61, %v181_v36  ;;  %v284_v12 = vadd.f32 %v1657_v61, %v213_v56 }
 0x11f   :  { %v920_v20 = vadd.f32 %v725_v47, %v2072_v38  ;;  %v952_v21 = vadd.f32 %v853_v48, %v2075_v39  ;;  %v1376_v4 = vpop.f32.mrb[22].mxu0  ;;  %v1408_v5 = vpop.f32.mrb[22].mxu1  ;;  %v186_v18 = vmul.f32 %v1200_v1, %v1638_v46  ;;  %v218_v19 = vmul.f32 %v1264_v37, %v1638_v46 }
 0x120   :  { %v986_v9 = vmax.f32 %v922_v43, 0.0  ;;  %v1018_v2 = vmax.f32 %v954_v0, 0.0  ;;  %v923_v26 = vadd.f32 %v1376_v4, %v250_v6  ;;  %v955_v3 = vadd.f32 %v1408_v5, %v282_v13  ;;  %v728_v14 = vpop.f32.mrb[23].mxu0  ;;  %v856_v15 = vpop.f32.mrb[23].mxu1 }
 0x121   :  { %v984_v11 = vmax.f32 %v920_v20, 0.0  ;;  %v1016_v45 = vmax.f32 %v952_v21, 0.0  ;;  %v921_v7 = vadd.f32 %v728_v14, %v248_v54  ;;  %v953_v55 = vadd.f32 %v856_v15, %v280_v34 }
 0x122   :  { %1050 = vst [vmem:[%s2266_s5 + $0xb0] sm:$0xff] %v986_v9  ;;  %1082 = vst [vmem:[%s2266_s5 + $0x1b0] sm:$0xff] %v1018_v2  ;;  %v987_v38 = vmax.f32 %v923_v26, 0.0  ;;  %v1019_v39 = vmax.f32 %v955_v3, 0.0  ;;  %v184_v57 = vmul.f32 %v1196_v42, %v1638_v46  ;;  %v216_v58 = vmul.f32 %v1260_v8, %v1638_v46 }
 0x123   :  { %1048 = vst [vmem:[%s2266_s5 + $0xa0] sm:$0xff] %v984_v11  ;;  %1080 = vst [vmem:[%s2266_s5 + $0x1a0] sm:$0xff] %v1016_v45  ;;  %v985_v49 = vmax.f32 %v921_v7, 0.0  ;;  %v1017_v50 = vmax.f32 %v953_v55, 0.0  ;;  %v187_v44 = vmul.f32 %v1201_v59, %v1638_v46  ;;  %v219_v10 = vmul.f32 %v1265_v60, %v1638_v46 }
 0x124   :  { %1051 = vst [vmem:[%s2266_s5 + $0xb8] sm:$0xff] %v987_v38  ;;  %1083 = vst [vmem:[%s2266_s5 + $0x1b8] sm:$0xff] %v1019_v39  ;;  %v185_v63 = vmul.f32 %v1197_v40, %v1638_v46  ;;  %v217_v25 = vmul.f32 %v1261_v41, %v1638_v46  ;;  %v289_v47 = vadd.f32 %v1657_v61, %v218_v19 }
 0x125   :  { %1049 = vst [vmem:[%s2266_s5 + $0xa8] sm:$0xff] %v985_v49  ;;  %1081 = vst [vmem:[%s2266_s5 + $0x1a8] sm:$0xff] %v1017_v50  ;;  %v1379_v16 = vpop.f32.mrb[24].mxu0  ;;  %v1411_v17 = vpop.f32.mrb[24].mxu1  ;;  %v255_v37 = vadd.f32 %v1657_v61, %v184_v57  ;;  %v287_v20 = vadd.f32 %v1657_v61, %v216_v58  ;;  %v258_v21 = vadd.f32 %v1657_v61, %v187_v44 }
 0x126   :  { %v926_v22 = vadd.f32 %v1379_v16, %v253_v24  ;;  %v958_v27 = vadd.f32 %v1411_v17, %v285_v62  ;;  %v741_v6 = vpop.f32.mrb[25].mxu0  ;;  %v869_v13 = vpop.f32.mrb[25].mxu1  ;;  %v290_v4 = vadd.f32 %v1657_v61, %v219_v10  ;;  %v256_v8 = vadd.f32 %v1657_v61, %v185_v63 }
 0x127   :  { %v924_v54 = vadd.f32 %v741_v6, %v251_v32  ;;  %v956_v34 = vadd.f32 %v869_v13, %v283_v33  ;;  %v1380_v35 = vpop.f32.mrb[26].mxu0  ;;  %v1412_v23 = vpop.f32.mrb[26].mxu1  ;;  %v257_v33 = vadd.f32 %v1657_v61, %v186_v18  ;;  %v288_v9 = vadd.f32 %v1657_v61, %v217_v25 }
 0x128   :  { %v990_v28 = vmax.f32 %v926_v22, 0.0  ;;  %v1022_v29 = vmax.f32 %v958_v27, 0.0  ;;  %v927_v30 = vadd.f32 %v1380_v35, %v254_v53  ;;  %v959_v31 = vadd.f32 %v1412_v23, %v286_v51  ;;  %v744_v24 = vpop.f32.mrb[27].mxu0  ;;  %v872_v62 = vpop.f32.mrb[27].mxu1 }
 0x129   :  { %v988_v36 = vmax.f32 %v924_v54, 0.0  ;;  %v1020_v56 = vmax.f32 %v956_v34, 0.0  ;;  %v925_v43 = vadd.f32 %v744_v24, %v252_v52  ;;  %v957_v0 = vadd.f32 %v872_v62, %v284_v12 }
 0x12a   :  { %1054 = vst [vmem:[%s2266_s5 + $0xd0] sm:$0xff] %v990_v28  ;;  %1086 = vst [vmem:[%s2266_s5 + $0x1d0] sm:$0xff] %v1022_v29  ;;  %v991_v32 = vmax.f32 %v927_v30, 0.0  ;;  %v1023_v46 = vmax.f32 %v959_v31, 0.0 }
 0x12b   :  { %1052 = vst [vmem:[%s2266_s5 + $0xc0] sm:$0xff] %v988_v36  ;;  %1084 = vst [vmem:[%s2266_s5 + $0x1c0] sm:$0xff] %v1020_v56  ;;  %v989_v48 = vmax.f32 %v925_v43, 0.0  ;;  %v1021_v1 = vmax.f32 %v957_v0, 0.0 }
 0x12c   :  { %1055 = vst [vmem:[%s2266_s5 + $0xd8] sm:$0xff] %v991_v32  ;;  %1087 = vst [vmem:[%s2266_s5 + $0x1d8] sm:$0xff] %v1023_v46 }
 0x12d   :  { %1053 = vst [vmem:[%s2266_s5 + $0xc8] sm:$0xff] %v989_v48  ;;  %1085 = vst [vmem:[%s2266_s5 + $0x1c8] sm:$0xff] %v1021_v1  ;;  %v1383_v5 = vpop.f32.mrb[28].mxu0  ;;  %v1415_v42 = vpop.f32.mrb[28].mxu1 }
 0x12e   :  { %v930_v2 = vadd.f32 %v1383_v5, %v257_v33  ;;  %v962_v26 = vadd.f32 %v1415_v42, %v289_v47  ;;  %v757_v3 = vpop.f32.mrb[29].mxu0  ;;  %v885_v14 = vpop.f32.mrb[29].mxu1 }
 0x12f   :  { %v928_v15 = vadd.f32 %v757_v3, %v255_v37  ;;  %v960_v11 = vadd.f32 %v885_v14, %v287_v20  ;;  %v1384_v45 = vpop.f32.mrb[30].mxu0  ;;  %v1416_v7 = vpop.f32.mrb[30].mxu1 }
 0x130   :  { %v994_v55 = vmax.f32 %v930_v2, 0.0  ;;  %v1026_v38 = vmax.f32 %v962_v26, 0.0  ;;  %v931_v39 = vadd.f32 %v1384_v45, %v258_v21  ;;  %v963_v59 = vadd.f32 %v1416_v7, %v290_v4  ;;  %v760_v60 = vpop.f32.mrb[31].mxu0  ;;  %v888_v49 = vpop.f32.mrb[31].mxu1 }
 0x131   :  { %v992_v50 = vmax.f32 %v928_v15, 0.0  ;;  %v1024_v40 = vmax.f32 %v960_v11, 0.0  ;;  %v929_v41 = vadd.f32 %v760_v60, %v256_v8  ;;  %v961_v53 = vadd.f32 %v888_v49, %v288_v9 }
 0x132   :  { %1058 = vst [vmem:[%s2266_s5 + $0xf0] sm:$0xff] %v994_v55  ;;  %1090 = vst [vmem:[%s2266_s5 + $0x1f0] sm:$0xff] %v1026_v38  ;;  %v995_v61 = vmax.f32 %v931_v39, 0.0  ;;  %v1027_v51 = vmax.f32 %v963_v59, 0.0 }
 0x133   :  { %1056 = vst [vmem:[%s2266_s5 + $0xe0] sm:$0xff] %v992_v50  ;;  %1088 = vst [vmem:[%s2266_s5 + $0x1e0] sm:$0xff] %v1024_v40  ;;  %v993_v52 = vmax.f32 %v929_v41, 0.0  ;;  %v1025_v12 = vmax.f32 %v961_v53, 0.0 }
 0x134   :  { %1059 = vst [vmem:[%s2266_s5 + $0xf8] sm:$0xff] %v995_v61  ;;  %1091 = vst [vmem:[%s2266_s5 + $0x1f8] sm:$0xff] %v1027_v51 }
 0x135   :  { %1057 = vst [vmem:[%s2266_s5 + $0xe8] sm:$0xff] %v993_v52  ;;  %1089 = vst [vmem:[%s2266_s5 + $0x1e8] sm:$0xff] %v1025_v12 }

// kernel: basic_block_pallas.4
= control target key start
LH: loop header
LB: loop body
LE: loop exit
PB: predicated region body
PF: predicated region fallthrough
CT: control target
= control target key end

     0   :  { %s4075_s18 = smov 0   ;;  %s5238_s0 = inlined_call_operand.vmem [shape: bf16[2,16,16,128], index: 0, kind: input, shape index: {}]   ;;  %s5239_s1 = inlined_call_operand.vmem [shape: f32[1,128], index: 1, kind: input, shape index: {}]   ;;  %s5240_s2 = inlined_call_operand.vmem [shape: f32[1,128], index: 2, kind: input, shape index: {}]   ;;  %s5241_s3 = inlined_call_operand.vmem [shape: bf16[3,384,128], index: 3, kind: input, shape index: {}]   ;;  %s5242_s4 = inlined_call_operand.vmem [shape: bf16[2,16,16,128], index: 4, kind: output, shape index: {0}]   ;;  %s5243_s5 = inlined_call_operand.vmem [shape: f32[2,2,128], index: 5, kind: output, shape index: {1}]  }
   0x1 LB: > { %s2805_s19 = sadd.s32 4294967295, %s4042_s18   ;;  %p2809_p0 = scmp.ge.s32.totalorder %s4042_s18, 1  ;;  %s4042_s18 = sphi %s4075_s18, %s16_s18  }
   0x2   : > { %p190_p1 = scmp.lt.s32.totalorder %s4042_s18, 3 }
   0x4   : > { %p191_p2 = pnand %p2809_p0, %p190_p1 }
   0x5   : > { %v3964_v0 = vld [vmem:[%s5241_s3 + $0x100] sm:$0xff] (!%p191_p2)   ;;  %v3967_v3 = vld [vmem:[%s5241_s3 + $0x108] sm:$0xff] (!%p191_p2)   ;;  %v3970_v6 = vld [vmem:[%s5241_s3 + $0x110] sm:$0xff] (!%p191_p2)   ;;  %p222_p3 = scmp.lt.s32.totalorder (!%p191_p2), %s2805_s19, 1  ;;  %vm562_vm0 = vcmask (!%p191_p2), 1040384   ;;  %vm662_vm1 = vcmask (!%p191_p2), 1047552  }
   0x6   : > { %194 = sbr.rel (%p191_p2) target bundleno = 573 (0x23d), region = 36  ;;  %v4089_v1 = vld [vmem:[%s5241_s3 + $0x140] sm:$0xff] (!%p191_p2)   ;;  %3227 = vmatprep.subr.bf16.mxu0 (!%p191_p2), %v3964_v0  ;;  %v4102_v4 = vld [vmem:[%s5241_s3 + $0x148] sm:$0xff] (!%p191_p2)   ;;  %v4114_v7 = vld [vmem:[%s5241_s3 + $0x150] sm:$0xff] (!%p191_p2)   ;;  %vm663_vm2 = vsmask.f32 (!%p191_p2), 7424 }
   0x7   : > { %v3966_v2 = vld [vmem:[%s5241_s3 + $0xc0] sm:$0xff] (!%p191_p2)   ;;  %3779 = vmatprep.subr.bf16.mxu1 (!%p191_p2), %v4089_v1  ;;  %v3969_v5 = vld [vmem:[%s5241_s3 + $0xc8] sm:$0xff] (!%p191_p2)   ;;  %v3972_v8 = vld [vmem:[%s5241_s3 + $0xd0] sm:$0xff] (!%p191_p2)   ;;  %vm563_vm3 = vsmask.f32 (!%p191_p2), 256 }
   0x8   : > { %3228 = vmatpush3.bf16.msra.mxu0 (!%p191_p2), %v3966_v2  ;;  %3787 = vmatpush3.bf16.msra.mxu1 (!%p191_p2), %v4089_v1  ;;  %v3973_v9 = vld [vmem:[%s5241_s3 + $0x118] sm:$0xff] (!%p191_p2)   ;;  %v3976_v12 = vld [vmem:[%s5241_s3 + $0x120] sm:$0xff] (!%p191_p2)   ;;  %v3979_v15 = vld [vmem:[%s5241_s3 + $0x128] sm:$0xff] (!%p191_p2)  }
   0x9   : > { %3229 = vmatprep.subr.bf16.mxu0 (!%p191_p2), %v3967_v3  ;;  %3780 = vmatprep.subr.bf16.mxu1 (!%p191_p2), %v4102_v4  ;;  %v4127_v10 = vld [vmem:[%s5241_s3 + $0x158] sm:$0xff] (!%p191_p2)   ;;  %v4142_v13 = vld [vmem:[%s5241_s3 + $0x160] sm:$0xff] (!%p191_p2)   ;;  %v4159_v16 = vld [vmem:[%s5241_s3 + $0x168] sm:$0xff] (!%p191_p2)  }
   0xa   : > { %v3975_v11 = vld [vmem:[%s5241_s3 + $0xd8] sm:$0xff] (!%p191_p2)   ;;  %v3978_v14 = vld [vmem:[%s5241_s3 + $0xe0] sm:$0xff] (!%p191_p2)   ;;  %v3981_v17 = vld [vmem:[%s5241_s3 + $0xe8] sm:$0xff] (!%p191_p2)  }
   0xb   : > { %v3982_v18 = vld [vmem:[%s5241_s3 + $0x130] sm:$0xff] (!%p191_p2)   ;;  %v3985_v21 = vld [vmem:[%s5241_s3 + $0x138] sm:$0xff] (!%p191_p2)   ;;  %v4193_v23 = vld [vmem:[%s5239_s1] ss:$0 sm:$0xff] (!%p191_p2) }
   0xc   : > { %3230 = vmatpush3.bf16.msra.mxu0 (!%p191_p2), %v3969_v5  ;;  %3788 = vmatpush3.bf16.msra.mxu1 (!%p191_p2), %v4102_v4  ;;  %v4173_v19 = vld [vmem:[%s5241_s3 + $0x170] sm:$0xff] (!%p191_p2)   ;;  %v4199_v24 = vld [vmem:[%s5241_s3 + $0x178] sm:$0xff] (!%p191_p2)   ;;  %v4206_v29 = vld [vmem:[%s5240_s2] ss:$0 sm:$0xff] (!%p191_p2) }
   0xd   : > { %3231 = vmatprep.subr.bf16.mxu0 %v3970_v6  ;;  %3781 = vmatprep.subr.bf16.mxu1 %v4114_v7  ;;  %s5265_s19 = smov (!%p222_p3, %s2805_s19), 1  ;;  %v3984_v20 = vld [vmem:[%s5241_s3 + $0xf0] sm:$0xff]   ;;  %v3987_v34 = vld [vmem:[%s5241_s3 + $0xf8] sm:$0xff]   ;;  %v3988_v43 = vld [vmem:[%s5241_s3 + $0x40] sm:$0xff]  }
   0xe   : > { %s3019_s6 = sshll.u32 %s5265_s19, 7  ;;  %vm4257_vm4 = vmand %vm562_vm0, %vm563_vm3 }
   0xf   : > { %s4180_s15 = scalar_lea.vmem %s5238_s0, %s3019_s6  ;;  %vm4265_vm5 = vmand %vm662_vm1, %vm663_vm2  ;;  %s5162_s20 = scalar_lea.vmem %s5242_s4, %s3019_s6 }
  0x10   : > { %3232 = vmatpush3.bf16.msra.mxu0 %v3972_v8  ;;  %3789 = vmatpush3.bf16.msra.mxu1 %v4114_v7  ;;  %v3054_v22 = vld [vmem:[%s4180_s15] sm:$0xff]   ;;  %v3205_v28 = vld [vmem:[%s4180_s15 + $0x48] sm:$0xff]   ;;  %v3206_v52 = vld [vmem:[%s4180_s15 + $0x50] sm:$0xff]   ;;  %s2814_s6 = sshll.u32 %s5265_s19, 1 }
  0x11   : > { %3233 = vmatprep.subr.bf16.mxu0 %v3973_v9  ;;  %3782 = vmatprep.subr.bf16.mxu1 %v4127_v10  ;;  %v3055_v25 = vunpack.c.l.bf16 %v3054_v22  ;;  %v3056_v26 = vunpack.c.h.bf16 %v3054_v22  ;;  %v3204_v27 = vld [vmem:[%s4180_s15 + $0x40] sm:$0xff]   ;;  %v3091_v32 = vunpack.c.l.bf16 %v3205_v28  ;;  %v3092_v33 = vunpack.c.h.bf16 %v3205_v28  ;;  %v3197_v47 = vld [vmem:[%s4180_s15 + $0x8] sm:$0xff]   ;;  %v3207_v53 = vld [vmem:[%s4180_s15 + $0x58] sm:$0xff]   ;;  %s235_s22 = scalar_lea.vmem %s5243_s5, %s2814_s6 }
  0x12   : > { %v3087_v30 = vunpack.c.l.bf16 %v3204_v27  ;;  %v3088_v31 = vunpack.c.h.bf16 %v3204_v27  ;;  %v3059_v51 = vunpack.c.l.bf16 %v3197_v47  ;;  %v3060_v57 = vunpack.c.h.bf16 %v3197_v47  ;;  %v4739_v22 = vld [vmem:[%s5241_s3 + $0x200] sm:$0xff]  }
  0x13   : > { %v308_v35 = vmul.f32 %v3055_v25, %v4193_v23  ;;  %v309_v36 = vmul.f32 %v3056_v26, %v4193_v23  ;;  %v326_v39 = vmul.f32 %v3091_v32, %v4193_v23  ;;  %v327_v42 = vmul.f32 %v3092_v33, %v4193_v23 }
  0x14   : > { %3234 = vmatpush3.bf16.msra.mxu0 %v3975_v11  ;;  %3790 = vmatpush3.bf16.msra.mxu1 %v4127_v10  ;;  %v324_v37 = vmul.f32 %v3087_v30, %v4193_v23  ;;  %v325_v38 = vmul.f32 %v3088_v31, %v4193_v23  ;;  %v310_v60 = vmul.f32 %v3059_v51, %v4193_v23  ;;  %v3095_v61 = vunpack.c.l.bf16 %v3206_v52 }
  0x15   : > { %3235 = vmatprep.subr.bf16.mxu0 %v3976_v12  ;;  %3783 = vmatprep.subr.bf16.mxu1 %v4142_v13  ;;  %v347_v40 = vadd.f32 %v4206_v29, %v308_v35  ;;  %v348_v41 = vadd.f32 %v4206_v29, %v309_v36  ;;  %v365_v46 = vadd.f32 %v4206_v29, %v326_v39  ;;  %v3096_v0 = vunpack.c.h.bf16 %v3206_v52 }
  0x16   : > { %v363_v44 = vadd.f32 %v4206_v29, %v324_v37  ;;  %v364_v45 = vadd.f32 %v4206_v29, %v325_v38  ;;  %v366_v50 = vadd.f32 %v4206_v29, %v327_v42  ;;  %v311_v63 = vmul.f32 %v3060_v57, %v4193_v23  ;;  %v3198_v38 = vld [vmem:[%s4180_s15 + $0x10] sm:$0xff]  }
  0x17   : > { %v379_v48 = vmax.f32 %v347_v40, 0.0  ;;  %v380_v49 = vmax.f32 %v348_v41, 0.0  ;;  %v397_v56 = vmax.f32 %v365_v46, 0.0  ;;  %v3099_v2 = vunpack.c.l.bf16 %v3207_v53  ;;  %v3989_v41 = vld [vmem:[%s5241_s3] sm:$0xff]  }
  0x18   : > { %3236 = vmatpush3.bf16.msra.mxu0 %v3978_v14  ;;  %3791 = vmatpush3.bf16.msra.mxu1 %v4142_v13  ;;  %v395_v54 = vmax.f32 %v363_v44, 0.0  ;;  %v396_v55 = vmax.f32 %v364_v45, 0.0  ;;  %v398_v59 = vmax.f32 %v366_v50, 0.0  ;;  %v349_v8 = vadd.f32 %v4206_v29, %v310_v60  ;;  %v3990_v45 = vld [vmem:[%s5241_s3 + $0x48] sm:$0xff]  }
  0x19   : > { %3237 = vmatprep.subr.bf16.mxu0 %v3979_v15  ;;  %3784 = vmatprep.subr.bf16.mxu1 %v4159_v16  ;;  %v4232_v58 = vpack.c.bf16 %v380_v49, %v379_v48  ;;  %v350_v12 = vadd.f32 %v4206_v29, %v311_v63  ;;  %v328_v14 = vmul.f32 %v3095_v61, %v4193_v23  ;;  %v3100_v32 = vunpack.c.h.bf16 %v3207_v53  ;;  %v3208_v49 = vld [vmem:[%s4180_s15 + $0x60] sm:$0xff]   ;;  %v3209_v63 = vld [vmem:[%s4180_s15 + $0x68] sm:$0xff]  }
  0x1a   : > { %v4236_v62 = vpack.c.bf16 %v396_v55, %v395_v54  ;;  %v4242_v6 = vpack.c.bf16 %v398_v59, %v397_v56  ;;  %v329_v26 = vmul.f32 %v3096_v0, %v4193_v23  ;;  %v330_v33 = vmul.f32 %v3099_v2, %v4193_v23  ;;  %v3991_v54 = vld [vmem:[%s5241_s3 + $0x8] sm:$0xff]  }
  0x1b   : > { %1066 = vmatprep.mubr.bf16.mxu0 %v4232_v58  ;;  %v5246_v3 = vshrl.u32 %v4232_v58, 16  ;;  %v5250_v5 = vshll.u32 %v4232_v58, 16  ;;  %v382_v25 = vmax.f32 %v350_v12, 0.0  ;;  %v367_v27 = vadd.f32 %v4206_v29, %v328_v14  ;;  %v3992_v12 = vld [vmem:[%s5241_s3 + $0x50] sm:$0xff]  }
  0x1c   : > { %3238 = vmatpush3.bf16.msra.mxu0 %v3981_v17  ;;  %3792 = vmatpush3.bf16.msra.mxu1 %v4159_v16  ;;  %v491_v9 = vshrl.u32 %v4236_v62, 16  ;;  %v494_v11 = vshll.u32 %v4236_v62, 16  ;;  %v498_v17 = vshrl.u32 %v4242_v6, 16  ;;  %v368_v36 = vadd.f32 %v4206_v29, %v329_v26  ;;  %v3199_v26 = vld [vmem:[%s4180_s15 + $0x18] sm:$0xff]  }
  0x1d   : > { %3239 = vmatprep.subr.bf16.mxu0 %v3982_v18  ;;  %3785 = vmatprep.subr.bf16.mxu1 %v4173_v19  ;;  %v437_v15 = vrot.slane %v5246_v3, 7  ;;  %v501_v18 = vshll.u32 %v4242_v6, 16  ;;  %v399_v37 = vmax.f32 %v367_v27, 0.0  ;;  %v331_v42 = vmul.f32 %v3100_v32, %v4193_v23 }
  0x1e   : > { %v400_v46 = vmax.f32 %v368_v36, 0.0  ;;  %v3063_v53 = vunpack.c.l.bf16 %v3198_v38  ;;  %v3064_v57 = vunpack.c.h.bf16 %v3198_v38  ;;  %v3103_v60 = vunpack.c.l.bf16 %v3208_v49 }
  0x1f   : > { %v440_v30 = vor.u32 %v5250_v5, %v437_v15  ;;  %v632_v31 = vrot.slane %v501_v18, 1  ;;  %v370_v51 = vadd.f32 %v4206_v29, %v331_v42  ;;  %v3104_v61 = vunpack.c.h.bf16 %v3208_v49 }
  0x20   : > { %3240 = vmatpush3.bf16.msra.mxu0 %v3984_v20  ;;  %3793 = vmatpush3.bf16.msra.mxu1 %v4173_v19  ;;  %v381_v20 = vmax.f32 %v349_v8, 0.0  ;;  %v4314_v55 = vpack.c.bf16 %v400_v46, %v399_v37  ;;  %v312_v59 = vmul.f32 %v3063_v53, %v4193_v23  ;;  %v313_v14 = vmul.f32 %v3064_v57, %v4193_v23  ;;  %v3995_v46 = vld [vmem:[%s5241_s3 + $0x18] sm:$0xff]  }
  0x21   : > { %3241 = vmatprep.subr.bf16.mxu0 %v3985_v21  ;;  %3786 = vmatprep.subr.bf16.mxu1 %v4199_v24  ;;  %v630_v21 = vrot.slane %v494_v11, 1  ;;  %v4282_v39 = vsel %vm4257_vm4, 0, %v440_v30  ;;  %v633_v40 = vor.u32 %v632_v31, %v498_v17  ;;  %v3107_v32 = vunpack.c.l.bf16 %v3209_v63 }
  0x22   : > { %v4276_v35 = vpack.c.bf16 %v382_v25, %v381_v20  ;;  %v505_v0 = vshrl.u32 %v4314_v55, 16  ;;  %v508_v2 = vshll.u32 %v4314_v55, 16  ;;  %v351_v20 = vadd.f32 %v4206_v29, %v312_v59  ;;  %v3996_v59 = vld [vmem:[%s5241_s3 + $0x60] sm:$0xff]  }
  0x23   : > { %v4305_v50 = vsel %vm4265_vm5, %v633_v40, 0  ;;  %v333_v25 = vmul.f32 %v3104_v61, %v4193_v23  ;;  %v352_v31 = vadd.f32 %v4206_v29, %v313_v14  ;;  %v3994_v40 = vld [vmem:[%s5241_s3 + $0x58] sm:$0xff]  }
  0x24   : > { %3242 = vmatpush3.bf16.msra.mxu0 %v3987_v34  ;;  %3794 = vmatpush3.bf16.msra.mxu1 %v4199_v24  ;;  %v631_v34 = vor.u32 %v630_v21, %v491_v9  ;;  %v5249_v47 = vshrl.u32 %v4276_v35, 16  ;;  %v445_v48 = vshll.u32 %v4276_v35, 16  ;;  %v332_v21 = vmul.f32 %v3103_v60, %v4193_v23 }
  0x25   : > { %3635 = vmatprep.subr.bf16.mxu0 %v4089_v1  ;;  %3363 = vmatprep.subr.bf16.mxu1 %v3988_v43  ;;  %v369_v43 = vadd.f32 %v4206_v29, %v330_v33  ;;  %v634_v27 = vrot.slane %v508_v2, 1  ;;  %v383_v36 = vmax.f32 %v351_v20, 0.0  ;;  %v372_v42 = vadd.f32 %v4206_v29, %v333_v25  ;;  %v3210_v20 = vld [vmem:[%s4180_s15 + $0x70] sm:$0xff]  }
  0x26   : > { %v4293_v44 = vsel %vm4265_vm5, %v631_v34, 0  ;;  %v444_v56 = vrot.slane %v5249_v47, 7  ;;  %v371_v37 = vadd.f32 %v4206_v29, %v332_v21  ;;  %v3068_v60 = vunpack.c.h.bf16 %v3199_v26  ;;  %v3211_v21 = vld [vmem:[%s4180_s15 + $0x78] sm:$0xff]  }
  0x27   : > { %1067 = vmatmul.mubr.bf16.vlgmr.msra.gmra.mrb[0].mxu0 %v4282_v39  ;;  %3667 = vmatprep.mubr.bf16.mxu1 %v4293_v44  ;;  %v401_v52 = vmax.f32 %v369_v43, 0.0  ;;  %v635_v38 = vor.u32 %v634_v27, %v505_v0  ;;  %v3108_v43 = vunpack.c.h.bf16 %v3209_v63  ;;  %v3997_v27 = vld [vmem:[%s5241_s3 + $0x20] sm:$0xff]  }
  0x28   : > { %3636 = vmatpush3.bf16.msra.mxu0 %v4089_v1  ;;  %3668 = vmatmul.mubr.bf16.vlgmr.msra.gmra.mrb[0].mxu1 %v4305_v50  ;;  %v402_v1 = vmax.f32 %v370_v51, 0.0  ;;  %v447_v8 = vor.u32 %v445_v48, %v444_v56  ;;  %v403_v49 = vmax.f32 %v371_v37, 0.0  ;;  %v334_v51 = vmul.f32 %v3107_v32, %v4193_v23 }
  0x29   : > { %1074 = vmatprep.mubr.bf16.mxu0 %v4276_v35  ;;  %3364 = vmatpush3.bf16.msra.mxu1 %v3989_v41  ;;  %v384_v41 = vmax.f32 %v352_v31, 0.0  ;;  %v4366_v53 = vsel %vm4265_vm5, %v635_v38, 0  ;;  %v404_v56 = vmax.f32 %v372_v42, 0.0  ;;  %v335_v57 = vmul.f32 %v3108_v43, %v4193_v23 }
  0x2a   : > { %3637 = vmatprep.subr.bf16.mxu0 %v4102_v4  ;;  %3365 = vmatprep.subr.bf16.mxu1 %v3990_v45  ;;  %v4329_v15 = vpack.c.bf16 %v402_v1, %v401_v52  ;;  %v4340_v30 = vsel %vm4257_vm4, 0, %v447_v8  ;;  %v3067_v52 = vunpack.c.l.bf16 %v3199_v26  ;;  %v315_v31 = vmul.f32 %v3068_v60, %v4193_v23 }
  0x2b   : > { %3671 = vmatprep.mubr.bf16.mxu1 %v4366_v53  ;;  %v4381_v63 = vpack.c.bf16 %v404_v56, %v403_v49  ;;  %v374_v14 = vadd.f32 %v4206_v29, %v335_v57  ;;  %v3111_v42 = vunpack.c.l.bf16 %v3210_v20  ;;  %v3112_v43 = vunpack.c.h.bf16 %v3210_v20  ;;  %v3999_v56 = vld [vmem:[%s5241_s3 + $0x28] sm:$0xff]  }
  0x2c   : > { %3638 = vmatpush3.bf16.msra.mxu0 %v4102_v4  ;;  %v512_v33 = vshrl.u32 %v4329_v15, 16  ;;  %v515_v34 = vshll.u32 %v4329_v15, 16  ;;  %v3993_v4 = vld [vmem:[%s5241_s3 + $0x10] sm:$0xff]   ;;  %v314_v61 = vmul.f32 %v3067_v52, %v4193_v23  ;;  %v3115_v52 = vunpack.c.l.bf16 %v3211_v21 }
  0x2d   : > { %3639 = vmatprep.subr.bf16.mxu0 %v4114_v7  ;;  %3366 = vmatpush3.bf16.msra.mxu1 %v3991_v54  ;;  %v4368_v54 = vpack.c.bf16 %v384_v41, %v383_v36  ;;  %v522_v36 = vshll.u32 %v4381_v63, 16  ;;  %v406_v38 = vmax.f32 %v374_v14, 0.0  ;;  %v3116_v60 = vunpack.c.h.bf16 %v3211_v21 }
  0x2e   : > { %3367 = vmatprep.subr.bf16.mxu1 %v3992_v12  ;;  %v636_v45 = vrot.slane %v515_v34, 1  ;;  %v353_v32 = vadd.f32 %v4206_v29, %v314_v61 }
  0x2f   : > { %1075 = vmatmul.mubr.bf16.gmra.mrb[4].mxu0 %v4340_v30  ;;  %v5245_v8 = vshrl.u32 %v4368_v54, 16  ;;  %v5248_v12 = vshll.u32 %v4368_v54, 16 }
  0x30   : > { %3640 = vmatpush3.bf16.msra.mxu0 %v4114_v7  ;;  %v637_v1 = vor.u32 %v636_v45, %v512_v33  ;;  %v373_v7 = vadd.f32 %v4206_v29, %v334_v51  ;;  %1082 = vmatprep.mubr.bf16.mxu0 %v4368_v54  ;;  %v385_v41 = vmax.f32 %v353_v32, 0.0  ;;  %v638_v45 = vrot.slane %v522_v36, 1 }
  0x31   : > { %3641 = vmatprep.subr.bf16.mxu0 %v4127_v10  ;;  %3368 = vmatpush3.bf16.msra.mxu1 %v3993_v4  ;;  %v519_v4 = vshrl.u32 %v4381_v63, 16  ;;  %v451_v37 = vrot.slane %v5245_v8, 7  ;;  %v3203_v8 = vld [vmem:[%s4180_s15 + $0x38] sm:$0xff]  }
  0x32   : > { %3369 = vmatprep.subr.bf16.mxu1 %v3994_v40  ;;  %v4390_v25 = vsel %vm4265_vm5, %v637_v1, 0  ;;  %v405_v26 = vmax.f32 %v373_v7, 0.0  ;;  %v3998_v40 = vld [vmem:[%s5241_s3 + $0x68] sm:$0xff]   ;;  %v336_v1 = vmul.f32 %v3111_v42, %v4193_v23  ;;  %v337_v7 = vmul.f32 %v3112_v43, %v4193_v23 }
  0x33   : > { %3672 = vmatmul.mubr.bf16.gmra.mrb[4].mxu1 %v4390_v25  ;;  %v454_v49 = vor.u32 %v5248_v12, %v451_v37  ;;  %v639_v61 = vor.u32 %v638_v45, %v519_v4  ;;  %v3201_v37 = vld [vmem:[%s4180_s15 + $0x28] sm:$0xff]   ;;  %v338_v42 = vmul.f32 %v3115_v52, %v4193_v23 }
  0x34   : > { %3642 = vmatpush3.bf16.msra.mxu0 %v4127_v10  ;;  %v354_v10 = vadd.f32 %v4206_v29, %v315_v31  ;;  %v4412_v51 = vpack.c.bf16 %v406_v38, %v405_v26  ;;  %v4000_v26 = vld [vmem:[%s5241_s3 + $0x70] sm:$0xff]   ;;  %v375_v21 = vadd.f32 %v4206_v29, %v336_v1  ;;  %v376_v31 = vadd.f32 %v4206_v29, %v337_v7 }
  0x35   : > { %3643 = vmatprep.subr.bf16.mxu0 %v4142_v13  ;;  %3370 = vmatpush3.bf16.msra.mxu1 %v3995_v46  ;;  %v3200_v46 = vld [vmem:[%s4180_s15 + $0x20] sm:$0xff]   ;;  %v4441_v38 = vsel %vm4265_vm5, %v639_v61, 0  ;;  %v377_v52 = vadd.f32 %v4206_v29, %v338_v42 }
  0x36   : > { %3371 = vmatprep.subr.bf16.mxu1 %v3996_v59  ;;  %v386_v57 = vmax.f32 %v354_v10, 0.0  ;;  %v4425_v59 = vsel %vm4257_vm4, 0, %v454_v49  ;;  %v526_v14 = vshrl.u32 %v4412_v51, 16  ;;  %v529_v20 = vshll.u32 %v4412_v51, 16  ;;  %3675 = vmatprep.mubr.bf16.mxu1 %v4441_v38 }
  0x37   : > { %1083 = vmatmul.mubr.bf16.gmra.mrb[8].mxu0 %v4425_v59  ;;  %v3071_v32 = vunpack.c.l.bf16 %v3200_v46  ;;  %v408_v43 = vmax.f32 %v376_v31, 0.0  ;;  %v3072_v7 = vunpack.c.h.bf16 %v3200_v46 }
  0x38   : > { %3644 = vmatpush3.bf16.msra.mxu0 %v4142_v13  ;;  %v4434_v13 = vpack.c.bf16 %v386_v57, %v385_v41  ;;  %v640_v10 = vrot.slane %v529_v20, 1  ;;  %v407_v41 = vmax.f32 %v375_v21, 0.0  ;;  %v4001_v57 = vld [vmem:[%s5241_s3 + $0x30] sm:$0xff]   ;;  %v4002_v21 = vld [vmem:[%s5241_s3 + $0x78] sm:$0xff]  }
  0x39   : > { %3645 = vmatprep.subr.bf16.mxu0 %v4159_v16  ;;  %3372 = vmatpush3.bf16.msra.mxu1 %v3997_v27  ;;  %v339_v27 = vmul.f32 %v3116_v60, %v4193_v23  ;;  %v316_v31 = vmul.f32 %v3071_v32, %v4193_v23  ;;  %v317_v42 = vmul.f32 %v3072_v7, %v4193_v23  ;;  %v3076_v7 = vunpack.c.h.bf16 %v3201_v37 }
  0x3a   : > { %3373 = vmatprep.subr.bf16.mxu1 %v3998_v40  ;;  %1090 = vmatprep.mubr.bf16.mxu0 %v4434_v13  ;;  %v5244_v45 = vshrl.u32 %v4434_v13, 16  ;;  %v5247_v49 = vshll.u32 %v4434_v13, 16  ;;  %v641_v40 = vor.u32 %v640_v10, %v526_v14  ;;  %v4459_v60 = vpack.c.bf16 %v408_v43, %v407_v41 }
  0x3b   : > { %v378_v1 = vadd.f32 %v4206_v29, %v339_v27  ;;  %v3075_v10 = vunpack.c.l.bf16 %v3201_v37  ;;  %v3202_v27 = vld [vmem:[%s4180_s15 + $0x30] sm:$0xff]   ;;  %v4011_v37 = vld [vmem:[%s5241_s3 + $0x1c0] sm:$0xff]  }
  0x3c   : > { %3646 = vmatpush3.bf16.msra.mxu0 %v4159_v16  ;;  %v458_v61 = vrot.slane %v5244_v45, 7  ;;  %v4470_v46 = vsel %vm4265_vm5, %v641_v40, 0  ;;  %v409_v16 = vmax.f32 %v377_v52, 0.0  ;;  %v533_v41 = vshrl.u32 %v4459_v60, 16  ;;  %v4003_v40 = vld [vmem:[%s5241_s3 + $0x38] sm:$0xff]  }
  0x3d   : > { %3374 = vmatpush3.bf16.msra.mxu1 %v3999_v56  ;;  %3647 = vmatprep.subr.bf16.mxu0 %v4173_v19  ;;  %v410_v56 = vmax.f32 %v378_v1, 0.0  ;;  %v536_v32 = vshll.u32 %v4459_v60, 16  ;;  %v355_v52 = vadd.f32 %v4206_v29, %v316_v31  ;;  %v318_v45 = vmul.f32 %v3075_v10, %v4193_v23 }
  0x3e   : > { %3375 = vmatprep.subr.bf16.mxu1 %v4000_v26  ;;  %3676 = vmatmul.mubr.bf16.gmra.mrb[8].mxu1 %v4470_v46  ;;  %v461_v43 = vor.u32 %v5247_v49, %v458_v61  ;;  %v356_v26 = vadd.f32 %v4206_v29, %v317_v42  ;;  %v3079_v31 = vunpack.c.l.bf16 %v3202_v27  ;;  %v4508_v42 = vld [vmem:[%s5241_s3 + $0x80] sm:$0xff]  }
  0x3f   : > { %v4483_v1 = vpack.c.bf16 %v410_v56, %v409_v16  ;;  %v642_v3 = vrot.slane %v536_v32, 1  ;;  %v387_v49 = vmax.f32 %v355_v52, 0.0  ;;  %v319_v56 = vmul.f32 %v3076_v7, %v4193_v23 }
  0x40   : > { %3648 = vmatpush3.bf16.msra.mxu0 %v4173_v19  ;;  %v4493_v61 = vsel %vm4257_vm4, 0, %v461_v43  ;;  %v388_v16 = vmax.f32 %v356_v26, 0.0  ;;  %v357_v43 = vadd.f32 %v4206_v29, %v318_v45  ;;  %v3080_v52 = vunpack.c.h.bf16 %v3202_v27 }
  0x41   : > { %3376 = vmatpush3.bf16.msra.mxu1 %v4001_v57  ;;  %3649 = vmatprep.subr.bf16.mxu0 %v4199_v24  ;;  %v540_v19 = vshrl.u32 %v4483_v1, 16  ;;  %v543_v10 = vshll.u32 %v4483_v1, 16  ;;  %v643_v57 = vor.u32 %v642_v3, %v533_v41  ;;  %v320_v12 = vmul.f32 %v3079_v31, %v4193_v23 }
  0x42   : > { %1091 = vmatmul.mubr.bf16.gmra.mrb[12].mxu0 %v4493_v61  ;;  %3377 = vmatprep.subr.bf16.mxu1 %v4002_v21  ;;  %v4514_v21 = vpack.c.bf16 %v388_v16, %v387_v49  ;;  %v358_v26 = vadd.f32 %v4206_v29, %v319_v56  ;;  %v3083_v7 = vunpack.c.l.bf16 %v3203_v8  ;;  %v389_v5 = vmax.f32 %v357_v43, 0.0 }
  0x43   : > { %v644_v47 = vrot.slane %v543_v10, 1  ;;  %v4520_v3 = vsel %vm4265_vm5, %v643_v57, 0  ;;  %v321_v45 = vmul.f32 %v3080_v52, %v4193_v23  ;;  %v359_v27 = vadd.f32 %v4206_v29, %v320_v12 }
  0x44   : > { %3650 = vmatpush3.bf16.msra.mxu0 %v4199_v24  ;;  %3679 = vmatprep.mubr.bf16.mxu1 %v4520_v3  ;;  %v5251_v24 = vshrl.u32 %v4514_v21, 16  ;;  %v466_v31 = vshll.u32 %v4514_v21, 16  ;;  %v390_v16 = vmax.f32 %v358_v26, 0.0  ;;  %v3084_v57 = vunpack.c.h.bf16 %v3203_v8 }
  0x45   : > { %3378 = vmatpush3.bf16.msra.mxu1 %v4003_v40  ;;  %3499 = vmatprep.subr.bf16.mxu0 %v4011_v37  ;;  %v645_v49 = vor.u32 %v644_v47, %v540_v19  ;;  %v360_v40 = vadd.f32 %v4206_v29, %v321_v45  ;;  %v391_v56 = vmax.f32 %v359_v27, 0.0  ;;  %v322_v12 = vmul.f32 %v3083_v7, %v4193_v23 }
  0x46   : > { %1098 = vmatprep.mubr.bf16.mxu0 %v4514_v21  ;;  %3683 = vmatprep.subr.bf16.mxu1 %v4508_v42  ;;  %v465_v47 = vrot.slane %v5251_v24, 7  ;;  %v4539_v43 = vpack.c.bf16 %v390_v16, %v389_v5  ;;  %v493_v52 = vrot.slane %v491_v9, 7  ;;  %v323_v45 = vmul.f32 %v3084_v57, %v4193_v23 }
  0x47   : > { %v4535_v37 = vsel %vm4265_vm5, %v645_v49, 0  ;;  %v392_v26 = vmax.f32 %v360_v40, 0.0  ;;  %v361_v8 = vadd.f32 %v4206_v29, %v322_v12  ;;  %v500_v7 = vrot.slane %v498_v17, 7 }
  0x48   : > { %3680 = vmatmul.mubr.bf16.gmra.mrb[12].mxu1 %v4535_v37  ;;  %v4044_v27 = vmov 0   ;;  %v468_v5 = vor.u32 %v466_v31, %v465_v47  ;;  %v470_v49 = vshrl.u32 %v4539_v43, 16  ;;  %v473_v9 = vshll.u32 %v4539_v43, 16 }
  0x49   : > { %1532 = vmatprep.mubr.bf16.mxu1 %v4044_v27  ;;  %v496_v16 = vor.u32 %v494_v11, %v493_v52  ;;  %v4555_v40 = vpack.c.bf16 %v392_v26, %v391_v56  ;;  %v362_v23 = vadd.f32 %v4206_v29, %v323_v45  ;;  %v393_v57 = vmax.f32 %v361_v8, 0.0 }
  0x4a   : > { %v503_v17 = vor.u32 %v501_v18, %v500_v7  ;;  %v4562_v12 = vsel %vm4257_vm4, 0, %v468_v5  ;;  %v472_v47 = vrot.slane %v470_v49, 7  ;;  %v507_v11 = vrot.slane %v505_v0, 7  ;;  %v4005_v5 = vld [vmem:[%s5241_s3 + $0x88] sm:$0xff]  }
  0x4b   : > { %v4568_v24 = vsel %vm4257_vm4, 0, %v496_v16  ;;  %1099 = vmatmul.mubr.bf16.gmra.mrb[16].mxu0 %v4562_v12  ;;  %v477_v29 = vshrl.u32 %v4555_v40, 16  ;;  %v480_v18 = vshll.u32 %v4555_v40, 16  ;;  %v394_v56 = vmax.f32 %v362_v23, 0.0 }
  0x4c   : > { %v4577_v52 = vsel %vm4257_vm4, 0, %v503_v17  ;;  %1106 = vmatprep.mubr.bf16.mxu0 %v4539_v43  ;;  %v475_v26 = vor.u32 %v473_v9, %v472_v47  ;;  %v510_v45 = vor.u32 %v508_v2, %v507_v11  ;;  %v514_v0 = vrot.slane %v512_v33, 7 }
  0x4d   : > { %v521_v8 = vrot.slane %v519_v4, 7  ;;  %v479_v7 = vrot.slane %v477_v29, 7  ;;  %v4591_v16 = vpack.c.bf16 %v394_v56, %v393_v57  ;;  %v528_v23 = vrot.slane %v526_v14, 7 }
  0x4e   : > { %v535_v2 = vrot.slane %v533_v41, 7  ;;  %v616_v33 = vrot.slane %v445_v48, 1  ;;  %v4601_v4 = vsel %vm4257_vm4, 0, %v510_v45  ;;  %v517_v17 = vor.u32 %v515_v34, %v514_v0 }
  0x4f   : > { %v524_v57 = vor.u32 %v522_v36, %v521_v8  ;;  %v4610_v14 = vsel %vm4257_vm4, 0, %v475_v26  ;;  %v531_v41 = vor.u32 %v529_v20, %v528_v23  ;;  %v542_v47 = vrot.slane %v540_v19, 7 }
  0x50   : > { %1533 = vmatmul.mubr.bf16.vlgmr.msra.gmra.mrb[16].mxu1 %v4044_v27  ;;  %v4618_v48 = vsel %vm4257_vm4, 0, %v517_v17  ;;  %v538_v36 = vor.u32 %v536_v32, %v535_v2  ;;  %v482_v11 = vor.u32 %v480_v18, %v479_v7  ;;  %v484_v20 = vshrl.u32 %v4591_v16, 16 }
  0x51   : > { %3684 = vmatpush3.bf16.msra.mxu1 %v4508_v42  ;;  %1540 = vmatprep.mubr.bf16.mxu1 %v4232_v58  ;;  %v4622_v34 = vsel %vm4257_vm4, 0, %v524_v57  ;;  %v4006_v42 = vld [vmem:[%s5241_s3 + $0x90] sm:$0xff]   ;;  %v4634_v56 = vsel %vm4257_vm4, 0, %v531_v41  ;;  %v5256_v26 = vshll.u32 %v4232_v58, 16  ;;  %v545_v19 = vor.u32 %v543_v10, %v542_v47 }
  0x52   : > { %3685 = vmatprep.subr.bf16.mxu1 %v4005_v5  ;;  %v4640_v32 = vsel %vm4257_vm4, 0, %v538_v36  ;;  %v5257_v0 = vshrl.u32 %v4276_v35, 16  ;;  %v5258_v7 = vshll.u32 %v4368_v54, 16  ;;  %v487_v2 = vshll.u32 %v4591_v16, 16 }
  0x53   : > { %v614_v45 = vrot.slane %v5256_v26, 1  ;;  %1107 = vmatmul.mubr.bf16.gmra.mrb[20].mxu0 %v4610_v14  ;;  %v5259_v17 = vshrl.u32 %v4232_v58, 16  ;;  %v5260_v41 = vshll.u32 %v4434_v13, 16  ;;  %v622_v26 = vrot.slane %v466_v31, 1  ;;  %v4007_v31 = vld [vmem:[%s5241_s3 + $0x98] sm:$0xff]  }
  0x54   : > { %v617_v8 = vor.u32 %v616_v33, %v5257_v0  ;;  %v618_v23 = vrot.slane %v5258_v7, 1  ;;  %1114 = vmatprep.mubr.bf16.mxu0 %v4555_v40  ;;  %v4659_v10 = vsel %vm4257_vm4, 0, %v545_v19  ;;  %v5261_v58 = vshrl.u32 %v4368_v54, 16 }
  0x55   : > { %v615_v57 = vor.u32 %v614_v45, %v5259_v17  ;;  %v620_v36 = vrot.slane %v5260_v41, 1  ;;  %3686 = vmatpush3.bf16.msra.mxu1 %v4005_v5  ;;  %v624_v45 = vrot.slane %v473_v9, 1  ;;  %v5262_v19 = vshrl.u32 %v4434_v13, 16 }
  0x56   : > { %v4663_v33 = vsel %vm4265_vm5, %v617_v8, 0  ;;  %v619_v47 = vor.u32 %v618_v23, %v5261_v58  ;;  %3687 = vmatprep.subr.bf16.mxu1 %v4006_v42  ;;  %v5263_v7 = vshrl.u32 %v4514_v21, 16  ;;  %v626_v23 = vrot.slane %v480_v18, 1 }
  0x57   : > { %v4672_v5 = vsel %vm4265_vm5, %v615_v57, 0  ;;  %v621_v0 = vor.u32 %v620_v36, %v5262_v19  ;;  %v625_v9 = vor.u32 %v624_v45, %v470_v49  ;;  %v628_v41 = vrot.slane %v487_v2, 1  ;;  %v4013_v19 = vld [vmem:[%s5241_s3 + $0x1c8] sm:$0xff]  }
  0x58   : > { %v623_v8 = vor.u32 %v622_v26, %v5263_v7  ;;  %v4680_v17 = vsel %vm4265_vm5, %v619_v47, 0  ;;  %1541 = vmatmul.mubr.bf16.gmra.mrb[20].mxu1 %v4282_v39  ;;  %v4687_v57 = vsel %vm4257_vm4, 0, %v482_v11  ;;  %v486_v58 = vrot.slane %v484_v20, 7  ;;  %v4008_v11 = vld [vmem:[%s5241_s3 + $0xa0] sm:$0xff]   ;;  %v4015_v7 = vld [vmem:[%s5241_s3 + $0x1d0] sm:$0xff]  }
  0x59   : > { %v4691_v36 = vsel %vm4265_vm5, %v621_v0, 0  ;;  %1548 = vmatprep.mubr.bf16.mxu1 %v4276_v35  ;;  %3688 = vmatpush3.bf16.msra.mxu1 %v4006_v42  ;;  %v4700_v49 = vsel %vm4265_vm5, %v625_v9, 0  ;;  %v627_v39 = vor.u32 %v626_v23, %v477_v29  ;;  %v629_v18 = vor.u32 %v628_v41, %v484_v20  ;;  %v4009_v29 = vld [vmem:[%s5241_s3 + $0xa8] sm:$0xff]   ;;  %v4010_v20 = vld [vmem:[%s5241_s3 + $0xb0] sm:$0xff]   ;;  %v4017_v9 = vld [vmem:[%s5241_s3 + $0x1d8] sm:$0xff]  }
  0x5a   : > { %v4695_v26 = vsel %vm4265_vm5, %v623_v8, 0  ;;  %3689 = vmatprep.subr.bf16.mxu1 %v4007_v31  ;;  %v489_v45 = vor.u32 %v487_v2, %v486_v58  ;;  %v4019_v2 = vld [vmem:[%s5241_s3 + $0xb8] sm:$0xff]   ;;  %v4014_v0 = vld [vmem:[%s5241_s3 + $0x188] sm:$0xff]   ;;  %v4016_v8 = vld [vmem:[%s5241_s3 + $0x190] sm:$0xff]  }
  0x5b   : > { %v4709_v47 = vsel %vm4265_vm5, %v627_v39, 0  ;;  %v4713_v42 = vsel %vm4265_vm5, %v629_v18, 0  ;;  %1115 = vmatmul.mubr.bf16.gmra.mrb[24].mxu0 %v4687_v57  ;;  %v4018_v23 = vld [vmem:[%s5241_s3 + $0x198] sm:$0xff]   ;;  %v4020_v41 = vld [vmem:[%s5241_s3 + $0x1e0] sm:$0xff]   ;;  %v4022_v39 = vld [vmem:[%s5241_s3 + $0x1e8] sm:$0xff]  }
  0x5c   : > { %1122 = vmatprep.mubr.bf16.mxu0 %v4591_v16  ;;  %v4724_v28 = vsel %vm4257_vm4, 0, %v489_v45  ;;  %v4021_v58 = vld [vmem:[%s5241_s3 + $0x1a0] sm:$0xff]   ;;  %v4023_v18 = vld [vmem:[%s5241_s3 + $0x1a8] sm:$0xff]   ;;  %v4025_v45 = vld [vmem:[%s5241_s3 + $0x1b0] sm:$0xff]  }
  0x5d   : > { %3690 = vmatpush3.bf16.msra.mxu1 %v4007_v31  ;;  %v4012_v31 = vld [vmem:[%s5241_s3 + $0x180] sm:$0xff]  }
  0x5e   : > { %3691 = vmatprep.subr.bf16.mxu1 %v4008_v11 }
  0x60   : > { %1549 = vmatmul.mubr.bf16.gmra.mrb[24].mxu1 %v4340_v30 }
  0x61   : > { %1556 = vmatprep.mubr.bf16.mxu1 %v4368_v54  ;;  %3692 = vmatpush3.bf16.msra.mxu1 %v4008_v11  ;;  %v4024_v11 = vld [vmem:[%s5241_s3 + $0x1f0] sm:$0xff]  }
  0x62   : > { %3693 = vmatprep.subr.bf16.mxu1 %v4009_v29 }
  0x63   : > { %1123 = vmatmul.mubr.bf16.gmra.mrb[28].mxu0 %v4724_v28 }
  0x64   : > { %1130 = vmatprep.mubr.bf16.mxu0 %v4236_v62 }
  0x65   : > { %3694 = vmatpush3.bf16.msra.mxu1 %v4009_v29  ;;  %v4026_v29 = vld [vmem:[%s5241_s3 + $0x1f8] sm:$0xff]  }
  0x66   : > { %3695 = vmatprep.subr.bf16.mxu1 %v4010_v20 }
  0x68   : > { %1557 = vmatmul.mubr.bf16.gmra.mrb[28].mxu1 %v4425_v59 }
  0x69   : > { %1564 = vmatprep.mubr.bf16.mxu1 %v4434_v13  ;;  %3696 = vmatpush3.bf16.msra.mxu1 %v4010_v20  ;;  %v4027_v20 = vld [vmem:[%s5241_s3 + $0x1b8] sm:$0xff]  }
  0x6a   : > { %3697 = vmatprep.subr.bf16.mxu1 %v4019_v2 }
  0x6b   : > { %1131 = vmatmul.mubr.bf16.gmra.mrb[32].mxu0 %v4568_v24 }
  0x6c   : > { %1138 = vmatprep.mubr.bf16.mxu0 %v4242_v6 }
  0x6d   : > { %3698 = vmatpush3.bf16.msra.mxu1 %v4019_v2  ;;  %v4029_v2 = vld [vmem:[%s5241_s3 + $0x208] sm:$0xff]  }
  0x6e   : > { %3731 = vmatprep.subr.bf16.mxu1 %v4739_v22 }
  0x70   : > { %1565 = vmatmul.mubr.bf16.gmra.mrb[32].mxu1 %v4493_v61 }
  0x71   : > { %1572 = vmatprep.mubr.bf16.mxu1 %v4514_v21 }
  0x73   : > { %1139 = vmatmul.mubr.bf16.gmra.mrb[36].mxu0 %v4577_v52 }
  0x74   : > { %1146 = vmatprep.mubr.bf16.mxu0 %v4314_v55 }
  0x78   : > { %1573 = vmatmul.mubr.bf16.gmra.mrb[36].mxu1 %v4562_v12 }
  0x79   : > { %1580 = vmatprep.mubr.bf16.mxu1 %v4539_v43 }
  0x7b   : > { %1147 = vmatmul.mubr.bf16.gmra.mrb[40].mxu0 %v4601_v4 }
  0x7c   : > { %1154 = vmatprep.mubr.bf16.mxu0 %v4329_v15 }
  0x80   : > { %1581 = vmatmul.mubr.bf16.gmra.mrb[40].mxu1 %v4610_v14 }
  0x81   : > { %1588 = vmatprep.mubr.bf16.mxu1 %v4555_v40 }
  0x83   : > { %1155 = vmatmul.mubr.bf16.gmra.mrb[44].mxu0 %v4618_v48 }
  0x84   : > { %1162 = vmatprep.mubr.bf16.mxu0 %v4381_v63 }
  0x88   : > { %1589 = vmatmul.mubr.bf16.gmra.mrb[44].mxu1 %v4687_v57 }
  0x89   : > { %1596 = vmatprep.mubr.bf16.mxu1 %v4591_v16 }
  0x8b   : > { %1163 = vmatmul.mubr.bf16.gmra.mrb[48].mxu0 %v4622_v34 }
  0x8c   : > { %1170 = vmatprep.mubr.bf16.mxu0 %v4412_v51 }
  0x90   : > { %1597 = vmatmul.mubr.bf16.gmra.mrb[48].mxu1 %v4724_v28 }
  0x91   : > { %1604 = vmatprep.mubr.bf16.mxu1 %v4236_v62 }
  0x93   : > { %1171 = vmatmul.mubr.bf16.gmra.mrb[52].mxu0 %v4634_v56 }
  0x94   : > { %1178 = vmatprep.mubr.bf16.mxu0 %v4459_v60 }
  0x98   : > { %1605 = vmatmul.mubr.bf16.gmra.mrb[52].mxu1 %v4568_v24 }
  0x99   : > { %1612 = vmatprep.mubr.bf16.mxu1 %v4242_v6 }
  0x9b   : > { %1179 = vmatmul.mubr.bf16.gmra.mrb[56].mxu0 %v4640_v32 }
  0x9c   : > { %1186 = vmatprep.mubr.bf16.mxu0 %v4483_v1 }
  0xa0   : > { %1613 = vmatmul.mubr.bf16.gmra.mrb[56].mxu1 %v4577_v52 }
  0xa1   : > { %1620 = vmatprep.mubr.bf16.mxu1 %v4314_v55 }
  0xa3   : > { %1187 = vmatmul.mubr.bf16.gmra.mrb[60].mxu0 %v4659_v10 }
  0xa4   : > { %3651 = vmatprep.mubr.bf16.mxu0 %v4672_v5 }
  0xa8   : > { %1621 = vmatmul.mubr.bf16.gmra.mrb[60].mxu1 %v4601_v4 }
  0xa9   : > { %1628 = vmatprep.mubr.bf16.mxu1 %v4329_v15 }
  0xab   : > { %3652 = vmatmul.mubr.bf16.vlgmr.msra.gmra.mrb[64].mxu0 %v4663_v33 }
  0xac   : > { %3500 = vmatpush3.bf16.msra.mxu0 %v4012_v31  ;;  %3655 = vmatprep.mubr.bf16.mxu0 %v4680_v17 }
  0xad   : > { %3501 = vmatprep.subr.bf16.mxu0 %v4013_v19 }
  0xb0   : > { %1629 = vmatmul.mubr.bf16.gmra.mrb[64].mxu1 %v4618_v48  ;;  %3502 = vmatpush3.bf16.msra.mxu0 %v4014_v0 }
  0xb1   : > { %1636 = vmatprep.mubr.bf16.mxu1 %v4381_v63  ;;  %3503 = vmatprep.subr.bf16.mxu0 %v4015_v7 }
  0xb3   : > { %3656 = vmatmul.mubr.bf16.gmra.mrb[68].mxu0 %v4691_v36 }
  0xb4   : > { %3504 = vmatpush3.bf16.msra.mxu0 %v4016_v8  ;;  %3659 = vmatprep.mubr.bf16.mxu0 %v4695_v26 }
  0xb5   : > { %3505 = vmatprep.subr.bf16.mxu0 %v4017_v9 }
  0xb8   : > { %1637 = vmatmul.mubr.bf16.gmra.mrb[68].mxu1 %v4622_v34  ;;  %3506 = vmatpush3.bf16.msra.mxu0 %v4018_v23 }
  0xb9   : > { %1644 = vmatprep.mubr.bf16.mxu1 %v4412_v51  ;;  %3507 = vmatprep.subr.bf16.mxu0 %v4020_v41 }
  0xbb   : > { %3660 = vmatmul.mubr.bf16.gmra.mrb[72].mxu0 %v4700_v49 }
  0xbc   : > { %3508 = vmatpush3.bf16.msra.mxu0 %v4021_v58  ;;  %3663 = vmatprep.mubr.bf16.mxu0 %v4709_v47 }
  0xbd   : > { %3509 = vmatprep.subr.bf16.mxu0 %v4022_v39 }
  0xc0   : > { %1645 = vmatmul.mubr.bf16.gmra.mrb[72].mxu1 %v4634_v56  ;;  %3510 = vmatpush3.bf16.msra.mxu0 %v4023_v18 }
  0xc1   : > { %1652 = vmatprep.mubr.bf16.mxu1 %v4459_v60  ;;  %3511 = vmatprep.subr.bf16.mxu0 %v4024_v11 }
  0xc3   : > { %3664 = vmatmul.mubr.bf16.gmra.mrb[76].mxu0 %v4713_v42 }
  0xc4   : > { %3512 = vmatpush3.bf16.msra.mxu0 %v4025_v45  ;;  %2096 = vmatprep.mubr.bf16.mxu0 %v4276_v35  ;;  %v4030_v35 = vld [vmem:[%s5241_s3 + $0x210] sm:$0xff]  }
  0xc5   : > { %3513 = vmatprep.subr.bf16.mxu0 %v4026_v29 }
  0xc8   : > { %1653 = vmatmul.mubr.bf16.gmra.mrb[76].mxu1 %v4640_v32  ;;  %3514 = vmatpush3.bf16.msra.mxu0 %v4027_v20 }
  0xc9   : > { %3699 = vmatprep.mubr.bf16.mxu1 %v4044_v27 }
  0xcb   : > { %2097 = vmatmul.mubr.bf16.vlgmr.msra.gmra.mrb[80].mxu0 %v4340_v30  ;;  %v4031_v30 = vld [vmem:[%s5241_s3 + $0x218] sm:$0xff]  }
  0xcc   : > { %2104 = vmatprep.mubr.bf16.mxu0 %v4368_v54  ;;  %v4032_v54 = vld [vmem:[%s5241_s3 + $0x220] sm:$0xff]  }
  0xd0   : > { %3700 = vmatmul.mubr.bf16.vlgmr.msra.gmra.mrb[80].mxu1 %v4672_v5 }
  0xd1   : > { %3732 = vmatpush3.bf16.msra.mxu1 %v4739_v22  ;;  %3703 = vmatprep.mubr.bf16.mxu1 %v4663_v33 }
  0xd2   : > { %3733 = vmatprep.subr.bf16.mxu1 %v4029_v2 }
  0xd3   : > { %2105 = vmatmul.mubr.bf16.gmra.mrb[84].mxu0 %v4425_v59  ;;  %v4033_v59 = vld [vmem:[%s5241_s3 + $0x228] sm:$0xff]  }
  0xd4   : > { %2112 = vmatprep.mubr.bf16.mxu0 %v4434_v13  ;;  %v4034_v13 = vld [vmem:[%s5241_s3 + $0x230] sm:$0xff]  }
  0xd5   : > { %3734 = vmatpush3.bf16.msra.mxu1 %v4029_v2 }
  0xd6   : > { %3735 = vmatprep.subr.bf16.mxu1 %v4030_v35 }
  0xd8   : > { %3704 = vmatmul.mubr.bf16.gmra.mrb[84].mxu1 %v4680_v17 }
  0xd9   : > { %3707 = vmatprep.mubr.bf16.mxu1 %v4691_v36  ;;  %3736 = vmatpush3.bf16.msra.mxu1 %v4030_v35 }
  0xda   : > { %3737 = vmatprep.subr.bf16.mxu1 %v4031_v30 }
  0xdb   : > { %2113 = vmatmul.mubr.bf16.gmra.mrb[88].mxu0 %v4493_v61  ;;  %v4035_v61 = vld [vmem:[%s5241_s3 + $0x238] sm:$0xff]  }
  0xdc   : > { %2120 = vmatprep.mubr.bf16.mxu0 %v4514_v21 }
  0xdd   : > { %3738 = vmatpush3.bf16.msra.mxu1 %v4031_v30 }
  0xde   : > { %3739 = vmatprep.subr.bf16.mxu1 %v4032_v54 }
  0xe0   : > { %3708 = vmatmul.mubr.bf16.gmra.mrb[88].mxu1 %v4695_v26 }
  0xe1   : > { %3711 = vmatprep.mubr.bf16.mxu1 %v4700_v49  ;;  %3740 = vmatpush3.bf16.msra.mxu1 %v4032_v54 }
  0xe2   : > { %3741 = vmatprep.subr.bf16.mxu1 %v4033_v59 }
  0xe3   : > { %2121 = vmatmul.mubr.bf16.gmra.mrb[92].mxu0 %v4562_v12 }
  0xe4   : > { %2128 = vmatprep.mubr.bf16.mxu0 %v4539_v43 }
  0xe5   : > { %3742 = vmatpush3.bf16.msra.mxu1 %v4033_v59 }
  0xe6   : > { %3743 = vmatprep.subr.bf16.mxu1 %v4034_v13 }
  0xe8   : > { %3712 = vmatmul.mubr.bf16.gmra.mrb[92].mxu1 %v4709_v47 }
  0xe9   : > { %3715 = vmatprep.mubr.bf16.mxu1 %v4713_v42  ;;  %3744 = vmatpush3.bf16.msra.mxu1 %v4034_v13 }
  0xea   : > { %3745 = vmatprep.subr.bf16.mxu1 %v4035_v61 }
  0xeb   : > { %2129 = vmatmul.mubr.bf16.gmra.mrb[96].mxu0 %v4610_v14 }
  0xec   : > { %2136 = vmatprep.mubr.bf16.mxu0 %v4555_v40 }
  0xed   : > { %3746 = vmatpush3.bf16.msra.mxu1 %v4035_v61 }
  0xf0   : > { %3716 = vmatmul.mubr.bf16.gmra.mrb[0].mxu1 %v4293_v44 }
  0xf1   : > { %3719 = vmatprep.mubr.bf16.mxu1 %v4305_v50 }
  0xf3   : > { %2137 = vmatmul.mubr.bf16.gmra.mrb[100].mxu0 %v4687_v57 }
  0xf4   : > { %2144 = vmatprep.mubr.bf16.mxu0 %v4591_v16 }
  0xf8   : > { %3720 = vmatmul.mubr.bf16.gmra.mrb[4].mxu1 %v4366_v53 }
  0xf9   : > { %3723 = vmatprep.mubr.bf16.mxu1 %v4390_v25 }
  0xfa   : > { %v3243_v21 = vpop.f32.mrb[0].mxu0 }
  0xfb   : > { %v3244_v43 = vpop.f32.mrb[1].mxu0  ;;  %2145 = vmatmul.mubr.bf16.gmra.mrb[104].mxu0 %v4724_v28 }
  0xfc   : > { %v4881_v12 = vadd.f32 %v3244_v43, %v3243_v21  ;;  %v3246_v14 = vpop.f32.mrb[2].mxu0  ;;  %2152 = vmatprep.mubr.bf16.mxu0 %v4236_v62 }
  0xfd   : > { %v3247_v5 = vpop.f32.mrb[3].mxu0 }
  0xfe   : > { %v4884_v40 = vadd.f32 %v3247_v5, %v3246_v14 }
 0x100   : > { %3724 = vmatmul.mubr.bf16.gmra.mrb[8].mxu1 %v4441_v38 }
 0x101   : > { %3727 = vmatprep.mubr.bf16.mxu1 %v4470_v46 }
 0x102   : > { %v3249_v57 = vpop.f32.mrb[4].mxu0 }
 0x103   : > { %v3250_v16 = vpop.f32.mrb[5].mxu0  ;;  %2153 = vmatmul.mubr.bf16.gmra.mrb[108].mxu0 %v4568_v24 }
 0x104   : > { %v4889_v22 = vadd.f32 %v3250_v16, %v3249_v57  ;;  %v3252_v31 = vpop.f32.mrb[6].mxu0  ;;  %2160 = vmatprep.mubr.bf16.mxu0 %v4242_v6 }
 0x105   : > { %v3253_v19 = vpop.f32.mrb[7].mxu0 }
 0x106   : > { %v4892_v0 = vadd.f32 %v3253_v19, %v3252_v31 }
 0x108   : > { %3728 = vmatmul.mubr.bf16.gmra.mrb[12].mxu1 %v4520_v3 }
 0x109   : > { %3747 = vmatprep.mubr.bf16.mxu1 %v4663_v33 }
 0x10a   : > { %v3255_v62 = vpop.f32.mrb[8].mxu0 }
 0x10b   : > { %2161 = vmatmul.mubr.bf16.gmra.mrb[112].mxu0 %v4577_v52  ;;  %v3256_v28 = vpop.f32.mrb[9].mxu0 }
 0x10c   : > { %v4898_v7 = vadd.f32 %v3256_v28, %v3255_v62  ;;  %v3258_v8 = vpop.f32.mrb[10].mxu0  ;;  %2168 = vmatprep.mubr.bf16.mxu0 %v4314_v55 }
 0x10d   : > { %v3259_v9 = vpop.f32.mrb[11].mxu0 }
 0x10e   : > { %v4901_v23 = vadd.f32 %v3259_v9, %v3258_v8 }
 0x110   : > { %3748 = vmatmul.mubr.bf16.vlgmr.msra.gmra.mrb[80].mxu1 %v4680_v17 }
 0x111   : > { %3751 = vmatprep.mubr.bf16.mxu1 %v4691_v36 }
 0x113   : > { %2169 = vmatmul.mubr.bf16.gmra.mrb[116].mxu0 %v4601_v4 }
 0x114   : > { %2176 = vmatprep.mubr.bf16.mxu0 %v4329_v15 }
 0x115   : > { %v3261_v6 = vpop.f32.mrb[12].mxu0 }
 0x116   : > { %v3262_v24 = vpop.f32.mrb[13].mxu0 }
 0x117   : > { %v4907_v52 = vadd.f32 %v3262_v24, %v3261_v6  ;;  %v3264_v33 = vpop.f32.mrb[14].mxu0 }
 0x118   : > { %v3265_v41 = vpop.f32.mrb[15].mxu0  ;;  %3752 = vmatmul.mubr.bf16.gmra.mrb[84].mxu1 %v4695_v26 }
 0x119   : > { %v4910_v55 = vadd.f32 %v3265_v41, %v3264_v33  ;;  %3755 = vmatprep.mubr.bf16.mxu1 %v4700_v49 }
 0x11b   : > { %2177 = vmatmul.mubr.bf16.gmra.mrb[120].mxu0 %v4618_v48 }
 0x11c   : > { %2184 = vmatprep.mubr.bf16.mxu0 %v4381_v63 }
 0x11e   : > { %v3267_v17 = vpop.f32.mrb[16].mxu0 }
 0x11f   : > { %v3268_v4 = vpop.f32.mrb[17].mxu0 }
 0x120   : > { %3756 = vmatmul.mubr.bf16.gmra.mrb[88].mxu1 %v4709_v47  ;;  %v4916_v36 = vadd.f32 %v3268_v4, %v3267_v17  ;;  %v3270_v15 = vpop.f32.mrb[18].mxu0 }
 0x121   : > { %3759 = vmatprep.mubr.bf16.mxu1 %v4713_v42  ;;  %v3271_v58 = vpop.f32.mrb[19].mxu0 }
 0x122   : > { %v4919_v26 = vadd.f32 %v3271_v58, %v3270_v15 }
 0x123   : > { %v3379_v39 = vpop.f32.mrb[16].mxu1  ;;  %2185 = vmatmul.mubr.bf16.gmra.mrb[124].mxu0 %v4622_v34 }
 0x124   : > { %v3380_v18 = vpop.f32.mrb[17].mxu1  ;;  %2192 = vmatprep.mubr.bf16.mxu0 %v4412_v51 }
 0x125   : > { %v4922_v49 = vadd.f32 %v3380_v18, %v3379_v39  ;;  %v3382_v48 = vpop.f32.mrb[18].mxu1 }
 0x126   : > { %v3383_v63 = vpop.f32.mrb[19].mxu1  ;;  %v3273_v11 = vpop.f32.mrb[20].mxu0 }
 0x127   : > { %v4925_v47 = vadd.f32 %v3383_v63, %v3382_v48  ;;  %v3274_v45 = vpop.f32.mrb[21].mxu0 }
 0x128   : > { %3760 = vmatmul.mubr.bf16.gmra.mrb[92].mxu1 %v4293_v44  ;;  %v4928_v42 = vadd.f32 %v3274_v45, %v3273_v11  ;;  %v3276_v29 = vpop.f32.mrb[22].mxu0 }
 0x129   : > { %3763 = vmatprep.mubr.bf16.mxu1 %v4305_v50  ;;  %v3277_v20 = vpop.f32.mrb[23].mxu0 }
 0x12a   : > { %v4931_v34 = vadd.f32 %v3277_v20, %v3276_v29 }
 0x12b   : > { %v3385_v2 = vpop.f32.mrb[20].mxu1  ;;  %2193 = vmatmul.mubr.bf16.gmra.mrb[128].mxu0 %v4634_v56 }
 0x12c   : > { %v3386_v35 = vpop.f32.mrb[21].mxu1  ;;  %2200 = vmatprep.mubr.bf16.mxu0 %v4459_v60 }
 0x12d   : > { %v4934_v51 = vadd.f32 %v3386_v35, %v3385_v2  ;;  %v3388_v30 = vpop.f32.mrb[22].mxu1 }
 0x12e   : > { %v3389_v54 = vpop.f32.mrb[23].mxu1  ;;  %v3279_v59 = vpop.f32.mrb[24].mxu0 }
 0x12f   : > { %v4937_v44 = vadd.f32 %v3389_v54, %v3388_v30  ;;  %v3280_v13 = vpop.f32.mrb[25].mxu0 }
 0x130   : > { %3764 = vmatmul.mubr.bf16.gmra.mrb[0].mxu1 %v4366_v53  ;;  %v4940_v50 = vadd.f32 %v3280_v13, %v3279_v59  ;;  %v3282_v61 = vpop.f32.mrb[26].mxu0 }
 0x131   : > { %3767 = vmatprep.mubr.bf16.mxu1 %v4390_v25  ;;  %v3283_v21 = vpop.f32.mrb[27].mxu0 }
 0x132   : > { %v4943_v56 = vadd.f32 %v3283_v21, %v3282_v61 }
 0x133   : > { %v3391_v43 = vpop.f32.mrb[24].mxu1  ;;  %2201 = vmatmul.mubr.bf16.gmra.mrb[132].mxu0 %v4640_v32 }
 0x134   : > { %v3392_v14 = vpop.f32.mrb[25].mxu1  ;;  %2208 = vmatprep.mubr.bf16.mxu0 %v4483_v1 }
 0x135   : > { %v4946_v60 = vadd.f32 %v3392_v14, %v3391_v43  ;;  %v3394_v5 = vpop.f32.mrb[26].mxu1 }
 0x136   : > { %v3395_v57 = vpop.f32.mrb[27].mxu1  ;;  %v3285_v16 = vpop.f32.mrb[28].mxu0 }
 0x137   : > { %v4949_v53 = vadd.f32 %v3395_v57, %v3394_v5  ;;  %v3286_v31 = vpop.f32.mrb[29].mxu0 }
 0x138   : > { %3768 = vmatmul.mubr.bf16.gmra.mrb[4].mxu1 %v4441_v38  ;;  %v4952_v25 = vadd.f32 %v3286_v31, %v3285_v16  ;;  %v3288_v19 = vpop.f32.mrb[30].mxu0 }
 0x139   : > { %3771 = vmatprep.mubr.bf16.mxu1 %v4470_v46  ;;  %v3289_v62 = vpop.f32.mrb[31].mxu0 }
 0x13a   : > { %v4955_v32 = vadd.f32 %v3289_v62, %v3288_v19 }
 0x13b   : > { %v3397_v28 = vpop.f32.mrb[28].mxu1  ;;  %2209 = vmatmul.mubr.bf16.gmra.mrb[136].mxu0 %v4659_v10 }
 0x13c   : > { %v3398_v8 = vpop.f32.mrb[29].mxu1  ;;  %2216 = vmatprep.mubr.bf16.mxu0 %v4044_v27 }
 0x13d   : > { %v4958_v1 = vadd.f32 %v3398_v8, %v3397_v28  ;;  %v3400_v9 = vpop.f32.mrb[30].mxu1 }
 0x13e   : > { %v3401_v6 = vpop.f32.mrb[31].mxu1  ;;  %v3291_v24 = vpop.f32.mrb[32].mxu0 }
 0x13f   : > { %v4961_v38 = vadd.f32 %v3401_v6, %v3400_v9  ;;  %v3292_v33 = vpop.f32.mrb[33].mxu0 }
 0x140   : > { %3772 = vmatmul.mubr.bf16.gmra.mrb[8].mxu1 %v4520_v3  ;;  %v3293_v46 = vadd.f32 %v3292_v33, %v3291_v24  ;;  %v3294_v41 = vpop.f32.mrb[34].mxu0 }
 0x141   : > { %3775 = vmatprep.mubr.bf16.mxu1 %v4535_v37  ;;  %v3295_v17 = vpop.f32.mrb[35].mxu0 }
 0x142   : > { %v3296_v15 = vadd.f32 %v3295_v17, %v3294_v41 }
 0x143   : > { %v3403_v4 = vpop.f32.mrb[32].mxu1  ;;  %2217 = vmatmul.mubr.bf16.gmra.mrb[140].mxu0 %v4044_v27 }
 0x144   : > { %v3404_v10 = vpop.f32.mrb[33].mxu1 }
 0x145   : > { %v4966_v58 = vadd.f32 %v3404_v10, %v3403_v4  ;;  %v3406_v39 = vpop.f32.mrb[34].mxu1 }
 0x146   : > { %v3407_v18 = vpop.f32.mrb[35].mxu1  ;;  %v3297_v63 = vpop.f32.mrb[36].mxu0 }
 0x147   : > { %v4968_v48 = vadd.f32 %v3407_v18, %v3406_v39  ;;  %v3298_v3 = vpop.f32.mrb[37].mxu0 }
 0x148   : > { %3776 = vmatmul.mubr.bf16.gmra.mrb[12].mxu1 %v4044_v27  ;;  %v3299_v11 = vadd.f32 %v3298_v3, %v3297_v63  ;;  %v3300_v45 = vpop.f32.mrb[38].mxu0 }
 0x149   : > { %v3301_v29 = vpop.f32.mrb[39].mxu0 }
 0x14a   : > { %v3302_v20 = vadd.f32 %v3301_v29, %v3300_v45 }
 0x14b   : > { %v3409_v37 = vpop.f32.mrb[36].mxu1 }
 0x14c   : > { %v3410_v2 = vpop.f32.mrb[37].mxu1 }
 0x14d   : > { %v4971_v35 = vadd.f32 %v3410_v2, %v3409_v37  ;;  %v3412_v30 = vpop.f32.mrb[38].mxu1 }
 0x14e   : > { %v3413_v54 = vpop.f32.mrb[39].mxu1  ;;  %v3303_v13 = vpop.f32.mrb[40].mxu0 }
 0x14f   : > { %v4973_v59 = vadd.f32 %v3413_v54, %v3412_v30  ;;  %v3304_v61 = vpop.f32.mrb[41].mxu0 }
 0x150   : > { %v3305_v21 = vadd.f32 %v3304_v61, %v3303_v13  ;;  %v3306_v43 = vpop.f32.mrb[42].mxu0 }
 0x151   : > { %v3307_v14 = vpop.f32.mrb[43].mxu0 }
 0x152   : > { %v3308_v27 = vadd.f32 %v3307_v14, %v3306_v43 }
 0x153   : > { %v3415_v5 = vpop.f32.mrb[40].mxu1 }
 0x154   : > { %v3416_v57 = vpop.f32.mrb[41].mxu1 }
 0x155   : > { %v4975_v16 = vadd.f32 %v3416_v57, %v3415_v5  ;;  %v3418_v31 = vpop.f32.mrb[42].mxu1 }
 0x156   : > { %v3419_v19 = vpop.f32.mrb[43].mxu1  ;;  %v3309_v28 = vpop.f32.mrb[44].mxu0 }
 0x157   : > { %v4977_v62 = vadd.f32 %v3419_v19, %v3418_v31  ;;  %v3310_v8 = vpop.f32.mrb[45].mxu0 }
 0x158   : > { %v4979_v9 = vadd.f32 %v3310_v8, %v3309_v28  ;;  %v3312_v6 = vpop.f32.mrb[46].mxu0 }
 0x159   : > { %v3313_v24 = vpop.f32.mrb[47].mxu0 }
 0x15a   : > { %v4981_v41 = vadd.f32 %v3313_v24, %v3312_v6 }
 0x15b   : > { %v3421_v33 = vpop.f32.mrb[44].mxu1 }
 0x15c   : > { %v3422_v17 = vpop.f32.mrb[45].mxu1 }
 0x15d   : > { %v4983_v4 = vadd.f32 %v3422_v17, %v3421_v33  ;;  %v3424_v10 = vpop.f32.mrb[46].mxu1 }
 0x15e   : > { %v3425_v39 = vpop.f32.mrb[47].mxu1  ;;  %v3315_v63 = vpop.f32.mrb[48].mxu0 }
 0x15f   : > { %v4985_v18 = vadd.f32 %v3425_v39, %v3424_v10  ;;  %v3316_v3 = vpop.f32.mrb[49].mxu0 }
 0x160   : > { %v4987_v45 = vadd.f32 %v3316_v3, %v3315_v63  ;;  %v3318_v29 = vpop.f32.mrb[50].mxu0 }
 0x161   : > { %v3319_v37 = vpop.f32.mrb[51].mxu0 }
 0x162   : > { %v4989_v30 = vadd.f32 %v3319_v37, %v3318_v29 }
 0x163   : > { %v3427_v2 = vpop.f32.mrb[48].mxu1 }
 0x164   : > { %v3428_v54 = vpop.f32.mrb[49].mxu1 }
 0x165   : > { %v3429_v13 = vadd.f32 %v3428_v54, %v3427_v2  ;;  %v3430_v61 = vpop.f32.mrb[50].mxu1 }
 0x166   : > { %v3431_v43 = vpop.f32.mrb[51].mxu1  ;;  %v3321_v57 = vpop.f32.mrb[52].mxu0 }
 0x167   : > { %v4991_v14 = vadd.f32 %v3429_v13, %v3293_v46  ;;  %v3432_v5 = vadd.f32 %v3431_v43, %v3430_v61  ;;  %v3322_v31 = vpop.f32.mrb[53].mxu0 }
 0x168   : > { %v4995_v28 = vadd.f32 %v3322_v31, %v3321_v57  ;;  %v3324_v8 = vpop.f32.mrb[54].mxu0 }
 0x169   : > { %v4993_v19 = vadd.f32 %v3432_v5, %v3296_v15  ;;  %v3325_v6 = vpop.f32.mrb[55].mxu0 }
 0x16a   : > { %v4997_v33 = vadd.f32 %v3325_v6, %v3324_v8 }
 0x16b   : > { %v3433_v24 = vpop.f32.mrb[52].mxu1 }
 0x16c   : > { %v3434_v17 = vpop.f32.mrb[53].mxu1 }
 0x16d   : > { %v3435_v10 = vadd.f32 %v3434_v17, %v3433_v24  ;;  %v3436_v39 = vpop.f32.mrb[54].mxu1 }
 0x16e   : > { %v3437_v63 = vpop.f32.mrb[55].mxu1  ;;  %v3327_v29 = vpop.f32.mrb[56].mxu0 }
 0x16f   : > { %v4999_v3 = vadd.f32 %v3435_v10, %v3299_v11  ;;  %v3438_v46 = vadd.f32 %v3437_v63, %v3436_v39  ;;  %v3328_v37 = vpop.f32.mrb[57].mxu0 }
 0x170   : > { %v5003_v15 = vadd.f32 %v3328_v37, %v3327_v29  ;;  %v3330_v54 = vpop.f32.mrb[58].mxu0 }
 0x171   : > { %v5001_v2 = vadd.f32 %v3438_v46, %v3302_v20  ;;  %v3331_v13 = vpop.f32.mrb[59].mxu0 }
 0x172   : > { %v5005_v43 = vadd.f32 %v3331_v13, %v3330_v54 }
 0x173   : > { %v3439_v61 = vpop.f32.mrb[56].mxu1 }
 0x174   : > { %v3440_v5 = vpop.f32.mrb[57].mxu1 }
 0x175   : > { %v3441_v57 = vadd.f32 %v3440_v5, %v3439_v61  ;;  %v3442_v31 = vpop.f32.mrb[58].mxu1 }
 0x176   : > { %v3443_v8 = vpop.f32.mrb[59].mxu1  ;;  %v3333_v24 = vpop.f32.mrb[60].mxu0 }
 0x177   : > { %v5007_v6 = vadd.f32 %v3441_v57, %v3305_v21  ;;  %v3444_v11 = vadd.f32 %v3443_v8, %v3442_v31  ;;  %v3334_v17 = vpop.f32.mrb[61].mxu0 }
 0x178   : > { %v5011_v20 = vadd.f32 %v3334_v17, %v3333_v24  ;;  %v3336_v39 = vpop.f32.mrb[62].mxu0 }
 0x179   : > { %v5009_v10 = vadd.f32 %v3444_v11, %v3308_v27  ;;  %v3337_v63 = vpop.f32.mrb[63].mxu0 }
 0x17a   : > { %v5013_v29 = vadd.f32 %v3337_v63, %v3336_v39 }
 0x17b   : > { %v3445_v46 = vpop.f32.mrb[60].mxu1 }
 0x17c   : > { %v3446_v37 = vpop.f32.mrb[61].mxu1 }
 0x17d   : > { %v3447_v54 = vadd.f32 %v3446_v37, %v3445_v46  ;;  %v3448_v13 = vpop.f32.mrb[62].mxu1 }
 0x17e   : > { %v3449_v61 = vpop.f32.mrb[63].mxu1  ;;  %v3653_v57 = vpop.f32.mrb[64].mxu0 }
 0x17f   : > { %v5016_v5 = vadd.f32 %v3447_v54, %v4979_v9  ;;  %v3450_v21 = vadd.f32 %v3449_v61, %v3448_v13  ;;  %v1238_v31 = vadd.f32 %v3653_v57, %v4889_v22  ;;  %v1229_v27 = vpop.f32.mrb[65].mxu0 }
 0x180   : > { %v1230_v11 = vadd.f32 %v4881_v12, %v1229_v27  ;;  %v3654_v24 = vpop.f32.mrb[66].mxu0 }
 0x181   : > { %v5020_v8 = vadd.f32 %v3450_v21, %v4981_v41  ;;  %v5024_v17 = vadd.f32 %v4934_v51, %v1238_v31  ;;  %v1241_v39 = vadd.f32 %v3654_v24, %v4892_v0  ;;  %v1232_v63 = vpop.f32.mrb[67].mxu0 }
 0x182   : > { %v5028_v9 = vadd.f32 %v4922_v49, %v1230_v11  ;;  %v1233_v37 = vadd.f32 %v4884_v40, %v1232_v63 }
 0x183   : > { %v3451_v46 = vpop.f32.mrb[64].mxu1  ;;  %v5032_v54 = vadd.f32 %v4937_v44, %v1241_v39 }
 0x184   : > { %v3452_v22 = vpop.f32.mrb[65].mxu1  ;;  %v5035_v12 = vadd.f32 %v4925_v47, %v1233_v37 }
 0x185   : > { %v3453_v41 = vadd.f32 %v3452_v22, %v3451_v46  ;;  %v3454_v13 = vpop.f32.mrb[66].mxu1 }
 0x186   : > { %v3455_v51 = vpop.f32.mrb[67].mxu1  ;;  %v3657_v21 = vpop.f32.mrb[68].mxu0 }
 0x187   : > { %v5038_v61 = vadd.f32 %v3453_v41, %v4987_v45  ;;  %v3456_v0 = vadd.f32 %v3455_v51, %v3454_v13  ;;  %v1254_v49 = vadd.f32 %v3657_v21, %v4907_v52  ;;  %v1245_v57 = vpop.f32.mrb[69].mxu0 }
 0x188   : > { %v1246_v44 = vadd.f32 %v4898_v7, %v1245_v57  ;;  %v3658_v31 = vpop.f32.mrb[70].mxu0 }
 0x189   : > { %v5042_v40 = vadd.f32 %v3456_v0, %v4989_v30  ;;  %v5046_v27 = vadd.f32 %v4958_v1, %v1254_v49  ;;  %v1257_v47 = vadd.f32 %v3658_v31, %v4910_v55  ;;  %v1248_v11 = vpop.f32.mrb[71].mxu0 }
 0x18a   : > { %v5050_v45 = vadd.f32 %v4946_v60, %v1246_v44  ;;  %v1249_v39 = vadd.f32 %v4901_v23, %v1248_v11 }
 0x18b   : > { %v3457_v24 = vpop.f32.mrb[68].mxu1  ;;  %v5054_v63 = vadd.f32 %v4961_v38, %v1257_v47 }
 0x18c   : > { %v3458_v52 = vpop.f32.mrb[69].mxu1  ;;  %v5057_v7 = vadd.f32 %v4949_v53, %v1249_v39 }
 0x18d   : > { %v3459_v30 = vadd.f32 %v3458_v52, %v3457_v24  ;;  %v3460_v46 = vpop.f32.mrb[70].mxu1 }
 0x18e   : > { %v3461_v1 = vpop.f32.mrb[71].mxu1  ;;  %v3661_v22 = vpop.f32.mrb[72].mxu0 }
 0x18f   : > { %v5060_v37 = vadd.f32 %v3459_v30, %v4995_v28  ;;  %v3462_v55 = vadd.f32 %v3461_v1, %v3460_v46  ;;  %v1270_v60 = vadd.f32 %v3661_v22, %v4928_v42  ;;  %v1261_v41 = vpop.f32.mrb[73].mxu0 }
 0x190   : > { %v1262_v38 = vadd.f32 %v4916_v36, %v1261_v41  ;;  %v3662_v13 = vpop.f32.mrb[74].mxu0 }
 0x191   : > { %v5064_v23 = vadd.f32 %v3462_v55, %v4997_v33  ;;  %v5068_v51 = vadd.f32 %v4971_v35, %v1270_v60  ;;  %v1273_v53 = vadd.f32 %v3662_v13, %v4931_v34  ;;  %v1264_v0 = vpop.f32.mrb[75].mxu0 }
 0x192   : > { %v5072_v28 = vadd.f32 %v4966_v58, %v1262_v38  ;;  %v1265_v49 = vadd.f32 %v4919_v26, %v1264_v0 }
 0x193   : > { %v3463_v21 = vpop.f32.mrb[72].mxu1  ;;  %v5076_v57 = vadd.f32 %v4973_v59, %v1273_v53 }
 0x194   : > { %v3464_v42 = vpop.f32.mrb[73].mxu1  ;;  %v5079_v36 = vadd.f32 %v4968_v48, %v1265_v49 }
 0x195   : > { %v3465_v33 = vadd.f32 %v3464_v42, %v3463_v21  ;;  %v3466_v44 = vpop.f32.mrb[74].mxu1 }
 0x196   : > { %v3467_v35 = vpop.f32.mrb[75].mxu1  ;;  %v3665_v47 = vpop.f32.mrb[76].mxu0 }
 0x197   : > { %v5082_v31 = vadd.f32 %v3465_v33, %v5003_v15  ;;  %v3468_v34 = vadd.f32 %v3467_v35, %v3466_v44  ;;  %v1286_v58 = vadd.f32 %v3665_v47, %v4952_v25  ;;  %v1277_v11 = vpop.f32.mrb[77].mxu0 }
 0x198   : > { %v1278_v59 = vadd.f32 %v4940_v50, %v1277_v11  ;;  %v3666_v24 = vpop.f32.mrb[78].mxu0 }
 0x199   : > { %v5086_v26 = vadd.f32 %v3468_v34, %v5005_v43  ;;  %v5090_v39 = vadd.f32 %v4983_v4, %v1286_v58  ;;  %v1289_v48 = vadd.f32 %v3666_v24, %v4955_v32  ;;  %v1280_v52 = vpop.f32.mrb[79].mxu0 }
 0x19a   : > { %v5094_v15 = vadd.f32 %v4975_v16, %v1278_v59  ;;  %v1281_v46 = vadd.f32 %v4943_v56, %v1280_v52 }
 0x19b   : > { %v3469_v30 = vpop.f32.mrb[76].mxu1  ;;  %v5098_v1 = vadd.f32 %v4985_v18, %v1289_v48 }
 0x19c   : > { %v3470_v25 = vpop.f32.mrb[77].mxu1  ;;  %v1586_v50 = vadd.f32 %v4977_v62, %v1281_v46 }
 0x19d   : > { %v3471_v43 = vadd.f32 %v3470_v25, %v3469_v30  ;;  %v3472_v55 = vpop.f32.mrb[78].mxu1 }
 0x19e   : > { %v3473_v22 = vpop.f32.mrb[79].mxu1  ;;  %v3515_v60 = vpop.f32.mrb[80].mxu0 }
 0x19f   : > { %v5102_v4 = vadd.f32 %v3471_v43, %v5011_v20  ;;  %v3474_v32 = vadd.f32 %v3473_v22, %v3472_v55  ;;  %v3516_v41 = vpop.f32.mrb[81].mxu0 }
 0x1a0   : > { %v3517_v38 = vadd.f32 %v3516_v41, %v3515_v60  ;;  %v3518_v56 = vpop.f32.mrb[82].mxu0 }
 0x1a1   : > { %v5105_v16 = vadd.f32 %v3474_v32, %v5013_v29  ;;  %v3519_v13 = vpop.f32.mrb[83].mxu0 }
 0x1a2   : > { %v3520_v53 = vadd.f32 %v3519_v13, %v3518_v56  ;;  %v5108_v18 = vadd.f32 %v3517_v38, %v5028_v9 }
 0x1a4   : > { %v5111_v0 = vadd.f32 %v3520_v53, %v5035_v12 }
 0x1a6   : > { %v3521_v62 = vpop.f32.mrb[84].mxu0 }
 0x1a7   : > { %v3522_v21 = vpop.f32.mrb[85].mxu0 }
 0x1a8   : > { %v3523_v20 = vadd.f32 %v3522_v21, %v3521_v62  ;;  %v3524_v49 = vpop.f32.mrb[86].mxu0 }
 0x1a9   : > { %v3525_v42 = vpop.f32.mrb[87].mxu0 }
 0x1aa   : > { %v3526_v33 = vadd.f32 %v3525_v42, %v3524_v49  ;;  %v3797_v44 = vadd.f32 %v3523_v20, %v5024_v17 }
 0x1ac   : > { %v3805_v29 = vadd.f32 %v3526_v33, %v5032_v54 }
 0x1ae   : > { %v3527_v35 = vpop.f32.mrb[88].mxu0 }
 0x1af   : > { %v3528_v34 = vpop.f32.mrb[89].mxu0 }
 0x1b0   : > { %v3529_v47 = vadd.f32 %v3528_v34, %v3527_v35  ;;  %v3530_v58 = vpop.f32.mrb[90].mxu0 }
 0x1b1   : > { %v3531_v11 = vpop.f32.mrb[91].mxu0 }
 0x1b2   : > { %v3532_v9 = vadd.f32 %v3531_v11, %v3530_v58  ;;  %v5116_v59 = vadd.f32 %v3529_v47, %v5050_v45 }
 0x1b4   : > { %v5119_v12 = vadd.f32 %v3532_v9, %v5057_v7 }
 0x1b6   : > { %v3533_v24 = vpop.f32.mrb[92].mxu0 }
 0x1b7   : > { %v3534_v48 = vpop.f32.mrb[93].mxu0 }
 0x1b8   : > { %v3535_v52 = vadd.f32 %v3534_v48, %v3533_v24  ;;  %v3536_v30 = vpop.f32.mrb[94].mxu0 }
 0x1b9   : > { %v3537_v46 = vpop.f32.mrb[95].mxu0 }
 0x1ba   : > { %v3538_v17 = vadd.f32 %v3537_v46, %v3536_v30  ;;  %v5122_v54 = vadd.f32 %v3535_v52, %v5046_v27 }
 0x1bc   : > { %v5125_v25 = vadd.f32 %v3538_v17, %v5054_v63 }
 0x1be   : > { %v3539_v43 = vpop.f32.mrb[96].mxu0 }
 0x1bf   : > { %v3540_v55 = vpop.f32.mrb[97].mxu0 }
 0x1c0   : > { %v3541_v22 = vadd.f32 %v3540_v55, %v3539_v43  ;;  %v3542_v45 = vpop.f32.mrb[98].mxu0 }
 0x1c1   : > { %v3543_v32 = vpop.f32.mrb[99].mxu0 }
 0x1c2   : > { %v3544_v60 = vadd.f32 %v3543_v32, %v3542_v45  ;;  %v5128_v7 = vadd.f32 %v3541_v22, %v5072_v28 }
 0x1c4   : > { %v5131_v41 = vadd.f32 %v3544_v60, %v5079_v36 }
 0x1c6   : > { %v3545_v38 = vpop.f32.mrb[100].mxu0 }
 0x1c7   : > { %v3546_v56 = vpop.f32.mrb[101].mxu0 }
 0x1c8   : > { %v3547_v13 = vadd.f32 %v3546_v56, %v3545_v38  ;;  %v3548_v27 = vpop.f32.mrb[102].mxu0 }
 0x1c9   : > { %v3549_v53 = vpop.f32.mrb[103].mxu0 }
 0x1ca   : > { %v3550_v62 = vadd.f32 %v3549_v53, %v3548_v27  ;;  %v5134_v63 = vadd.f32 %v3547_v13, %v5068_v51 }
 0x1cc   : > { %v5137_v21 = vadd.f32 %v3550_v62, %v5076_v57 }
 0x1ce   : > { %v3551_v20 = vpop.f32.mrb[104].mxu0 }
 0x1cf   : > { %v3552_v49 = vpop.f32.mrb[105].mxu0 }
 0x1d0   : > { %v3553_v42 = vadd.f32 %v3552_v49, %v3551_v20  ;;  %v3554_v28 = vpop.f32.mrb[106].mxu0 }
 0x1d1   : > { %v3555_v33 = vpop.f32.mrb[107].mxu0 }
 0x1d2   : > { %v3556_v35 = vadd.f32 %v3555_v33, %v3554_v28  ;;  %v5140_v36 = vadd.f32 %v3553_v42, %v5094_v15 }
 0x1d4   : > { %v5142_v34 = vadd.f32 %v3556_v35, %v1586_v50 }
 0x1d6   : > { %v3557_v47 = vpop.f32.mrb[108].mxu0 }
 0x1d7   : > { %v3558_v58 = vpop.f32.mrb[109].mxu0 }
 0x1d8   : > { %v3559_v11 = vadd.f32 %v3558_v58, %v3557_v47  ;;  %v3560_v9 = vpop.f32.mrb[110].mxu0 }
 0x1d9   : > { %v3561_v51 = vpop.f32.mrb[111].mxu0 }
 0x1da   : > { %v3562_v24 = vadd.f32 %v3561_v51, %v3560_v9  ;;  %v5145_v57 = vadd.f32 %v3559_v11, %v5090_v39 }
 0x1dc   : > { %v5148_v48 = vadd.f32 %v3562_v24, %v5098_v1 }
 0x1de   : > { %v3563_v52 = vpop.f32.mrb[112].mxu0 }
 0x1df   : > { %v3564_v30 = vpop.f32.mrb[113].mxu0 }
 0x1e0   : > { %v3565_v46 = vadd.f32 %v3564_v30, %v3563_v52  ;;  %v3566_v15 = vpop.f32.mrb[114].mxu0 }
 0x1e1   : > { %v3567_v17 = vpop.f32.mrb[115].mxu0 }
 0x1e2   : > { %v3568_v43 = vadd.f32 %v3567_v17, %v3566_v15  ;;  %v5151_v55 = vadd.f32 %v4991_v14, %v3565_v46 }
 0x1e3   : > { %v3749_v50 = vpop.f32.mrb[80].mxu1 }
 0x1e4   : > { %v3798_v22 = vadd.f32 %v3797_v44, %v3749_v50  ;;  %v2259_v45 = vpop.f32.mrb[81].mxu1  ;;  %v5155_v60 = vadd.f32 %v4993_v19, %v3568_v43 }
 0x1e5   : > { %v3802_v32 = vadd.f32 %v5108_v18, %v2259_v45  ;;  %v3750_v39 = vpop.f32.mrb[82].mxu1 }
 0x1e6   : > { %v3806_v1 = vadd.f32 %v3805_v29, %v3750_v39  ;;  %v2262_v38 = vpop.f32.mrb[83].mxu1  ;;  %v3569_v44 = vpop.f32.mrb[116].mxu0 }
 0x1e7   : > { %v3810_v14 = vadd.f32 %v5111_v0, %v2262_v38  ;;  %v3570_v13 = vpop.f32.mrb[117].mxu0 }
 0x1e8   : > { %v2419_v56 = vpack.c.bf16 %v3806_v1, %v3798_v22  ;;  %v3571_v27 = vadd.f32 %v3570_v13, %v3569_v44  ;;  %v3572_v53 = vpop.f32.mrb[118].mxu0 }
 0x1e9   : > { %v2418_v18 = vpack.c.bf16 %v3810_v14, %v3802_v32  ;;  %v3573_v29 = vpop.f32.mrb[119].mxu0 }
 0x1ea   : > { %3212 = vst [vmem:[%s5162_s20 + $0x8] sm:$0xff] %v2419_v56   ;;  %v2580_v19 = vunpack.c.l.bf16 %v2419_v56  ;;  %v3574_v42 = vadd.f32 %v3573_v29, %v3572_v53  ;;  %v5168_v28 = vadd.f32 %v4999_v3, %v3571_v27  ;;  %v2581_v33 = vunpack.c.h.bf16 %v2419_v56 }
 0x1eb   : > { %3121 = vst [vmem:[%s5162_s20] sm:$0xff] %v2418_v18   ;;  %v2578_v62 = vunpack.c.l.bf16 %v2418_v18  ;;  %v2579_v20 = vunpack.c.h.bf16 %v2418_v18  ;;  %v3753_v49 = vpop.f32.mrb[84].mxu1 }
 0x1ec   : > { %v3814_v0 = vadd.f32 %v5122_v54, %v3753_v49  ;;  %v2275_v35 = vpop.f32.mrb[85].mxu1  ;;  %v5174_v30 = vadd.f32 %v5001_v2, %v3574_v42  ;;  %v2649_v3 = vmul.f32 %v2580_v19, %v2580_v19  ;;  %v2650_v50 = vmul.f32 %v2581_v33, %v2581_v33 }
 0x1ed   : > { %v2610_v47 = vadd.f32 %v2579_v20, %v2578_v62  ;;  %v2647_v58 = vmul.f32 %v2578_v62, %v2578_v62  ;;  %v2648_v11 = vmul.f32 %v2579_v20, %v2579_v20  ;;  %v3818_v9 = vadd.f32 %v5116_v59, %v2275_v35  ;;  %v3754_v51 = vpop.f32.mrb[86].mxu1 }
 0x1ee   : > { %v3822_v24 = vadd.f32 %v5125_v25, %v3754_v51  ;;  %v2278_v52 = vpop.f32.mrb[87].mxu1  ;;  %v3575_v17 = vpop.f32.mrb[120].mxu0 }
 0x1ef   : > { %v2611_v46 = vadd.f32 %v2610_v47, %v2580_v19  ;;  %v2679_v15 = vadd.f32 %v2648_v11, %v2647_v58  ;;  %v3826_v54 = vadd.f32 %v5119_v12, %v2278_v52  ;;  %v3576_v22 = vpop.f32.mrb[121].mxu0 }
 0x1f0   : > { %v2421_v43 = vpack.c.bf16 %v3822_v24, %v3814_v0  ;;  %v3577_v39 = vadd.f32 %v3576_v22, %v3575_v17  ;;  %v3578_v25 = vpop.f32.mrb[122].mxu0 }
 0x1f1   : > { %v2680_v45 = vadd.f32 %v2679_v15, %v2649_v3  ;;  %v2420_v59 = vpack.c.bf16 %v3826_v54, %v3818_v9  ;;  %v2612_v32 = vadd.f32 %v2611_v46, %v2581_v33  ;;  %v3579_v1 = vpop.f32.mrb[123].mxu0 }
 0x1f2   : > { %3214 = vst [vmem:[%s5162_s20 + $0x18] sm:$0xff] %v2421_v43   ;;  %v3580_v56 = vadd.f32 %v3579_v1, %v3578_v25  ;;  %v2584_v13 = vunpack.c.l.bf16 %v2421_v43  ;;  %v5181_v27 = vadd.f32 %v5007_v6, %v3577_v39  ;;  %v2585_v20 = vunpack.c.h.bf16 %v2421_v43 }
 0x1f3   : > { %3213 = vst [vmem:[%s5162_s20 + $0x10] sm:$0xff] %v2420_v59   ;;  %v2582_v2 = vunpack.c.l.bf16 %v2420_v59  ;;  %v2583_v38 = vunpack.c.h.bf16 %v2420_v59  ;;  %v2681_v14 = vadd.f32 %v2680_v45, %v2650_v50  ;;  %v3757_v44 = vpop.f32.mrb[88].mxu1 }
 0x1f4   : > { %v3830_v12 = vadd.f32 %v5134_v63, %v3757_v44  ;;  %v2291_v18 = vpop.f32.mrb[89].mxu1  ;;  %v5186_v33 = vadd.f32 %v5009_v10, %v3580_v56  ;;  %v2653_v58 = vmul.f32 %v2584_v13, %v2584_v13  ;;  %v2654_v3 = vmul.f32 %v2585_v20, %v2585_v20 }
 0x1f5   : > { %v2613_v53 = vadd.f32 %v2612_v32, %v2582_v2  ;;  %v2651_v19 = vmul.f32 %v2582_v2, %v2582_v2  ;;  %v3834_v29 = vadd.f32 %v5128_v7, %v2291_v18  ;;  %v3758_v62 = vpop.f32.mrb[90].mxu1  ;;  %v2652_v35 = vmul.f32 %v2583_v38, %v2583_v38 }
 0x1f6   : > { %v3838_v49 = vadd.f32 %v5137_v21, %v3758_v62  ;;  %v2294_v42 = vpop.f32.mrb[91].mxu1  ;;  %v3581_v47 = vpop.f32.mrb[124].mxu0 }
 0x1f7   : > { %v2614_v0 = vadd.f32 %v2613_v53, %v2583_v38  ;;  %v2682_v63 = vadd.f32 %v2681_v14, %v2651_v19  ;;  %v3842_v6 = vadd.f32 %v5131_v41, %v2294_v42  ;;  %v3582_v9 = vpop.f32.mrb[125].mxu0 }
 0x1f8   : > { %v2423_v11 = vpack.c.bf16 %v3838_v49, %v3830_v12  ;;  %v3583_v52 = vadd.f32 %v3582_v9, %v3581_v47  ;;  %v3584_v21 = vpop.f32.mrb[126].mxu0 }
 0x1f9   : > { %v2615_v7 = vadd.f32 %v2614_v0, %v2584_v13  ;;  %v2683_v51 = vadd.f32 %v2682_v63, %v2652_v35  ;;  %v2422_v24 = vpack.c.bf16 %v3842_v6, %v3834_v29  ;;  %v3585_v46 = vpop.f32.mrb[127].mxu0 }
 0x1fa   : > { %3216 = vst [vmem:[%s5162_s20 + $0x28] sm:$0xff] %v2423_v11   ;;  %v2588_v43 = vunpack.c.l.bf16 %v2423_v11  ;;  %v3586_v45 = vadd.f32 %v3585_v46, %v3584_v21  ;;  %v2589_v59 = vunpack.c.h.bf16 %v2423_v11  ;;  %v3872_v44 = vadd.f32 %v5016_v5, %v3583_v52 }
 0x1fb   : > { %v2684_v10 = vadd.f32 %v2683_v51, %v2653_v58  ;;  %3215 = vst [vmem:[%s5162_s20 + $0x20] sm:$0xff] %v2422_v24   ;;  %v2586_v15 = vunpack.c.l.bf16 %v2422_v24  ;;  %v2587_v54 = vunpack.c.h.bf16 %v2422_v24  ;;  %v2616_v17 = vadd.f32 %v2615_v7, %v2585_v20  ;;  %v3761_v50 = vpop.f32.mrb[92].mxu1 }
 0x1fc   : > { %v3846_v41 = vadd.f32 %v5145_v57, %v3761_v50  ;;  %v2307_v22 = vpop.f32.mrb[93].mxu1  ;;  %v5196_v56 = vadd.f32 %v5020_v8, %v3586_v45  ;;  %v2657_v19 = vmul.f32 %v2588_v43, %v2588_v43  ;;  %v2658_v5 = vmul.f32 %v2589_v59, %v2589_v59 }
 0x1fd   : > { %v2617_v32 = vadd.f32 %v2616_v17, %v2586_v15  ;;  %v2655_v39 = vmul.f32 %v2586_v15, %v2586_v15  ;;  %v2685_v25 = vadd.f32 %v2684_v10, %v2654_v3  ;;  %v3762_v1 = vpop.f32.mrb[94].mxu1  ;;  %v3850_v2 = vadd.f32 %v5140_v36, %v2307_v22 }
 0x1fe   : > { %v3854_v38 = vadd.f32 %v5148_v48, %v3762_v1  ;;  %v2310_v14 = vpop.f32.mrb[95].mxu1  ;;  %v2656_v57 = vmul.f32 %v2587_v54, %v2587_v54  ;;  %v3587_v53 = vpop.f32.mrb[128].mxu0 }
 0x1ff   : > { %v2618_v13 = vadd.f32 %v2617_v32, %v2587_v54  ;;  %v2686_v12 = vadd.f32 %v2685_v25, %v2655_v39  ;;  %v3858_v18 = vadd.f32 %v5142_v34, %v2310_v14  ;;  %v3588_v62 = vpop.f32.mrb[129].mxu0 }
 0x200   : > { %v2425_v29 = vpack.c.bf16 %v3854_v38, %v3846_v41  ;;  %v3589_v49 = vadd.f32 %v3588_v62, %v3587_v53  ;;  %v3590_v42 = vpop.f32.mrb[130].mxu0 }
 0x201   : > { %v2619_v36 = vadd.f32 %v2618_v13, %v2588_v43  ;;  %v2687_v20 = vadd.f32 %v2686_v12, %v2656_v57  ;;  %v2424_v48 = vpack.c.bf16 %v3858_v18, %v3850_v2  ;;  %v3591_v0 = vpop.f32.mrb[131].mxu0 }
 0x202   : > { %3218 = vst [vmem:[%s5162_s20 + $0x38] sm:$0xff] %v2425_v29   ;;  %v2592_v58 = vunpack.c.l.bf16 %v2425_v29  ;;  %v3592_v9 = vadd.f32 %v3591_v0, %v3590_v42  ;;  %v2593_v7 = vunpack.c.h.bf16 %v2425_v29  ;;  %v5205_v15 = vadd.f32 %v5038_v61, %v3589_v49 }
 0x203   : > { %v2688_v8 = vadd.f32 %v2687_v20, %v2657_v19  ;;  %3217 = vst [vmem:[%s5162_s20 + $0x30] sm:$0xff] %v2424_v48   ;;  %v2590_v35 = vunpack.c.l.bf16 %v2424_v48  ;;  %v2591_v63 = vunpack.c.h.bf16 %v2424_v48  ;;  %v2620_v6 = vadd.f32 %v2619_v36, %v2589_v59  ;;  %v3765_v47 = vpop.f32.mrb[0].mxu1 }
 0x204   : > { %v3861_v34 = vadd.f32 %v5168_v28, %v3765_v47  ;;  %v2323_v11 = vpop.f32.mrb[1].mxu1  ;;  %v5208_v54 = vadd.f32 %v5042_v40, %v3592_v9  ;;  %v2661_v22 = vmul.f32 %v2592_v58, %v2592_v58  ;;  %v2662_v25 = vmul.f32 %v2593_v7, %v2593_v7 }
 0x205   : > { %v2621_v51 = vadd.f32 %v2620_v6, %v2590_v35  ;;  %v2659_v24 = vmul.f32 %v2590_v35, %v2590_v35  ;;  %v2689_v52 = vadd.f32 %v2688_v8, %v2658_v5  ;;  %v3766_v21 = vpop.f32.mrb[2].mxu1  ;;  %v3864_v3 = vadd.f32 %v5151_v55, %v2323_v11 }
 0x206   : > { %v3867_v46 = vadd.f32 %v5174_v30, %v3766_v21  ;;  %v2326_v10 = vpop.f32.mrb[3].mxu1  ;;  %v2660_v17 = vmul.f32 %v2591_v63, %v2591_v63  ;;  %v3593_v41 = vpop.f32.mrb[132].mxu0 }
 0x207   : > { %v2622_v28 = vadd.f32 %v2621_v51, %v2591_v63  ;;  %v2690_v50 = vadd.f32 %v2689_v52, %v2659_v24  ;;  %v3870_v43 = vadd.f32 %v5155_v60, %v2326_v10  ;;  %v3594_v55 = vpop.f32.mrb[133].mxu0 }
 0x208   : > { %v2427_v45 = vpack.c.bf16 %v3867_v46, %v3861_v34  ;;  %v3595_v39 = vadd.f32 %v3594_v55, %v3593_v41  ;;  %v3596_v61 = vpop.f32.mrb[134].mxu0 }
 0x209   : > { %v2623_v59 = vadd.f32 %v2622_v28, %v2592_v58  ;;  %v2691_v30 = vadd.f32 %v2690_v50, %v2660_v17  ;;  %v2426_v32 = vpack.c.bf16 %v3870_v43, %v3864_v3  ;;  %v3597_v1 = vpop.f32.mrb[135].mxu0 }
 0x20a   : > { %3220 = vst [vmem:[%s5162_s20 + $0x48] sm:$0xff] %v2427_v45   ;;  %v2596_v57 = vunpack.c.l.bf16 %v2427_v45  ;;  %v3598_v18 = vadd.f32 %v3597_v1, %v3596_v61  ;;  %v2597_v53 = vunpack.c.h.bf16 %v2427_v45  ;;  %v3884_v42 = vadd.f32 %v5060_v37, %v3595_v39 }
 0x20b   : > { %v2692_v40 = vadd.f32 %v2691_v30, %v2661_v22  ;;  %3219 = vst [vmem:[%s5162_s20 + $0x40] sm:$0xff] %v2426_v32   ;;  %v2594_v2 = vunpack.c.l.bf16 %v2426_v32  ;;  %v2595_v38 = vunpack.c.h.bf16 %v2426_v32  ;;  %v2624_v14 = vadd.f32 %v2623_v59, %v2593_v7  ;;  %v3769_v13 = vpop.f32.mrb[4].mxu1 }
 0x20c   : > { %v3873_v60 = vadd.f32 %v3872_v44, %v3769_v13  ;;  %v2339_v12 = vpop.f32.mrb[5].mxu1  ;;  %v3890_v5 = vadd.f32 %v5064_v23, %v3598_v18  ;;  %v2665_v6 = vmul.f32 %v2596_v57, %v2596_v57  ;;  %v2666_v7 = vmul.f32 %v2597_v53, %v2597_v53 }
 0x20d   : > { %v2625_v19 = vadd.f32 %v2624_v14, %v2594_v2  ;;  %v2663_v29 = vmul.f32 %v2594_v2, %v2594_v2  ;;  %v2693_v62 = vadd.f32 %v2692_v40, %v2662_v25  ;;  %v3770_v36 = vpop.f32.mrb[6].mxu1  ;;  %v3876_v20 = vadd.f32 %v5181_v27, %v2339_v12 }
 0x20e   : > { %v3879_v48 = vadd.f32 %v5196_v56, %v3770_v36  ;;  %v2342_v49 = vpop.f32.mrb[7].mxu1  ;;  %v2664_v8 = vmul.f32 %v2595_v38, %v2595_v38  ;;  %v3599_v63 = vpop.f32.mrb[136].mxu0 }
 0x20f   : > { %v2626_v0 = vadd.f32 %v2625_v19, %v2595_v38  ;;  %v2694_v44 = vadd.f32 %v2693_v62, %v2663_v29  ;;  %v3882_v35 = vadd.f32 %v5186_v33, %v2342_v49  ;;  %v3600_v58 = vpop.f32.mrb[137].mxu0 }
 0x210   : > { %v2429_v47 = vpack.c.bf16 %v3879_v48, %v3873_v60  ;;  %v3601_v56 = vadd.f32 %v3600_v58, %v3599_v63  ;;  %v3602_v9 = vpop.f32.mrb[138].mxu0 }
 0x211   : > { %v2627_v34 = vadd.f32 %v2626_v0, %v2596_v57  ;;  %v2695_v27 = vadd.f32 %v2694_v44, %v2664_v8  ;;  %v2428_v11 = vpack.c.bf16 %v3882_v35, %v3876_v20  ;;  %v3603_v37 = vpop.f32.mrb[139].mxu0 }
 0x212   : > { %3222 = vst [vmem:[%s5162_s20 + $0x58] sm:$0xff] %v2429_v47   ;;  %v2600_v3 = vunpack.c.l.bf16 %v2429_v47  ;;  %v3604_v10 = vadd.f32 %v3603_v37, %v3602_v9  ;;  %v2601_v28 = vunpack.c.h.bf16 %v2429_v47  ;;  %v3899_v59 = vadd.f32 %v5082_v31, %v3601_v56 }
 0x213   : > { %v2696_v51 = vadd.f32 %v2695_v27, %v2665_v6  ;;  %3221 = vst [vmem:[%s5162_s20 + $0x50] sm:$0xff] %v2428_v11   ;;  %v2598_v23 = vunpack.c.l.bf16 %v2428_v11  ;;  %v2599_v24 = vunpack.c.h.bf16 %v2428_v11  ;;  %v2628_v52 = vadd.f32 %v2627_v34, %v2597_v53  ;;  %v3773_v21 = vpop.f32.mrb[8].mxu1 }
 0x214   : > { %v3885_v33 = vadd.f32 %v3884_v42, %v3773_v21  ;;  %v2355_v46 = vpop.f32.mrb[9].mxu1  ;;  %v3905_v30 = vadd.f32 %v5086_v26, %v3604_v10  ;;  %v2669_v40 = vmul.f32 %v2600_v3, %v2600_v3  ;;  %v2670_v12 = vmul.f32 %v2601_v28, %v2601_v28 }
 0x215   : > { %v2629_v17 = vadd.f32 %v2628_v52, %v2598_v23  ;;  %v2667_v50 = vmul.f32 %v2598_v23, %v2598_v23  ;;  %v2697_v43 = vadd.f32 %v2696_v51, %v2666_v7  ;;  %v3774_v41 = vpop.f32.mrb[10].mxu1  ;;  %v3888_v22 = vadd.f32 %v5205_v15, %v2355_v46 }
 0x216   : > { %v3891_v45 = vadd.f32 %v3890_v5, %v3774_v41  ;;  %v2358_v55 = vpop.f32.mrb[11].mxu1  ;;  %v2668_v39 = vmul.f32 %v2599_v24, %v2599_v24  ;;  %v3605_v1 = vpop.f32.mrb[140].mxu0 }
 0x217   : > { %v2630_v32 = vadd.f32 %v2629_v17, %v2599_v24  ;;  %v2698_v61 = vadd.f32 %v2697_v43, %v2667_v50  ;;  %v3894_v25 = vadd.f32 %v5208_v54, %v2358_v55  ;;  %v3606_v38 = vpop.f32.mrb[141].mxu0 }
 0x218   : > { %v2431_v2 = vpack.c.bf16 %v3891_v45, %v3885_v33  ;;  %v3607_v57 = vadd.f32 %v3606_v38, %v3605_v1  ;;  %v3608_v60 = vpop.f32.mrb[142].mxu0 }
 0x219   : > { %v2631_v14 = vadd.f32 %v2630_v32, %v2600_v3  ;;  %v2699_v13 = vadd.f32 %v2698_v61, %v2668_v39  ;;  %v2430_v15 = vpack.c.bf16 %v3894_v25, %v3888_v22  ;;  %v3609_v31 = vpop.f32.mrb[143].mxu0 }
 0x21a   : > { %3224 = vst [vmem:[%s5162_s20 + $0x68] sm:$0xff] %v2431_v2   ;;  %v3896_v54 = vadd.f32 %v5102_v4, %v3607_v57  ;;  %v3610_v36 = vadd.f32 %v3609_v31, %v3608_v60  ;;  %v2604_v20 = vunpack.c.l.bf16 %v2431_v2  ;;  %v2605_v0 = vunpack.c.h.bf16 %v2431_v2 }
 0x21b   : > { %v2700_v18 = vadd.f32 %v2699_v13, %v2669_v40  ;;  %3223 = vst [vmem:[%s5162_s20 + $0x60] sm:$0xff] %v2430_v15   ;;  %v2602_v26 = vunpack.c.l.bf16 %v2430_v15  ;;  %v2603_v53 = vunpack.c.h.bf16 %v2430_v15  ;;  %v2632_v19 = vadd.f32 %v2631_v14, %v2601_v28  ;;  %v3777_v29 = vpop.f32.mrb[12].mxu1 }
 0x21c   : > { %v2371_v62 = vpop.f32.mrb[13].mxu1  ;;  %v3897_v8 = vadd.f32 %v3896_v54, %v3777_v29  ;;  %v3902_v35 = vadd.f32 %v5105_v16, %v3610_v36  ;;  %v2673_v27 = vmul.f32 %v2604_v20, %v2604_v20  ;;  %v2674_v7 = vmul.f32 %v2605_v0, %v2605_v0 }
 0x21d   : > { %v2633_v48 = vadd.f32 %v2632_v19, %v2602_v26  ;;  %v2671_v49 = vmul.f32 %v2602_v26, %v2602_v26  ;;  %v2701_v42 = vadd.f32 %v2700_v18, %v2670_v12  ;;  %v3778_v5 = vpop.f32.mrb[14].mxu1  ;;  %v3900_v44 = vadd.f32 %v3899_v59, %v2371_v62 }
 0x21e   : > { %v2374_v63 = vpop.f32.mrb[15].mxu1  ;;  %v2672_v47 = vmul.f32 %v2603_v53, %v2603_v53  ;;  %v3903_v4 = vadd.f32 %v3902_v35, %v3778_v5 }
 0x21f   : > { %v2634_v6 = vadd.f32 %v2633_v48, %v2603_v53  ;;  %v2702_v58 = vadd.f32 %v2701_v42, %v2671_v49  ;;  %v3906_v34 = vadd.f32 %v3905_v30, %v2374_v63 }
 0x220   : > { %v2433_v37 = vpack.c.bf16 %v3903_v4, %v3897_v8 }
 0x221   : > { %v2635_v11 = vadd.f32 %v2634_v6, %v2604_v20  ;;  %v2703_v56 = vadd.f32 %v2702_v58, %v2672_v47  ;;  %v2432_v9 = vpack.c.bf16 %v3906_v34, %v3900_v44 }
 0x222   : > { %3226 = vst [vmem:[%s5162_s20 + $0x78] sm:$0xff] %v2433_v37   ;;  %v2608_v16 = vunpack.c.l.bf16 %v2433_v37  ;;  %v2609_v46 = vunpack.c.h.bf16 %v2433_v37 }
 0x223   : > { %v2704_v51 = vadd.f32 %v2703_v56, %v2673_v27  ;;  %3225 = vst [vmem:[%s5162_s20 + $0x70] sm:$0xff] %v2432_v9   ;;  %v2606_v23 = vunpack.c.l.bf16 %v2432_v9  ;;  %v2607_v24 = vunpack.c.h.bf16 %v2432_v9  ;;  %v2636_v52 = vadd.f32 %v2635_v11, %v2605_v0 }
 0x224   : > { %v2677_v10 = vmul.f32 %v2608_v16, %v2608_v16  ;;  %v2678_v22 = vmul.f32 %v2609_v46, %v2609_v46 }
 0x225   : > { %v2637_v21 = vadd.f32 %v2636_v52, %v2606_v23  ;;  %v2675_v3 = vmul.f32 %v2606_v23, %v2606_v23  ;;  %v2705_v33 = vadd.f32 %v2704_v51, %v2674_v7  ;;  %v2676_v17 = vmul.f32 %v2607_v24, %v2607_v24 }
 0x227   : > { %v2638_v28 = vadd.f32 %v2637_v21, %v2607_v24  ;;  %v2706_v50 = vadd.f32 %v2705_v33, %v2675_v3 }
 0x229   : > { %v2639_v43 = vadd.f32 %v2638_v28, %v2608_v16  ;;  %v2707_v41 = vadd.f32 %v2706_v50, %v2676_v17 }
 0x22b   : > { %v2640_v45 = vadd.f32 %v2639_v43, %v2609_v46  ;;  %v2708_v55 = vadd.f32 %v2707_v41, %v2677_v10 }
 0x22d   : > { %v2641_v59 = vrot.slane %v2640_v45, 4  ;;  %v2709_v30 = vadd.f32 %v2708_v55, %v2678_v22 }
 0x22f   : > { %v2642_v32 = vadd.f32 %v2641_v59, %v2640_v45  ;;  %v2710_v39 = vrot.slane %v2709_v30, 4 }
 0x231   : > { %v2643_v61 = vrot.slane %v2642_v32, 2  ;;  %v2711_v25 = vadd.f32 %v2710_v39, %v2709_v30 }
 0x233   : > { %v2644_v1 = vadd.f32 %v2643_v61, %v2642_v32  ;;  %v2712_v40 = vrot.slane %v2711_v25, 2 }
 0x235   : > { %v2645_v2 = vrot.slane %v2644_v1, 1  ;;  %v2713_v38 = vadd.f32 %v2712_v40, %v2711_v25 }
 0x237   : > { %v2714_v14 = vrot.slane %v2713_v38, 1  ;;  %v2646_v13 = vadd.f32 %v2645_v2, %v2644_v1 }
 0x239   : > { %v2715_v15 = vadd.f32 %v2714_v14, %v2713_v38 }
 0x23b   : > { %v2717_v57 = vsel %vm562_vm0, %v2646_v13, %v2715_v15 }
 0x23c   : > { %2718 = vst [vmem:[%s235_s22] sm:$0x3] %v2717_v57 }
 0x23d PF: > { %s16_s18 = sadd.s32 1, %s4042_s18  }
 0x23e   : > { %p13_p4 = scmp.ge.s32.totalorder %s16_s18, 4  }
 0x240   :  { %15 = sbr.rel (!%p13_p4) target bundleno = 1 (0x1), region = 83 }

// kernel: basic_block_pallas.3
= control target key start
LH: loop header
LB: loop body
LE: loop exit
PB: predicated region body
PF: predicated region fallthrough
CT: control target
= control target key end

     0   :  { %s4553_s12 = smov 0   ;;  %s5509_s0 = inlined_call_operand.vmem [shape: bf16[2,18,18,128], index: 0, kind: input, shape index: {}]   ;;  %s5510_s1 = inlined_call_operand.vmem [shape: bf16[3,384,128], index: 1, kind: input, shape index: {}]   ;;  %s5511_s2 = inlined_call_operand.vmem [shape: bf16[2,16,16,128], index: 2, kind: output, shape index: {0}]   ;;  %s5512_s3 = inlined_call_operand.vmem [shape: f32[2,2,128], index: 3, kind: output, shape index: {1}]  }
   0x1 LB: > { %s3194_s13 = sadd.s32 4294967295, %s4531_s12   ;;  %p3198_p0 = scmp.ge.s32.totalorder %s4531_s12, 1  ;;  %s4531_s12 = sphi %s4553_s12, %s14_s12  }
   0x2   : > { %p140_p1 = scmp.lt.s32.totalorder %s4531_s12, 3 }
   0x4   : > { %p141_p2 = pnand %p3198_p0, %p140_p1 }
   0x6   : > { %144 = sbr.rel (%p141_p2) target bundleno = 575 (0x23f), region = 28 }
   0xd   : > { %v4360_v0 = vld [vmem:[%s5510_s1 + $0x100] sm:$0xff]   ;;  %v4363_v3 = vld [vmem:[%s5510_s1 + $0x108] sm:$0xff]   ;;  %v4366_v6 = vld [vmem:[%s5510_s1 + $0x110] sm:$0xff]   ;;  %p168_p3 = scmp.lt.s32.totalorder %s3194_s13, 1  ;;  %vm543_vm0 = vsmask.f32 7424 }
   0xe   : > { %v4567_v1 = vld [vmem:[%s5510_s1 + $0x140] sm:$0xff]   ;;  %3623 = vmatprep.subr.bf16.mxu0 %v4360_v0  ;;  %v4580_v4 = vld [vmem:[%s5510_s1 + $0x148] sm:$0xff]   ;;  %v4592_v7 = vld [vmem:[%s5510_s1 + $0x150] sm:$0xff]   ;;  %vm994_vm1 = vcmask 1046528   ;;  %vm3105_vm2 = vcmask 1040384  }
   0xf   : > { %v4362_v2 = vld [vmem:[%s5510_s1 + $0xc0] sm:$0xff]   ;;  %4175 = vmatprep.subr.bf16.mxu1 %v4567_v1  ;;  %v4365_v5 = vld [vmem:[%s5510_s1 + $0xc8] sm:$0xff]   ;;  %v4368_v8 = vld [vmem:[%s5510_s1 + $0xd0] sm:$0xff]   ;;  %s5516_s13 = smov (!%p168_p3, %s3194_s13), 1 }
  0x10   : > { %3624 = vmatpush3.bf16.msra.mxu0 %v4362_v2  ;;  %4183 = vmatpush3.bf16.msra.mxu1 %v4567_v1  ;;  %v4369_v9 = vld [vmem:[%s5510_s1 + $0x118] sm:$0xff]   ;;  %v4372_v12 = vld [vmem:[%s5510_s1 + $0x120] sm:$0xff]   ;;  %v4375_v15 = vld [vmem:[%s5510_s1 + $0x128] sm:$0xff]   ;;  %s4351_s23 = smul.u32 216, %s5516_s13  ;;  %s3202_s19 = sshll.u32 %s5516_s13, 1 }
  0x11   : > { %3625 = vmatprep.subr.bf16.mxu0 %v4363_v3  ;;  %4176 = vmatprep.subr.bf16.mxu1 %v4580_v4  ;;  %v4605_v10 = vld [vmem:[%s5510_s1 + $0x158] sm:$0xff]   ;;  %v4620_v13 = vld [vmem:[%s5510_s1 + $0x160] sm:$0xff]   ;;  %v4637_v16 = vld [vmem:[%s5510_s1 + $0x168] sm:$0xff]   ;;  %s181_s22 = scalar_lea.vmem %s5512_s3, %s3202_s19 }
  0x12   : > { %v4371_v11 = vld [vmem:[%s5510_s1 + $0xd8] sm:$0xff]   ;;  %v4374_v14 = vld [vmem:[%s5510_s1 + $0xe0] sm:$0xff]   ;;  %v4377_v17 = vld [vmem:[%s5510_s1 + $0xe8] sm:$0xff]   ;;  %s4659_s7 = scalar_lea.vmem %s5509_s0, %s4351_s23 }
  0x13   : > { %v4378_v18 = vld [vmem:[%s5510_s1 + $0x130] sm:$0xff]   ;;  %v4381_v21 = vld [vmem:[%s5510_s1 + $0x138] sm:$0xff]   ;;  %v4391_v36 = vld [vmem:[%s5510_s1 + $0x40] sm:$0xff]  }
  0x14   : > { %3626 = vmatpush3.bf16.msra.mxu0 %v4365_v5  ;;  %4184 = vmatpush3.bf16.msra.mxu1 %v4580_v4  ;;  %v4651_v19 = vld [vmem:[%s5510_s1 + $0x170] sm:$0xff]   ;;  %v4667_v22 = vld [vmem:[%s5510_s1 + $0x178] sm:$0xff]   ;;  %v4390_v40 = vld [vmem:[%s4659_s7 + $0x80] ss:$0 sps:$4 sm:$0x11]  }
  0x15   : > { %3627 = vmatprep.subr.bf16.mxu0 %v4366_v6  ;;  %4177 = vmatprep.subr.bf16.mxu1 %v4592_v7  ;;  %v4380_v20 = vld [vmem:[%s5510_s1 + $0xf0] sm:$0xff]   ;;  %v4383_v29 = vld [vmem:[%s5510_s1 + $0xf8] sm:$0xff]   ;;  %v4392_v41 = vld [vmem:[%s5510_s1] sm:$0xff]   ;;  %v1026_v45 = vrot.slane %v4390_v40, 1 }
  0x16   : > { %v4384_v23 = vld [vmem:[%s4659_s7 + $0xc] sm:$0xff]   ;;  %v4385_v24 = vld [vmem:[%s4659_s7 + $0x14] ss:$0 sps:$4 sm:$0x11]   ;;  %v4389_v38 = vld [vmem:[%s4659_s7 + $0x78] sm:$0xfe]  }
  0x17   : > { %v557_v25 = vshrl.u32 %v4384_v23, 16  ;;  %v559_v26 = vshll.u32 %v4384_v23, 16  ;;  %v564_v27 = vshll.u32 %v4385_v24, 16  ;;  %v4386_v28 = vld [vmem:[%s4659_s7 + $0x6c] sm:$0xfe]   ;;  %v1025_v43 = vrot.slane %v4389_v38, 1 }
  0x18   : > { %3628 = vmatpush3.bf16.msra.mxu0 %v4368_v8  ;;  %4185 = vmatpush3.bf16.msra.mxu1 %v4592_v7  ;;  %v4387_v30 = vld [vmem:[%s4659_s7 + $0x74] ss:$0 sps:$4 sm:$0x11]   ;;  %v1022_v33 = vrot.slane %v4386_v28, 1  ;;  %v4681_v34 = vld [vmem:[%s4659_s7 + $0xc] sm:$0xff]   ;;  %v4395_v44 = vld [vmem:[%s4659_s7 + $0x18] sm:$0xff]  }
  0x19   : > { %3629 = vmatprep.subr.bf16.mxu0 %v4369_v9  ;;  %4178 = vmatprep.subr.bf16.mxu1 %v4605_v10  ;;  %v561_v31 = vrot.slane %v559_v26, 1  ;;  %v566_v32 = vrot.slane %v564_v27, 1  ;;  %v1023_v35 = vrot.slane %v4387_v30, 1  ;;  %v4393_v46 = vld [vmem:[%s5510_s1 + $0x48] sm:$0xff]   ;;  %v4707_v47 = vsel %vm994_vm1, %v1025_v43, %v1026_v45  ;;  %v4402_v53 = vld [vmem:[%s5510_s1 + $0x50] sm:$0xff]   ;;  %v4722_v57 = vld [vmem:[%s4659_s7 + $0x18] sm:$0xff]  }
  0x1a   : > { %v569_v48 = vshrl.u32 %v4395_v44, 16  ;;  %v571_v49 = vshll.u32 %v4395_v44, 16  ;;  %v4394_v50 = vld [vmem:[%s5510_s1 + $0x8] sm:$0xff]   ;;  %v4396_v51 = vld [vmem:[%s4659_s7 + $0x20] ss:$0 sps:$4 sm:$0x11]  }
  0x1b   : > { %v562_v37 = vor.u32 %v561_v31, %v557_v25  ;;  %v4689_v39 = vsel %vm994_vm1, %v1022_v33, %v1023_v35  ;;  %v576_v54 = vshll.u32 %v4396_v51, 16  ;;  %v4397_v55 = vld [vmem:[%s4659_s7 + $0x84] sm:$0xfe]   ;;  %v4398_v56 = vld [vmem:[%s4659_s7 + $0x8c] ss:$0 sps:$4 sm:$0x11]  }
  0x1c   : > { %3630 = vmatpush3.bf16.msra.mxu0 %v4371_v11  ;;  %4186 = vmatpush3.bf16.msra.mxu1 %v4605_v10  ;;  %v573_v52 = vrot.slane %v571_v49, 1  ;;  %v1028_v60 = vrot.slane %v4397_v55, 1  ;;  %v1029_v61 = vrot.slane %v4398_v56, 1  ;;  %v4403_v62 = vld [vmem:[%s5510_s1 + $0x10] sm:$0xff]   ;;  %v4404_v3 = vld [vmem:[%s5510_s1 + $0x58] sm:$0xff]   ;;  %v4406_v5 = vld [vmem:[%s4659_s7 + $0x24] sm:$0xff]  }
  0x1d   : > { %3631 = vmatprep.subr.bf16.mxu0 %v4372_v12  ;;  %4179 = vmatprep.subr.bf16.mxu1 %v4620_v13  ;;  %v4696_v42 = vsel %vm543_vm0, %v562_v37, %v566_v32  ;;  %v578_v59 = vrot.slane %v576_v54, 1  ;;  %v4400_v63 = vld [vmem:[%s4659_s7 + $0x90] sm:$0xfe]   ;;  %v4401_v2 = vld [vmem:[%s4659_s7 + $0x98] ss:$0 sps:$4 sm:$0x11]  }
  0x1e   : > { %4063 = vmatprep.mubr.bf16.mxu1 %v4689_v39  ;;  %1455 = vmatprep.mubr.bf16.mxu0 %v4696_v42  ;;  %v574_v58 = vor.u32 %v573_v52, %v569_v48  ;;  %v1032_v6 = vrot.slane %v4401_v2, 1  ;;  %v4405_v8 = vld [vmem:[%s5510_s1 + $0x18] sm:$0xff]   ;;  %v581_v11 = vshrl.u32 %v4406_v5, 16  ;;  %v583_v12 = vshll.u32 %v4406_v5, 16  ;;  %v4763_v23 = vld [vmem:[%s4659_s7 + $0x24] sm:$0xff]   ;;  %v4417_v35 = vld [vmem:[%s4659_s7 + $0x30] sm:$0xff]  }
  0x1f   : > { %v4415_v28 = vld [vmem:[%s5510_s1 + $0x68] sm:$0xff]   ;;  %v595_v38 = vshll.u32 %v4417_v35, 16  ;;  %v4418_v40 = vld [vmem:[%s4659_s7 + $0x38] ss:$0 sps:$4 sm:$0x11]   ;;  %v4425_v44 = vld [vmem:[%s5510_s1 + $0x30] sm:$0xff]  }
  0x20   : > { %3632 = vmatpush3.bf16.msra.mxu0 %v4374_v14  ;;  %4187 = vmatpush3.bf16.msra.mxu1 %v4620_v13  ;;  %v4731_v0 = vsel %vm543_vm0, %v574_v58, %v578_v59  ;;  %v4407_v14 = vld [vmem:[%s4659_s7 + $0x2c] ss:$0 sps:$4 sm:$0x11]   ;;  %v600_v45 = vshll.u32 %v4418_v40, 16  ;;  %v4422_v54 = vld [vmem:[%s4659_s7 + $0xc0] sm:$0xfe]  }
  0x21   : > { %3633 = vmatprep.subr.bf16.mxu0 %v4375_v15  ;;  %4180 = vmatprep.subr.bf16.mxu1 %v4637_v16  ;;  %v4413_v15 = vld [vmem:[%s5510_s1 + $0x60] sm:$0xff]   ;;  %v4416_v32 = vld [vmem:[%s5510_s1 + $0x28] sm:$0xff]   ;;  %v597_v43 = vrot.slane %v595_v38, 1  ;;  %v4420_v48 = vld [vmem:[%s4659_s7 + $0xbc] ss:$0 sps:$4 sm:$0x11]  }
  0x22   : > { %v1041_v52 = vrot.slane %v4420_v48, 1  ;;  %v4423_v58 = vld [vmem:[%s4659_s7 + $0xc8] ss:$0 sps:$4 sm:$0x11]   ;;  %v1043_v59 = vrot.slane %v4422_v54, 1  ;;  %v4442_v48 = vld [vmem:[%s4659_s7 + $0x60] sm:$0xff]  }
  0x23   : > { %v4852_v38 = vld [vmem:[%s4659_s7 + $0x48] sm:$0xff]  }
  0x24   : > { %3634 = vmatpush3.bf16.msra.mxu0 %v4377_v17  ;;  %4188 = vmatpush3.bf16.msra.mxu1 %v4637_v16  ;;  %v585_v17 = vrot.slane %v583_v12, 1  ;;  %v4431_v12 = vld [vmem:[%s4659_s7 + $0x8] ss:$0 sps:$4 sm:$0x11]  }
  0x25   : > { %3635 = vmatprep.subr.bf16.mxu0 %v4378_v18  ;;  %4181 = vmatprep.subr.bf16.mxu1 %v4651_v19  ;;  %v588_v18 = vshll.u32 %v4407_v14, 16 }
  0x26   : > { %v586_v24 = vor.u32 %v585_v17, %v581_v11  ;;  %v4834_v17 = vld [vmem:[%s4659_s7 + $0x3c] sm:$0xff]  }
  0x27   : > { %v590_v25 = vrot.slane %v588_v18, 1  ;;  %v4433_v18 = vld [vmem:[%s4659_s7] sm:$0xff]  }
  0x28   : > { %3636 = vmatpush3.bf16.msra.mxu0 %v4380_v20  ;;  %4189 = vmatpush3.bf16.msra.mxu1 %v4651_v19  ;;  %v4408_v20 = vld [vmem:[%s4659_s7 + $0x9c] sm:$0xfe]  }
  0x29   : > { %3637 = vmatprep.subr.bf16.mxu0 %v4381_v21  ;;  %4182 = vmatprep.subr.bf16.mxu1 %v4667_v22  ;;  %v4409_v21 = vld [vmem:[%s4659_s7 + $0xa4] ss:$0 sps:$4 sm:$0x11]   ;;  %v1034_v26 = vrot.slane %v4408_v20, 1  ;;  %v4772_v30 = vsel %vm543_vm0, %v586_v24, %v590_v25 }
  0x2a   : > { %v1035_v27 = vrot.slane %v4409_v21, 1  ;;  %v4434_v20 = vld [vmem:[%s5510_s1 + $0x80] sm:$0xff]  }
  0x2c   : > { %3638 = vmatpush3.bf16.msra.mxu0 %v4383_v29  ;;  %4190 = vmatpush3.bf16.msra.mxu1 %v4667_v22  ;;  %v4411_v29 = vld [vmem:[%s4659_s7 + $0xa8] sm:$0xfe]   ;;  %v4775_v31 = vsel %vm994_vm1, %v1034_v26, %v1035_v27  ;;  %v4436_v27 = vld [vmem:[%s4659_s7 + $0x50] ss:$0 sps:$4 sm:$0x11]  }
  0x2d   : > { %4031 = vmatprep.subr.bf16.mxu0 %v4567_v1  ;;  %3759 = vmatprep.subr.bf16.mxu1 %v4391_v36  ;;  %v1037_v33 = vrot.slane %v4411_v29, 1  ;;  %v4435_v26 = vld [vmem:[%s4659_s7 + $0x48] sm:$0xff]  }
  0x2e   : > { %v617_v29 = vshrl.u32 %v4435_v26, 16 }
  0x2f   : > { %1456 = vmatmul.mubr.bf16.vlgmr.msra.gmra.mrb[0].mxu0 %v4681_v34  ;;  %4064 = vmatmul.mubr.bf16.vlgmr.msra.gmra.mrb[0].mxu1 %v4707_v47 }
  0x30   : > { %4032 = vmatpush3.bf16.msra.mxu0 %v4567_v1  ;;  %3760 = vmatpush3.bf16.msra.mxu1 %v4392_v41  ;;  %v4734_v1 = vsel %vm994_vm1, %v1028_v60, %v1029_v61  ;;  %v4424_v41 = vld [vmem:[%s5510_s1 + $0x70] sm:$0xff]   ;;  %v4428_v60 = vld [vmem:[%s4659_s7 + $0x3c] sm:$0xff]   ;;  %v1044_v61 = vrot.slane %v4423_v58, 1 }
  0x31   : > { %4033 = vmatprep.subr.bf16.mxu0 %v4580_v4  ;;  %3761 = vmatprep.subr.bf16.mxu1 %v4393_v46  ;;  %v4419_v46 = vld [vmem:[%s4659_s7 + $0xb4] sm:$0xfe]   ;;  %v605_v2 = vshrl.u32 %v4428_v60, 16 }
  0x32   : > { %1463 = vmatprep.mubr.bf16.mxu0 %v4731_v0  ;;  %4067 = vmatprep.mubr.bf16.mxu1 %v4734_v1  ;;  %v1040_v51 = vrot.slane %v4419_v46, 1 }
  0x34   : > { %4034 = vmatpush3.bf16.msra.mxu0 %v4580_v4  ;;  %3762 = vmatpush3.bf16.msra.mxu1 %v4394_v50  ;;  %v1031_v4 = vrot.slane %v4400_v63, 1  ;;  %v602_v50 = vrot.slane %v600_v45, 1  ;;  %v4815_v56 = vsel %vm994_vm1, %v1040_v51, %v1041_v52  ;;  %v4828_v63 = vsel %vm994_vm1, %v1043_v59, %v1044_v61  ;;  %v4441_v45 = vld [vmem:[%s5510_s1 + $0x88] sm:$0xff]   ;;  %v4446_v61 = vld [vmem:[%s4659_s7 + $0x74] ss:$0 sps:$4 sm:$0x11]  }
  0x35   : > { %4035 = vmatprep.subr.bf16.mxu0 %v4592_v7  ;;  %3763 = vmatprep.subr.bf16.mxu1 %v4402_v53  ;;  %v4426_v53 = vld [vmem:[%s5510_s1 + $0x78] sm:$0xff]   ;;  %v641_v52 = vshrl.u32 %v4442_v48, 16  ;;  %v4445_v59 = vld [vmem:[%s4659_s7 + $0x6c] sm:$0xff]  }
  0x36   : > { %v4749_v9 = vsel %vm994_vm1, %v1031_v4, %v1032_v6  ;;  %v4429_v4 = vld [vmem:[%s4659_s7 + $0x44] ss:$0 sps:$4 sm:$0x11]  }
  0x37   : > { %1464 = vmatmul.mubr.bf16.gmra.mrb[4].mxu0 %v4722_v57  ;;  %4068 = vmatmul.mubr.bf16.gmra.mrb[4].mxu1 %v4749_v9  ;;  %v612_v11 = vshll.u32 %v4429_v4, 16  ;;  %v4876_v4 = vld [vmem:[%s4659_s7 + $0x54] sm:$0xff]  }
  0x38   : > { %3764 = vmatpush3.bf16.msra.mxu1 %v4403_v62  ;;  %4036 = vmatpush3.bf16.msra.mxu0 %v4592_v7  ;;  %v4414_v7 = vld [vmem:[%s5510_s1 + $0x20] sm:$0xff]  }
  0x39   : > { %3765 = vmatprep.subr.bf16.mxu1 %v4404_v3  ;;  %4037 = vmatprep.subr.bf16.mxu0 %v4605_v10  ;;  %v4430_v62 = vld [vmem:[%s4659_s7] sm:$0xff]   ;;  %v607_v3 = vshll.u32 %v4428_v60, 16 }
  0x3a   : > { %1471 = vmatprep.mubr.bf16.mxu0 %v4772_v30  ;;  %4071 = vmatprep.mubr.bf16.mxu1 %v4775_v31  ;;  %v545_v5 = vshrl.u32 %v4430_v62, 16 }
  0x3b   : > { %v609_v6 = vrot.slane %v607_v3, 1  ;;  %v4448_v3 = vld [vmem:[%s5510_s1 + $0x90] sm:$0xff]  }
  0x3c   : > { %3766 = vmatpush3.bf16.msra.mxu1 %v4405_v8  ;;  %4038 = vmatpush3.bf16.msra.mxu0 %v4605_v10  ;;  %v4412_v10 = vld [vmem:[%s4659_s7 + $0xb0] ss:$0 sps:$4 sm:$0x11]   ;;  %v547_v8 = vshll.u32 %v4430_v62, 16 }
  0x3d   : > { %3767 = vmatprep.subr.bf16.mxu1 %v4413_v15  ;;  %4039 = vmatprep.subr.bf16.mxu0 %v4620_v13  ;;  %v1038_v36 = vrot.slane %v4412_v10, 1  ;;  %v610_v14 = vor.u32 %v609_v6, %v605_v2  ;;  %v619_v10 = vshll.u32 %v4435_v26, 16  ;;  %v655_v2 = vshll.u32 %v4445_v59, 16 }
  0x3e   : > { %v549_v15 = vrot.slane %v547_v8, 1  ;;  %v653_v6 = vshrl.u32 %v4445_v59, 16 }
  0x3f   : > { %1472 = vmatmul.mubr.bf16.gmra.mrb[8].mxu0 %v4763_v23  ;;  %v4788_v37 = vsel %vm994_vm1, %v1037_v33, %v1038_v36  ;;  %v4438_v33 = vld [vmem:[%s4659_s7 + $0x54] sm:$0xff]   ;;  %v4439_v36 = vld [vmem:[%s4659_s7 + $0x5c] ss:$0 sps:$4 sm:$0x11]   ;;  %v657_v8 = vrot.slane %v655_v2, 1 }
  0x40   : > { %3768 = vmatpush3.bf16.msra.mxu1 %v4414_v7  ;;  %4040 = vmatpush3.bf16.msra.mxu0 %v4620_v13  ;;  %v593_v13 = vshrl.u32 %v4417_v35, 16  ;;  %v552_v7 = vshll.u32 %v4431_v12, 16  ;;  %v550_v21 = vor.u32 %v549_v15, %v545_v5  ;;  %v621_v35 = vrot.slane %v619_v10, 1  ;;  %v4449_v5 = vld [vmem:[%s4659_s7 + $0x78] sm:$0xff]  }
  0x41   : > { %3769 = vmatprep.subr.bf16.mxu1 %v4415_v28  ;;  %4041 = vmatprep.subr.bf16.mxu0 %v4637_v16  ;;  %v629_v40 = vshrl.u32 %v4438_v33, 16  ;;  %v4450_v12 = vld [vmem:[%s4659_s7 + $0x80] ss:$0 sps:$4 sm:$0x11]   ;;  %v658_v15 = vor.u32 %v657_v8, %v653_v6  ;;  %v4463_v8 = vld [vmem:[%s4659_s7 + $0xa8] sm:$0xff]  }
  0x42   : > { %4072 = vmatmul.mubr.bf16.gmra.mrb[8].mxu1 %v4788_v37  ;;  %v598_v49 = vor.u32 %v597_v43, %v593_v13  ;;  %v554_v25 = vrot.slane %v552_v7, 1  ;;  %v622_v43 = vor.u32 %v621_v35, %v617_v29  ;;  %v4888_v7 = vld [vmem:[%s4659_s7 + $0x60] sm:$0xff]   ;;  %v672_v26 = vshll.u32 %v4450_v12, 16  ;;  %v4456_v35 = vld [vmem:[%s4659_s7 + $0x90] sm:$0xff]  }
  0x43   : > { %4075 = vmatprep.mubr.bf16.mxu1 %v4815_v56 }
  0x44   : > { %3770 = vmatpush3.bf16.msra.mxu1 %v4416_v32  ;;  %4042 = vmatpush3.bf16.msra.mxu0 %v4637_v16  ;;  %v4803_v16 = vld [vmem:[%s4659_s7 + $0x30] sm:$0xff]   ;;  %v4812_v55 = vsel %vm543_vm0, %v598_v49, %v602_v50  ;;  %v555_v28 = vsel %vm543_vm0, %v550_v21, %v554_v25  ;;  %v624_v32 = vshll.u32 %v4436_v27, 16  ;;  %v4453_v27 = vld [vmem:[%s4659_s7 + $0x8c] ss:$0 sps:$4 sm:$0x11]   ;;  %v674_v29 = vrot.slane %v672_v26, 1 }
  0x45   : > { %4043 = vmatprep.subr.bf16.mxu0 %v4651_v19  ;;  %3771 = vmatprep.subr.bf16.mxu1 %v4424_v41  ;;  %v631_v41 = vshll.u32 %v4438_v33, 16  ;;  %v4906_v33 = vld [vmem:[%s4659_s7 + $0x6c] sm:$0xff]  }
  0x46   : > { %1479 = vmatprep.mubr.bf16.mxu0 %v4812_v55  ;;  %v626_v13 = vrot.slane %v624_v32, 1  ;;  %v4462_v32 = vld [vmem:[%s5510_s1 + $0xa0] sm:$0xff]  }
  0x47   : > { %1480 = vmatmul.mubr.bf16.gmra.mrb[12].mxu0 %v4803_v16  ;;  %v633_v46 = vrot.slane %v631_v41, 1  ;;  %v4457_v41 = vld [vmem:[%s4659_s7 + $0x98] ss:$0 sps:$4 sm:$0x11]  }
  0x48   : > { %3772 = vmatpush3.bf16.msra.mxu1 %v4425_v44  ;;  %4044 = vmatpush3.bf16.msra.mxu0 %v4651_v19  ;;  %v4427_v19 = vld [vmem:[%s5510_s1 + $0x38] sm:$0xff]   ;;  %v636_v44 = vshll.u32 %v4439_v36, 16  ;;  %v4859_v49 = vsel %vm543_vm0, %v622_v43, %v626_v13  ;;  %v691_v43 = vshll.u32 %v4456_v35, 16 }
  0x49   : > { %4045 = vmatprep.subr.bf16.mxu0 %v4667_v22  ;;  %3773 = vmatprep.subr.bf16.mxu1 %v4426_v53  ;;  %v634_v51 = vor.u32 %v633_v46, %v629_v40  ;;  %v643_v53 = vshll.u32 %v4442_v48, 16  ;;  %v4921_v48 = vld [vmem:[%s4659_s7 + $0x78] sm:$0xff]  }
  0x4a   : > { %4076 = vmatmul.mubr.bf16.gmra.mrb[12].mxu1 %v4828_v63  ;;  %v638_v50 = vrot.slane %v636_v44, 1  ;;  %v4469_v44 = vld [vmem:[%s5510_s1 + $0xa8] sm:$0xff]  }
  0x4b   : > { %1921 = vmatprep.mubr.bf16.mxu1 %v555_v28 }
  0x4c   : > { %3774 = vmatpush3.bf16.msra.mxu1 %v4427_v19  ;;  %4046 = vmatpush3.bf16.msra.mxu0 %v4667_v22  ;;  %v614_v22 = vrot.slane %v612_v11, 1  ;;  %v4865_v58 = vsel %vm543_vm0, %v634_v51, %v638_v50  ;;  %v645_v19 = vrot.slane %v643_v53, 1  ;;  %v660_v11 = vshll.u32 %v4446_v61, 16  ;;  %v4936_v61 = vld [vmem:[%s4659_s7 + $0x84] sm:$0xff]  }
  0x4d   : > { %4079 = vmatprep.subr.bf16.mxu1 %v4434_v20  ;;  %v689_v50 = vshrl.u32 %v4456_v35, 16  ;;  %v696_v51 = vshll.u32 %v4457_v41, 16  ;;  %v4966_v35 = vld [vmem:[%s4659_s7 + $0x9c] sm:$0xff]  }
  0x4e   : > { %v4841_v24 = vsel %vm543_vm0, %v610_v14, %v614_v22  ;;  %v646_v62 = vor.u32 %v645_v19, %v641_v52  ;;  %v667_v14 = vshll.u32 %v4449_v5, 16  ;;  %v662_v22 = vrot.slane %v660_v11, 1  ;;  %v4459_v52 = vld [vmem:[%s4659_s7 + $0x9c] sm:$0xff]   ;;  %v4464_v11 = vld [vmem:[%s4659_s7 + $0xb0] ss:$0 sps:$4 sm:$0x11]  }
  0x4f   : > { %1487 = vmatprep.mubr.bf16.mxu0 %v4841_v24  ;;  %v698_v59 = vrot.slane %v696_v51, 1 }
  0x50   : > { %1488 = vmatmul.mubr.bf16.gmra.mrb[16].mxu0 %v4834_v17  ;;  %v669_v21 = vrot.slane %v667_v14, 1  ;;  %v4894_v25 = vsel %vm543_vm0, %v658_v15, %v662_v22  ;;  %v715_v15 = vshll.u32 %v4463_v8, 16  ;;  %v4951_v22 = vld [vmem:[%s4659_s7 + $0x90] sm:$0xff]  }
  0x51   : > { %1495 = vmatprep.mubr.bf16.mxu0 %v4859_v49 }
  0x52   : > { %1922 = vmatmul.mubr.bf16.vlgmr.msra.gmra.mrb[16].mxu1 %v4433_v18  ;;  %v4455_v18 = vld [vmem:[%s5510_s1 + $0x98] sm:$0xff]   ;;  %v717_v26 = vrot.slane %v715_v15, 1  ;;  %v4476_v15 = vld [vmem:[%s4659_s7 + $0x20] ss:$0 sps:$4 sm:$0x11]  }
  0x53   : > { %4080 = vmatpush3.bf16.msra.mxu1 %v4434_v20  ;;  %1929 = vmatprep.mubr.bf16.mxu1 %v4696_v42  ;;  %v4443_v42 = vld [vmem:[%s4659_s7 + $0x68] ss:$0 sps:$4 sm:$0x11]   ;;  %v665_v20 = vshrl.u32 %v4449_v5, 16 }
  0x54   : > { %4081 = vmatprep.subr.bf16.mxu1 %v4441_v45  ;;  %v648_v54 = vshll.u32 %v4443_v42, 16  ;;  %v693_v42 = vrot.slane %v691_v43, 1  ;;  %v4470_v43 = vld [vmem:[%s4659_s7 + $0xc0] sm:$0xff]  }
  0x55   : > { %v670_v28 = vor.u32 %v669_v21, %v665_v20  ;;  %v4466_v20 = vld [vmem:[%s4659_s7 + $0xb4] sm:$0xff]   ;;  %v737_v51 = vshrl.u32 %v4470_v43, 16 }
  0x56   : > { %v650_v60 = vrot.slane %v648_v54, 1  ;;  %v4460_v54 = vld [vmem:[%s4659_s7 + $0xa4] ss:$0 sps:$4 sm:$0x11]   ;;  %v694_v19 = vor.u32 %v693_v42, %v689_v50  ;;  %v739_v50 = vshll.u32 %v4470_v43, 16  ;;  %v4978_v42 = vld [vmem:[%s4659_s7 + $0xa8] sm:$0xff]  }
  0x57   : > { %4082 = vmatpush3.bf16.msra.mxu1 %v4441_v45  ;;  %v4910_v36 = vsel %vm543_vm0, %v670_v28, %v674_v29  ;;  %v708_v2 = vshll.u32 %v4460_v54, 16  ;;  %v4494_v28 = vld [vmem:[%s5510_s1 + $0xb8] sm:$0xff]  }
  0x58   : > { %1496 = vmatmul.mubr.bf16.gmra.mrb[20].mxu0 %v4852_v38  ;;  %4083 = vmatprep.subr.bf16.mxu1 %v4448_v3  ;;  %v4942_v5 = vsel %vm543_vm0, %v694_v19, %v698_v59  ;;  %v741_v54 = vrot.slane %v739_v50, 1 }
  0x59   : > { %1503 = vmatprep.mubr.bf16.mxu0 %v4865_v58  ;;  %v710_v14 = vrot.slane %v708_v2, 1  ;;  %v4474_v2 = vld [vmem:[%s4659_s7 + $0x14] ss:$0 sps:$4 sm:$0x11]  }
  0x5a   : > { %1930 = vmatmul.mubr.bf16.gmra.mrb[20].mxu1 %v4681_v34  ;;  %v4880_v34 = vsel %vm543_vm0, %v646_v62, %v650_v60  ;;  %v703_v60 = vshll.u32 %v4459_v52, 16  ;;  %v701_v62 = vshrl.u32 %v4459_v52, 16  ;;  %v742_v19 = vor.u32 %v741_v54, %v737_v51  ;;  %v4486_v54 = vld [vmem:[%s5510_s1 + $0x1d0] sm:$0xff]  }
  0x5b   : > { %1937 = vmatprep.mubr.bf16.mxu1 %v4731_v0  ;;  %4084 = vmatpush3.bf16.msra.mxu1 %v4448_v3  ;;  %v4478_v3 = vld [vmem:[%s5510_s1 + $0x1c0] sm:$0xff]  }
  0x5c   : > { %4085 = vmatprep.subr.bf16.mxu1 %v4455_v18  ;;  %v705_v6 = vrot.slane %v703_v60, 1  ;;  %3895 = vmatprep.subr.bf16.mxu0 %v4478_v3  ;;  %v4989_v60 = vld [vmem:[%s5510_s1 + $0x200] sm:$0xff]  }
  0x5e   : > { %v706_v12 = vor.u32 %v705_v6, %v701_v62  ;;  %v4993_v62 = vld [vmem:[%s4659_s7 + $0xb4] sm:$0xff]   ;;  %v4473_v6 = vld [vmem:[%s4659_s7 + $0xc] sm:$0xfe]  }
  0x5f   : > { %4086 = vmatpush3.bf16.msra.mxu1 %v4455_v18  ;;  %v713_v18 = vshrl.u32 %v4463_v8, 16  ;;  %v5005_v8 = vld [vmem:[%s4659_s7 + $0xc0] sm:$0xff]  }
  0x60   : > { %1504 = vmatmul.mubr.bf16.gmra.mrb[24].mxu0 %v4876_v4  ;;  %4087 = vmatprep.subr.bf16.mxu1 %v4462_v32  ;;  %v4955_v21 = vsel %vm543_vm0, %v706_v12, %v710_v14  ;;  %v999_v12 = vrot.slane %v4474_v2, 1  ;;  %v4475_v14 = vld [vmem:[%s4659_s7 + $0x18] sm:$0xfe]   ;;  %v4487_v2 = vld [vmem:[%s5510_s1 + $0x190] sm:$0xff]  }
  0x61   : > { %1511 = vmatprep.mubr.bf16.mxu0 %v4880_v34  ;;  %v718_v29 = vor.u32 %v717_v26, %v713_v18  ;;  %v4483_v26 = vld [vmem:[%s4659_s7 + $0x2c] ss:$0 sps:$4 sm:$0x11]  }
  0x62   : > { %1938 = vmatmul.mubr.bf16.gmra.mrb[24].mxu1 %v4722_v57  ;;  %v4452_v57 = vld [vmem:[%s4659_s7 + $0x84] sm:$0xff]  }
  0x63   : > { %1945 = vmatprep.mubr.bf16.mxu1 %v4772_v30  ;;  %v679_v10 = vshll.u32 %v4452_v57, 16  ;;  %v677_v13 = vshrl.u32 %v4452_v57, 16  ;;  %4088 = vmatpush3.bf16.msra.mxu1 %v4462_v32  ;;  %v720_v57 = vshll.u32 %v4464_v11, 16  ;;  %v727_v32 = vshll.u32 %v4466_v20, 16 }
  0x64   : > { %4089 = vmatprep.subr.bf16.mxu1 %v4469_v44  ;;  %v998_v11 = vrot.slane %v4473_v6, 1  ;;  %v4492_v6 = vld [vmem:[%s4659_s7 + $0x48] sm:$0xfe]  }
  0x65   : > { %v681_v40 = vrot.slane %v679_v10, 1  ;;  %v722_v10 = vrot.slane %v720_v57, 1  ;;  %v729_v41 = vrot.slane %v727_v32, 1  ;;  %v1001_v57 = vrot.slane %v4475_v14, 1  ;;  %v4479_v32 = vld [vmem:[%s5510_s1 + $0x180] sm:$0xff]  }
  0x66   : > { %v5011_v18 = vsel %vm994_vm1, %v998_v11, %v999_v12  ;;  %v4493_v11 = vld [vmem:[%s4659_s7 + $0x50] ss:$0 sps:$4 sm:$0x11]   ;;  %v4488_v12 = vld [vmem:[%s5510_s1 + $0x1d8] sm:$0xff]  }
  0x67   : > { %v682_v45 = vor.u32 %v681_v40, %v677_v13  ;;  %4090 = vmatpush3.bf16.msra.mxu1 %v4469_v44  ;;  %v725_v13 = vshrl.u32 %v4466_v20, 16  ;;  %v4482_v20 = vld [vmem:[%s4659_s7 + $0x24] sm:$0xfe]  }
  0x68   : > { %1512 = vmatmul.mubr.bf16.gmra.mrb[28].mxu0 %v4888_v7 }
  0x69   : > { %1519 = vmatprep.mubr.bf16.mxu0 %v4894_v25 }
  0x6a   : > { %1946 = vmatmul.mubr.bf16.gmra.mrb[28].mxu1 %v4763_v23  ;;  %v684_v23 = vshll.u32 %v4453_v27, 16  ;;  %v4467_v27 = vld [vmem:[%s4659_s7 + $0xbc] ss:$0 sps:$4 sm:$0x11]  }
  0x6b   : > { %1953 = vmatprep.mubr.bf16.mxu1 %v4812_v55  ;;  %v732_v40 = vshll.u32 %v4467_v27, 16  ;;  %v1002_v27 = vrot.slane %v4476_v15, 1  ;;  %v4499_v15 = vld [vmem:[%s4659_s7 + $0x54] sm:$0xfe]  }
  0x6c   : > { %v686_v46 = vrot.slane %v684_v23, 1  ;;  %v4969_v23 = vsel %vm543_vm0, %v718_v29, %v722_v10  ;;  %v1005_v29 = vrot.slane %v4483_v26, 1  ;;  %v4489_v26 = vld [vmem:[%s5510_s1 + $0x198] sm:$0xff]  }
  0x6d   : > { %v734_v44 = vrot.slane %v732_v40, 1  ;;  %v5020_v10 = vsel %vm994_vm1, %v1001_v57, %v1002_v27  ;;  %v4485_v40 = vld [vmem:[%s4659_s7 + $0x38] ss:$0 sps:$4 sm:$0x11]   ;;  %v1013_v57 = vrot.slane %v4492_v6, 1  ;;  %v1014_v27 = vrot.slane %v4493_v11, 1 }
  0x6e   : > { %v4925_v53 = vsel %vm543_vm0, %v682_v45, %v686_v46  ;;  %v730_v45 = vor.u32 %v729_v41, %v725_v13  ;;  %v4471_v46 = vld [vmem:[%s4659_s7 + $0xc8] ss:$0 sps:$4 sm:$0x11]   ;;  %v4484_v13 = vld [vmem:[%s4659_s7 + $0x30] sm:$0xfe]   ;;  %v1008_v51 = vrot.slane %v4485_v40, 1 }
  0x6f   : > { %v4480_v41 = vld [vmem:[%s5510_s1 + $0x1c8] sm:$0xff]   ;;  %v1007_v50 = vrot.slane %v4484_v13, 1  ;;  %v5072_v13 = vsel %vm994_vm1, %v1013_v57, %v1014_v27  ;;  %v4496_v40 = vld [vmem:[%s5510_s1 + $0x1a0] sm:$0xff]   ;;  %v4506_v57 = vld [vmem:[%s5510_s1 + $0x1b8] sm:$0xff]  }
  0x70   : > { %1520 = vmatmul.mubr.bf16.gmra.mrb[32].mxu0 %v4906_v33  ;;  %v4981_v52 = vsel %vm543_vm0, %v730_v45, %v734_v44  ;;  %v4490_v44 = vld [vmem:[%s4659_s7 + $0x3c] sm:$0xfe]   ;;  %v4491_v45 = vld [vmem:[%s4659_s7 + $0x44] ss:$0 sps:$4 sm:$0x11]  }
  0x71   : > { %1527 = vmatprep.mubr.bf16.mxu0 %v4910_v36  ;;  %v4522_v27 = vld [vmem:[%s4659_s7 + $0x18] sm:$0xff]  }
  0x72   : > { %1954 = vmatmul.mubr.bf16.gmra.mrb[32].mxu1 %v4803_v16  ;;  %v4477_v16 = vld [vmem:[%s5510_s1 + $0xb0] sm:$0xff]  }
  0x73   : > { %1961 = vmatprep.mubr.bf16.mxu1 %v4841_v24  ;;  %4091 = vmatprep.subr.bf16.mxu1 %v4477_v16 }
  0x74   : > { %4092 = vmatpush3.bf16.msra.mxu1 %v4477_v16  ;;  %v744_v16 = vshll.u32 %v4471_v46, 16  ;;  %v4481_v46 = vld [vmem:[%s5510_s1 + $0x188] sm:$0xff]  }
  0x75   : > { %4093 = vmatprep.subr.bf16.mxu1 %v4494_v28 }
  0x76   : > { %v746_v59 = vrot.slane %v744_v16, 1  ;;  %v1010_v16 = vrot.slane %v4490_v44, 1  ;;  %v4502_v44 = vld [vmem:[%s4659_s7 + $0x68] ss:$0 sps:$4 sm:$0x11]  }
  0x78   : > { %1528 = vmatmul.mubr.bf16.gmra.mrb[36].mxu0 %v4921_v48  ;;  %4094 = vmatpush3.bf16.msra.mxu1 %v4494_v28  ;;  %v4998_v3 = vsel %vm543_vm0, %v742_v19, %v746_v59  ;;  %v1004_v28 = vrot.slane %v4482_v20, 1  ;;  %v1011_v19 = vrot.slane %v4491_v45, 1  ;;  %v5046_v59 = vsel %vm994_vm1, %v1007_v50, %v1008_v51  ;;  %v4500_v20 = vld [vmem:[%s4659_s7 + $0x5c] ss:$0 sps:$4 sm:$0x11]   ;;  %v4497_v45 = vld [vmem:[%s5510_s1 + $0x1e8] sm:$0xff]  }
  0x79   : > { %1535 = vmatprep.mubr.bf16.mxu0 %v4925_v53  ;;  %4127 = vmatprep.subr.bf16.mxu1 %v4989_v60  ;;  %v4507_v50 = vld [vmem:[%s4659_s7] sm:$0xfe]   ;;  %v4508_v51 = vld [vmem:[%s4659_s7 + $0x8] ss:$0 sps:$4 sm:$0x11]  }
  0x7a   : > { %1962 = vmatmul.mubr.bf16.gmra.mrb[36].mxu1 %v4834_v17  ;;  %v5031_v43 = vsel %vm994_vm1, %v1004_v28, %v1005_v29  ;;  %v5057_v14 = vsel %vm994_vm1, %v1010_v16, %v1011_v19  ;;  %v4495_v28 = vld [vmem:[%s5510_s1 + $0x1e0] sm:$0xff]   ;;  %v1016_v29 = vrot.slane %v4499_v15, 1  ;;  %v1020_v19 = vrot.slane %v4502_v44, 1  ;;  %v4504_v15 = vld [vmem:[%s5510_s1 + $0x1b0] sm:$0xff]  }
  0x7b   : > { %1969 = vmatprep.mubr.bf16.mxu1 %v4859_v49  ;;  %v995_v6 = vrot.slane %v4507_v50, 1  ;;  %v996_v11 = vrot.slane %v4508_v51, 1 }
  0x80   : > { %1536 = vmatmul.mubr.bf16.gmra.mrb[40].mxu0 %v4936_v61 }
  0x81   : > { %1543 = vmatprep.mubr.bf16.mxu0 %v4942_v5 }
  0x82   : > { %1970 = vmatmul.mubr.bf16.gmra.mrb[40].mxu1 %v4852_v38 }
  0x83   : > { %1977 = vmatprep.mubr.bf16.mxu1 %v4865_v58 }
  0x88   : > { %1544 = vmatmul.mubr.bf16.gmra.mrb[44].mxu0 %v4951_v22 }
  0x89   : > { %1551 = vmatprep.mubr.bf16.mxu0 %v4955_v21 }
  0x8a   : > { %1978 = vmatmul.mubr.bf16.gmra.mrb[44].mxu1 %v4876_v4 }
  0x8b   : > { %1985 = vmatprep.mubr.bf16.mxu1 %v4880_v34 }
  0x90   : > { %1552 = vmatmul.mubr.bf16.gmra.mrb[48].mxu0 %v4966_v35 }
  0x91   : > { %1559 = vmatprep.mubr.bf16.mxu0 %v4969_v23 }
  0x92   : > { %1986 = vmatmul.mubr.bf16.gmra.mrb[48].mxu1 %v4888_v7 }
  0x93   : > { %1993 = vmatprep.mubr.bf16.mxu1 %v4894_v25 }
  0x98   : > { %1560 = vmatmul.mubr.bf16.gmra.mrb[52].mxu0 %v4978_v42 }
  0x99   : > { %1567 = vmatprep.mubr.bf16.mxu0 %v4981_v52 }
  0x9a   : > { %1994 = vmatmul.mubr.bf16.gmra.mrb[52].mxu1 %v4906_v33 }
  0x9b   : > { %2001 = vmatprep.mubr.bf16.mxu1 %v4910_v36 }
  0xa0   : > { %1568 = vmatmul.mubr.bf16.gmra.mrb[56].mxu0 %v4993_v62 }
  0xa1   : > { %1575 = vmatprep.mubr.bf16.mxu0 %v4998_v3 }
  0xa2   : > { %2002 = vmatmul.mubr.bf16.gmra.mrb[56].mxu1 %v4921_v48 }
  0xa3   : > { %2009 = vmatprep.mubr.bf16.mxu1 %v4925_v53 }
  0xa8   : > { %1576 = vmatmul.mubr.bf16.gmra.mrb[60].mxu0 %v5005_v8 }
  0xa9   : > { %4047 = vmatprep.mubr.bf16.mxu0 %v5011_v18 }
  0xaa   : > { %2010 = vmatmul.mubr.bf16.gmra.mrb[60].mxu1 %v4936_v61 }
  0xab   : > { %2017 = vmatprep.mubr.bf16.mxu1 %v4942_v5 }
  0xb0   : > { %4048 = vmatmul.mubr.bf16.vlgmr.msra.gmra.mrb[64].mxu0 %v5020_v10 }
  0xb1   : > { %3896 = vmatpush3.bf16.msra.mxu0 %v4479_v32  ;;  %4051 = vmatprep.mubr.bf16.mxu0 %v5031_v43  ;;  %v1017_v32 = vrot.slane %v4500_v20, 1  ;;  %v4505_v20 = vld [vmem:[%s5510_s1 + $0x1f8] sm:$0xff]  }
  0xb2   : > { %2018 = vmatmul.mubr.bf16.gmra.mrb[64].mxu1 %v4951_v22  ;;  %3897 = vmatprep.subr.bf16.mxu0 %v4480_v41  ;;  %v4501_v41 = vld [vmem:[%s4659_s7 + $0x60] sm:$0xfe]  }
  0xb3   : > { %2025 = vmatprep.mubr.bf16.mxu1 %v4955_v21  ;;  %v1019_v16 = vrot.slane %v4501_v41, 1 }
  0xb5   : > { %3898 = vmatpush3.bf16.msra.mxu0 %v4481_v46  ;;  %v5083_v46 = vsel %vm994_vm1, %v1016_v29, %v1017_v32  ;;  %v4523_v29 = vld [vmem:[%s4659_s7 + $0x24] sm:$0xff]  }
  0xb6   : > { %3899 = vmatprep.subr.bf16.mxu0 %v4486_v54  ;;  %v4498_v54 = vld [vmem:[%s5510_s1 + $0x1a8] sm:$0xff]  }
  0xb7   : > { %v4514_v32 = vld [vmem:[%s5510_s1 + $0x228] sm:$0xff]  }
  0xb8   : > { %4052 = vmatmul.mubr.bf16.gmra.mrb[68].mxu0 %v5046_v59 }
  0xb9   : > { %3900 = vmatpush3.bf16.msra.mxu0 %v4487_v2  ;;  %4055 = vmatprep.mubr.bf16.mxu0 %v5057_v14  ;;  %v4503_v2 = vld [vmem:[%s5510_s1 + $0x1f0] sm:$0xff]  }
  0xba   : > { %2026 = vmatmul.mubr.bf16.gmra.mrb[68].mxu1 %v4966_v35  ;;  %3901 = vmatprep.subr.bf16.mxu0 %v4488_v12  ;;  %v5098_v12 = vsel %vm994_vm1, %v1019_v16, %v1020_v19 }
  0xbb   : > { %2033 = vmatprep.mubr.bf16.mxu1 %v4969_v23 }
  0xbd   : > { %3902 = vmatpush3.bf16.msra.mxu0 %v4489_v26  ;;  %v997_v26 = vsel %vm994_vm1, %v995_v6, %v996_v11 }
  0xbe   : > { %3903 = vmatprep.subr.bf16.mxu0 %v4495_v28  ;;  %v4510_v28 = vld [vmem:[%s5510_s1 + $0x208] sm:$0xff]  }
  0xc0   : > { %4056 = vmatmul.mubr.bf16.gmra.mrb[72].mxu0 %v5072_v13 }
  0xc1   : > { %3904 = vmatpush3.bf16.msra.mxu0 %v4496_v40  ;;  %4059 = vmatprep.mubr.bf16.mxu0 %v5083_v46  ;;  %v4516_v40 = vld [vmem:[%s5510_s1 + $0x238] sm:$0xff]  }
  0xc2   : > { %2034 = vmatmul.mubr.bf16.gmra.mrb[72].mxu1 %v4978_v42  ;;  %3905 = vmatprep.subr.bf16.mxu0 %v4497_v45 }
  0xc3   : > { %2041 = vmatprep.mubr.bf16.mxu1 %v4981_v52 }
  0xc5   : > { %3906 = vmatpush3.bf16.msra.mxu0 %v4498_v54 }
  0xc6   : > { %3907 = vmatprep.subr.bf16.mxu0 %v4503_v2 }
  0xc8   : > { %4060 = vmatmul.mubr.bf16.gmra.mrb[76].mxu0 %v5098_v12 }
  0xc9   : > { %3908 = vmatpush3.bf16.msra.mxu0 %v4504_v15  ;;  %2485 = vmatprep.mubr.bf16.mxu0 %v4731_v0  ;;  %v4511_v0 = vld [vmem:[%s5510_s1 + $0x210] sm:$0xff]  }
  0xca   : > { %2042 = vmatmul.mubr.bf16.gmra.mrb[76].mxu1 %v4993_v62  ;;  %3909 = vmatprep.subr.bf16.mxu0 %v4505_v20 }
  0xcb   : > { %4095 = vmatprep.mubr.bf16.mxu1 %v997_v26 }
  0xcd   : > { %3910 = vmatpush3.bf16.msra.mxu0 %v4506_v57 }
  0xd0   : > { %2486 = vmatmul.mubr.bf16.vlgmr.msra.gmra.mrb[80].mxu0 %v4522_v27 }
  0xd1   : > { %2493 = vmatprep.mubr.bf16.mxu0 %v4772_v30  ;;  %v4512_v30 = vld [vmem:[%s5510_s1 + $0x218] sm:$0xff]  }
  0xd2   : > { %4096 = vmatmul.mubr.bf16.vlgmr.msra.gmra.mrb[80].mxu1 %v5011_v18  ;;  %v4524_v18 = vld [vmem:[%s4659_s7 + $0x30] sm:$0xff]  }
  0xd3   : > { %4128 = vmatpush3.bf16.msra.mxu1 %v4989_v60  ;;  %4099 = vmatprep.mubr.bf16.mxu1 %v5020_v10  ;;  %v4513_v60 = vld [vmem:[%s5510_s1 + $0x220] sm:$0xff]  }
  0xd4   : > { %4129 = vmatprep.subr.bf16.mxu1 %v4510_v28 }
  0xd7   : > { %4130 = vmatpush3.bf16.msra.mxu1 %v4510_v28 }
  0xd8   : > { %2494 = vmatmul.mubr.bf16.gmra.mrb[84].mxu0 %v4523_v29  ;;  %4131 = vmatprep.subr.bf16.mxu1 %v4511_v0 }
  0xd9   : > { %2501 = vmatprep.mubr.bf16.mxu0 %v4812_v55  ;;  %v4515_v55 = vld [vmem:[%s5510_s1 + $0x230] sm:$0xff]  }
  0xda   : > { %4100 = vmatmul.mubr.bf16.gmra.mrb[84].mxu1 %v5031_v43 }
  0xdb   : > { %4103 = vmatprep.mubr.bf16.mxu1 %v5046_v59  ;;  %4132 = vmatpush3.bf16.msra.mxu1 %v4511_v0 }
  0xdc   : > { %4133 = vmatprep.subr.bf16.mxu1 %v4512_v30 }
  0xdf   : > { %4134 = vmatpush3.bf16.msra.mxu1 %v4512_v30  ;;  %v4517_v30 = vld [vmem:[%s4659_s7 + $0xcc] sm:$0xff]  }
  0xe0   : > { %2502 = vmatmul.mubr.bf16.gmra.mrb[88].mxu0 %v4524_v18  ;;  %4135 = vmatprep.subr.bf16.mxu1 %v4513_v60 }
  0xe1   : > { %2509 = vmatprep.mubr.bf16.mxu0 %v4841_v24 }
  0xe2   : > { %4104 = vmatmul.mubr.bf16.gmra.mrb[88].mxu1 %v5057_v14 }
  0xe3   : > { %4107 = vmatprep.mubr.bf16.mxu1 %v5072_v13  ;;  %4136 = vmatpush3.bf16.msra.mxu1 %v4513_v60 }
  0xe4   : > { %4137 = vmatprep.subr.bf16.mxu1 %v4514_v32 }
  0xe7   : > { %4138 = vmatpush3.bf16.msra.mxu1 %v4514_v32  ;;  %v751_v32 = vshll.u32 %v4517_v30, 16 }
  0xe8   : > { %2510 = vmatmul.mubr.bf16.gmra.mrb[92].mxu0 %v4834_v17  ;;  %4139 = vmatprep.subr.bf16.mxu1 %v4515_v55 }
  0xe9   : > { %2517 = vmatprep.mubr.bf16.mxu0 %v4859_v49 }
  0xea   : > { %4108 = vmatmul.mubr.bf16.gmra.mrb[92].mxu1 %v5083_v46 }
  0xeb   : > { %4111 = vmatprep.mubr.bf16.mxu1 %v5098_v12  ;;  %4140 = vmatpush3.bf16.msra.mxu1 %v4515_v55 }
  0xec   : > { %4141 = vmatprep.subr.bf16.mxu1 %v4516_v40 }
  0xef   : > { %4142 = vmatpush3.bf16.msra.mxu1 %v4516_v40 }
  0xf0   : > { %2518 = vmatmul.mubr.bf16.gmra.mrb[96].mxu0 %v4852_v38 }
  0xf1   : > { %2525 = vmatprep.mubr.bf16.mxu0 %v4865_v58 }
  0xf2   : > { %4112 = vmatmul.mubr.bf16.gmra.mrb[0].mxu1 %v4689_v39 }
  0xf3   : > { %4115 = vmatprep.mubr.bf16.mxu1 %v4707_v47 }
  0xf8   : > { %2526 = vmatmul.mubr.bf16.gmra.mrb[100].mxu0 %v4876_v4 }
  0xf9   : > { %2533 = vmatprep.mubr.bf16.mxu0 %v4880_v34 }
  0xfa   : > { %4116 = vmatmul.mubr.bf16.gmra.mrb[4].mxu1 %v4734_v1 }
  0xfb   : > { %4119 = vmatprep.mubr.bf16.mxu1 %v4749_v9 }
 0x100   : > { %2534 = vmatmul.mubr.bf16.gmra.mrb[104].mxu0 %v4888_v7 }
 0x101   : > { %2541 = vmatprep.mubr.bf16.mxu0 %v4894_v25 }
 0x102   : > { %v3639_v17 = vpop.f32.mrb[0].mxu0  ;;  %4120 = vmatmul.mubr.bf16.gmra.mrb[8].mxu1 %v4775_v31 }
 0x103   : > { %v3640_v24 = vpop.f32.mrb[1].mxu0  ;;  %4123 = vmatprep.mubr.bf16.mxu1 %v4788_v37 }
 0x104   : > { %v5158_v49 = vadd.f32 %v3640_v24, %v3639_v17  ;;  %v3642_v41 = vpop.f32.mrb[2].mxu0 }
 0x105   : > { %v3643_v38 = vpop.f32.mrb[3].mxu0 }
 0x106   : > { %v5161_v44 = vadd.f32 %v3643_v38, %v3642_v41 }
 0x108   : > { %2542 = vmatmul.mubr.bf16.gmra.mrb[108].mxu0 %v4906_v33 }
 0x109   : > { %2549 = vmatprep.mubr.bf16.mxu0 %v4910_v36 }
 0x10a   : > { %v3645_v58 = vpop.f32.mrb[4].mxu0  ;;  %4124 = vmatmul.mubr.bf16.gmra.mrb[12].mxu1 %v4815_v56 }
 0x10b   : > { %v3646_v4 = vpop.f32.mrb[5].mxu0  ;;  %4143 = vmatprep.mubr.bf16.mxu1 %v5020_v10 }
 0x10c   : > { %v5167_v34 = vadd.f32 %v3646_v4, %v3645_v58  ;;  %v3648_v45 = vpop.f32.mrb[6].mxu0  ;;  %v749_v4 = vshrl.u32 %v4517_v30, 16 }
 0x10d   : > { %v3649_v50 = vpop.f32.mrb[7].mxu0 }
 0x10e   : > { %v5169_v51 = vadd.f32 %v3649_v50, %v3648_v45 }
 0x110   : > { %2550 = vmatmul.mubr.bf16.gmra.mrb[112].mxu0 %v4921_v48 }
 0x111   : > { %2557 = vmatprep.mubr.bf16.mxu0 %v4925_v53 }
 0x112   : > { %v3651_v7 = vpop.f32.mrb[8].mxu0  ;;  %4144 = vmatmul.mubr.bf16.vlgmr.msra.gmra.mrb[80].mxu1 %v5031_v43 }
 0x113   : > { %v3652_v25 = vpop.f32.mrb[9].mxu0  ;;  %4147 = vmatprep.mubr.bf16.mxu1 %v5046_v59 }
 0x114   : > { %v5175_v54 = vadd.f32 %v3652_v25, %v3651_v7  ;;  %v3654_v16 = vpop.f32.mrb[10].mxu0 }
 0x115   : > { %v3655_v19 = vpop.f32.mrb[11].mxu0 }
 0x116   : > { %v5178_v2 = vadd.f32 %v3655_v19, %v3654_v16 }
 0x118   : > { %2558 = vmatmul.mubr.bf16.gmra.mrb[116].mxu0 %v4936_v61 }
 0x119   : > { %2565 = vmatprep.mubr.bf16.mxu0 %v4942_v5 }
 0x11a   : > { %v3657_v33 = vpop.f32.mrb[12].mxu0  ;;  %4148 = vmatmul.mubr.bf16.gmra.mrb[84].mxu1 %v5057_v14 }
 0x11b   : > { %v3658_v36 = vpop.f32.mrb[13].mxu0  ;;  %4151 = vmatprep.mubr.bf16.mxu1 %v5072_v13 }
 0x11c   : > { %v5186_v10 = vadd.f32 %v3658_v36, %v3657_v33  ;;  %v3660_v48 = vpop.f32.mrb[14].mxu0 }
 0x11d   : > { %v3661_v6 = vpop.f32.mrb[15].mxu0 }
 0x11e   : > { %v5189_v11 = vadd.f32 %v3661_v6, %v3660_v48 }
 0x120   : > { %2566 = vmatmul.mubr.bf16.gmra.mrb[120].mxu0 %v4951_v22 }
 0x121   : > { %2573 = vmatprep.mubr.bf16.mxu0 %v4955_v21 }
 0x122   : > { %4152 = vmatmul.mubr.bf16.gmra.mrb[88].mxu1 %v5083_v46 }
 0x123   : > { %v3663_v53 = vpop.f32.mrb[16].mxu0  ;;  %4155 = vmatprep.mubr.bf16.mxu1 %v5098_v12 }
 0x124   : > { %v3664_v61 = vpop.f32.mrb[17].mxu0 }
 0x125   : > { %v3775_v5 = vpop.f32.mrb[16].mxu1  ;;  %v5195_v43 = vadd.f32 %v3664_v61, %v3663_v53  ;;  %v3666_v59 = vpop.f32.mrb[18].mxu0 }
 0x126   : > { %v3776_v14 = vpop.f32.mrb[17].mxu1  ;;  %v3667_v15 = vpop.f32.mrb[19].mxu0 }
 0x127   : > { %v5197_v20 = vadd.f32 %v3776_v14, %v3775_v5  ;;  %v3778_v13 = vpop.f32.mrb[18].mxu1  ;;  %v5199_v26 = vadd.f32 %v3667_v15, %v3666_v59  ;;  %v4520_v59 = vld [vmem:[%s4659_s7 + $0xcc] sm:$0xfe]   ;;  %v4521_v14 = vld [vmem:[%s4659_s7 + $0xd4] ss:$0 sps:$4 sm:$0x11]  }
 0x128   : > { %v3779_v22 = vpop.f32.mrb[19].mxu1  ;;  %2574 = vmatmul.mubr.bf16.gmra.mrb[124].mxu0 %v4966_v35 }
 0x129   : > { %v5202_v21 = vadd.f32 %v3779_v22, %v3778_v13  ;;  %2581 = vmatprep.mubr.bf16.mxu0 %v4969_v23  ;;  %v1046_v22 = vrot.slane %v4520_v59, 1 }
 0x12a   : > { %4156 = vmatmul.mubr.bf16.gmra.mrb[92].mxu1 %v4689_v39 }
 0x12b   : > { %v3669_v46 = vpop.f32.mrb[20].mxu0  ;;  %4159 = vmatprep.mubr.bf16.mxu1 %v4707_v47  ;;  %v4518_v47 = vld [vmem:[%s4659_s7 + $0xd4] ss:$0 sps:$4 sm:$0x11]  }
 0x12c   : > { %v3670_v12 = vpop.f32.mrb[21].mxu0  ;;  %v756_v45 = vshll.u32 %v4518_v47, 16 }
 0x12d   : > { %v3781_v57 = vpop.f32.mrb[20].mxu1  ;;  %v5207_v27 = vadd.f32 %v3670_v12, %v3669_v46  ;;  %v3672_v28 = vpop.f32.mrb[22].mxu0  ;;  %v1047_v46 = vrot.slane %v4521_v14, 1 }
 0x12e   : > { %v3782_v0 = vpop.f32.mrb[21].mxu1  ;;  %v3673_v29 = vpop.f32.mrb[23].mxu0  ;;  %v758_v16 = vrot.slane %v756_v45, 1 }
 0x12f   : > { %v5210_v60 = vadd.f32 %v3782_v0, %v3781_v57  ;;  %v3784_v35 = vpop.f32.mrb[22].mxu1  ;;  %v5212_v18 = vadd.f32 %v3673_v29, %v3672_v28  ;;  %v4519_v57 = vld [vmem:[%s4659_s7 + $0xcc] sm:$0xff]   ;;  %s3495_s7 = sshll.u32 %s5516_s13, 7 }
 0x130   : > { %v3785_v23 = vpop.f32.mrb[23].mxu1  ;;  %2582 = vmatmul.mubr.bf16.gmra.mrb[128].mxu0 %v4978_v42  ;;  %v753_v42 = vrot.slane %v751_v32, 1  ;;  %v1048_v32 = vsel %vm994_vm1, %v1046_v22, %v1047_v46  ;;  %s5431_s18 = scalar_lea.vmem %s5511_s2, %s3495_s7 }
 0x131   : > { %v5215_v39 = vadd.f32 %v3785_v23, %v3784_v35  ;;  %2589 = vmatprep.mubr.bf16.mxu0 %v4981_v52 }
 0x132   : > { %4160 = vmatmul.mubr.bf16.gmra.mrb[0].mxu1 %v4734_v1 }
 0x133   : > { %v3675_v55 = vpop.f32.mrb[24].mxu0  ;;  %4163 = vmatprep.mubr.bf16.mxu1 %v4749_v9  ;;  %v754_v9 = vor.u32 %v753_v42, %v749_v4 }
 0x134   : > { %v3676_v40 = vpop.f32.mrb[25].mxu0 }
 0x135   : > { %v3787_v17 = vpop.f32.mrb[24].mxu1  ;;  %v5221_v24 = vadd.f32 %v3676_v40, %v3675_v55  ;;  %v3678_v41 = vpop.f32.mrb[26].mxu0  ;;  %v759_v61 = vsel %vm543_vm0, %v754_v9, %v758_v16 }
 0x136   : > { %v3788_v38 = vpop.f32.mrb[25].mxu1  ;;  %v3679_v58 = vpop.f32.mrb[27].mxu0 }
 0x137   : > { %v5223_v50 = vadd.f32 %v3788_v38, %v3787_v17  ;;  %v3790_v52 = vpop.f32.mrb[26].mxu1  ;;  %v5225_v7 = vadd.f32 %v3679_v58, %v3678_v41 }
 0x138   : > { %v3791_v1 = vpop.f32.mrb[27].mxu1  ;;  %2590 = vmatmul.mubr.bf16.gmra.mrb[132].mxu0 %v4993_v62 }
 0x139   : > { %v5228_v25 = vadd.f32 %v3791_v1, %v3790_v52  ;;  %2597 = vmatprep.mubr.bf16.mxu0 %v4998_v3 }
 0x13a   : > { %4164 = vmatmul.mubr.bf16.gmra.mrb[4].mxu1 %v4775_v31 }
 0x13b   : > { %v3681_v19 = vpop.f32.mrb[28].mxu0  ;;  %4167 = vmatprep.mubr.bf16.mxu1 %v4788_v37 }
 0x13c   : > { %v3682_v33 = vpop.f32.mrb[29].mxu0 }
 0x13d   : > { %v3793_v36 = vpop.f32.mrb[28].mxu1  ;;  %v5233_v48 = vadd.f32 %v3682_v33, %v3681_v19  ;;  %v3684_v6 = vpop.f32.mrb[30].mxu0 }
 0x13e   : > { %v3794_v53 = vpop.f32.mrb[29].mxu1  ;;  %v3685_v62 = vpop.f32.mrb[31].mxu0 }
 0x13f   : > { %v5236_v3 = vadd.f32 %v3794_v53, %v3793_v36  ;;  %v3796_v5 = vpop.f32.mrb[30].mxu1  ;;  %v5238_v31 = vadd.f32 %v3685_v62, %v3684_v6 }
 0x140   : > { %v3797_v15 = vpop.f32.mrb[31].mxu1  ;;  %2598 = vmatmul.mubr.bf16.gmra.mrb[136].mxu0 %v5005_v8 }
 0x141   : > { %v5243_v37 = vadd.f32 %v3797_v15, %v3796_v5  ;;  %2605 = vmatprep.mubr.bf16.mxu0 %v759_v61 }
 0x142   : > { %4168 = vmatmul.mubr.bf16.gmra.mrb[8].mxu1 %v4815_v56 }
 0x143   : > { %v3687_v13 = vpop.f32.mrb[32].mxu0  ;;  %4171 = vmatprep.mubr.bf16.mxu1 %v4828_v63 }
 0x144   : > { %v3688_v12 = vpop.f32.mrb[33].mxu0 }
 0x145   : > { %v3799_v28 = vpop.f32.mrb[32].mxu1  ;;  %v3689_v0 = vadd.f32 %v3688_v12, %v3687_v13  ;;  %v3690_v29 = vpop.f32.mrb[34].mxu0 }
 0x146   : > { %v3800_v30 = vpop.f32.mrb[33].mxu1  ;;  %v3691_v35 = vpop.f32.mrb[35].mxu0 }
 0x147   : > { %v5248_v23 = vadd.f32 %v3800_v30, %v3799_v28  ;;  %v3802_v8 = vpop.f32.mrb[34].mxu1  ;;  %v3692_v47 = vadd.f32 %v3691_v35, %v3690_v29 }
 0x148   : > { %v3803_v55 = vpop.f32.mrb[35].mxu1  ;;  %2606 = vmatmul.mubr.bf16.gmra.mrb[140].mxu0 %v4519_v57 }
 0x149   : > { %v5251_v56 = vadd.f32 %v3803_v55, %v3802_v8 }
 0x14a   : > { %4172 = vmatmul.mubr.bf16.gmra.mrb[12].mxu1 %v1048_v32 }
 0x14b   : > { %v3693_v63 = vpop.f32.mrb[36].mxu0 }
 0x14c   : > { %v3694_v40 = vpop.f32.mrb[37].mxu0 }
 0x14d   : > { %v3805_v17 = vpop.f32.mrb[36].mxu1  ;;  %v3695_v41 = vadd.f32 %v3694_v40, %v3693_v63  ;;  %v3696_v38 = vpop.f32.mrb[38].mxu0 }
 0x14e   : > { %v3806_v58 = vpop.f32.mrb[37].mxu1  ;;  %v3697_v4 = vpop.f32.mrb[39].mxu0 }
 0x14f   : > { %v5253_v42 = vadd.f32 %v3806_v58, %v3805_v17  ;;  %v3808_v45 = vpop.f32.mrb[38].mxu1  ;;  %v3698_v52 = vadd.f32 %v3697_v4, %v3696_v38 }
 0x150   : > { %v3809_v1 = vpop.f32.mrb[39].mxu1 }
 0x151   : > { %v5255_v9 = vadd.f32 %v3809_v1, %v3808_v45 }
 0x153   : > { %v3699_v16 = vpop.f32.mrb[40].mxu0 }
 0x154   : > { %v3700_v19 = vpop.f32.mrb[41].mxu0 }
 0x155   : > { %v3811_v33 = vpop.f32.mrb[40].mxu1  ;;  %v3701_v36 = vadd.f32 %v3700_v19, %v3699_v16  ;;  %v3702_v6 = vpop.f32.mrb[42].mxu0 }
 0x156   : > { %v3812_v53 = vpop.f32.mrb[41].mxu1  ;;  %v3703_v62 = vpop.f32.mrb[43].mxu0 }
 0x157   : > { %v5257_v61 = vadd.f32 %v3812_v53, %v3811_v33  ;;  %v3814_v5 = vpop.f32.mrb[42].mxu1  ;;  %v3704_v59 = vadd.f32 %v3703_v62, %v3702_v6 }
 0x158   : > { %v3815_v14 = vpop.f32.mrb[43].mxu1 }
 0x159   : > { %v5259_v15 = vadd.f32 %v3815_v14, %v3814_v5 }
 0x15b   : > { %v3705_v13 = vpop.f32.mrb[44].mxu0 }
 0x15c   : > { %v3706_v22 = vpop.f32.mrb[45].mxu0 }
 0x15d   : > { %v3817_v46 = vpop.f32.mrb[44].mxu1  ;;  %v3707_v12 = vadd.f32 %v3706_v22, %v3705_v13  ;;  %v3708_v57 = vpop.f32.mrb[46].mxu0 }
 0x15e   : > { %v3818_v28 = vpop.f32.mrb[45].mxu1  ;;  %v3709_v29 = vpop.f32.mrb[47].mxu0 }
 0x15f   : > { %v5261_v30 = vadd.f32 %v3818_v28, %v3817_v46  ;;  %v3820_v35 = vpop.f32.mrb[46].mxu1  ;;  %v3710_v8 = vadd.f32 %v3709_v29, %v3708_v57 }
 0x160   : > { %v3821_v32 = vpop.f32.mrb[47].mxu1 }
 0x161   : > { %v5263_v55 = vadd.f32 %v3821_v32, %v3820_v35 }
 0x163   : > { %v3711_v63 = vpop.f32.mrb[48].mxu0 }
 0x164   : > { %v3712_v40 = vpop.f32.mrb[49].mxu0 }
 0x165   : > { %v3823_v17 = vpop.f32.mrb[48].mxu1  ;;  %v5265_v38 = vadd.f32 %v3712_v40, %v3711_v63  ;;  %v3714_v58 = vpop.f32.mrb[50].mxu0 }
 0x166   : > { %v3824_v4 = vpop.f32.mrb[49].mxu1  ;;  %v3715_v45 = vpop.f32.mrb[51].mxu0 }
 0x167   : > { %v3825_v1 = vadd.f32 %v3824_v4, %v3823_v17  ;;  %v3826_v16 = vpop.f32.mrb[50].mxu1  ;;  %v5267_v19 = vadd.f32 %v3715_v45, %v3714_v58 }
 0x168   : > { %v3827_v33 = vpop.f32.mrb[51].mxu1 }
 0x169   : > { %v5269_v6 = vadd.f32 %v3825_v1, %v3689_v0  ;;  %v3828_v53 = vadd.f32 %v3827_v33, %v3826_v16 }
 0x16b   : > { %v5271_v62 = vadd.f32 %v3828_v53, %v3692_v47  ;;  %v3717_v5 = vpop.f32.mrb[52].mxu0 }
 0x16c   : > { %v3718_v14 = vpop.f32.mrb[53].mxu0 }
 0x16d   : > { %v3829_v13 = vpop.f32.mrb[52].mxu1  ;;  %v5273_v22 = vadd.f32 %v3718_v14, %v3717_v5  ;;  %v3720_v46 = vpop.f32.mrb[54].mxu0 }
 0x16e   : > { %v3830_v57 = vpop.f32.mrb[53].mxu1  ;;  %v3721_v28 = vpop.f32.mrb[55].mxu0 }
 0x16f   : > { %v3831_v29 = vadd.f32 %v3830_v57, %v3829_v13  ;;  %v3832_v35 = vpop.f32.mrb[54].mxu1  ;;  %v5275_v32 = vadd.f32 %v3721_v28, %v3720_v46 }
 0x170   : > { %v3833_v63 = vpop.f32.mrb[55].mxu1 }
 0x171   : > { %v5277_v40 = vadd.f32 %v3831_v29, %v3695_v41  ;;  %v3834_v0 = vadd.f32 %v3833_v63, %v3832_v35 }
 0x173   : > { %v5279_v17 = vadd.f32 %v3834_v0, %v3698_v52  ;;  %v3723_v47 = vpop.f32.mrb[56].mxu0 }
 0x174   : > { %v3724_v58 = vpop.f32.mrb[57].mxu0 }
 0x175   : > { %5513 = vst [vmem:[#allocation3_spill] sm:$0xff] %v5279_v17  ;;  %v3835_v4 = vpop.f32.mrb[56].mxu1  ;;  %v5281_v45 = vadd.f32 %v3724_v58, %v3723_v47  ;;  %v3726_v1 = vpop.f32.mrb[58].mxu0 }
 0x176   : > { %v3836_v16 = vpop.f32.mrb[57].mxu1  ;;  %v3727_v33 = vpop.f32.mrb[59].mxu0 }
 0x177   : > { %v3837_v53 = vadd.f32 %v3836_v16, %v3835_v4  ;;  %v3838_v5 = vpop.f32.mrb[58].mxu1  ;;  %v5283_v14 = vadd.f32 %v3727_v33, %v3726_v1 }
 0x178   : > { %v3839_v13 = vpop.f32.mrb[59].mxu1 }
 0x179   : > { %v5285_v46 = vadd.f32 %v3837_v53, %v3701_v36  ;;  %v3840_v41 = vadd.f32 %v3839_v13, %v3838_v5 }
 0x17b   : > { %v5287_v57 = vadd.f32 %v3840_v41, %v3704_v59  ;;  %v3729_v52 = vpop.f32.mrb[60].mxu0 }
 0x17c   : > { %v3730_v28 = vpop.f32.mrb[61].mxu0 }
 0x17d   : > { %v3841_v29 = vpop.f32.mrb[60].mxu1  ;;  %v5289_v35 = vadd.f32 %v3730_v28, %v3729_v52  ;;  %v3732_v63 = vpop.f32.mrb[62].mxu0 }
 0x17e   : > { %v3842_v0 = vpop.f32.mrb[61].mxu1  ;;  %v3733_v47 = vpop.f32.mrb[63].mxu0 }
 0x17f   : > { %v3843_v58 = vadd.f32 %v3842_v0, %v3841_v29  ;;  %v3844_v17 = vpop.f32.mrb[62].mxu1  ;;  %v5291_v4 = vadd.f32 %v3733_v47, %v3732_v63 }
 0x180   : > { %v3845_v1 = vpop.f32.mrb[63].mxu1 }
 0x181   : > { %v5293_v16 = vadd.f32 %v3843_v58, %v3707_v12  ;;  %v3846_v36 = vadd.f32 %v3845_v1, %v3844_v17 }
 0x183   : > { %v5295_v33 = vadd.f32 %v3846_v36, %v3710_v8  ;;  %v4049_v59 = vpop.f32.mrb[64].mxu0 }
 0x184   : > { %v1627_v53 = vadd.f32 %v4049_v59, %v5167_v34  ;;  %v1618_v5 = vpop.f32.mrb[65].mxu0 }
 0x185   : > { %v3847_v13 = vpop.f32.mrb[64].mxu1  ;;  %v1619_v41 = vadd.f32 %v5158_v49, %v1618_v5  ;;  %v4050_v52 = vpop.f32.mrb[66].mxu0 }
 0x186   : > { %v5300_v28 = vadd.f32 %v5210_v60, %v1627_v53  ;;  %v3848_v29 = vpop.f32.mrb[65].mxu1  ;;  %v1630_v63 = vadd.f32 %v4050_v52, %v5169_v51  ;;  %v1621_v0 = vpop.f32.mrb[67].mxu0 }
 0x187   : > { %v5304_v12 = vadd.f32 %v5197_v20, %v1619_v41  ;;  %v3849_v8 = vadd.f32 %v3848_v29, %v3847_v13  ;;  %v3850_v17 = vpop.f32.mrb[66].mxu1  ;;  %v1622_v47 = vadd.f32 %v5161_v44, %v1621_v0 }
 0x188   : > { %v5308_v34 = vadd.f32 %v5215_v39, %v1630_v63  ;;  %v3851_v58 = vpop.f32.mrb[67].mxu1 }
 0x189   : > { %v5311_v49 = vadd.f32 %v3849_v8, %v5265_v38  ;;  %v5314_v60 = vadd.f32 %v5202_v21, %v1622_v47  ;;  %v3852_v1 = vadd.f32 %v3851_v58, %v3850_v17 }
 0x18b   : > { %v5317_v51 = vadd.f32 %v3852_v1, %v5267_v19  ;;  %v4053_v20 = vpop.f32.mrb[68].mxu0 }
 0x18c   : > { %v1643_v36 = vadd.f32 %v4053_v20, %v5186_v10  ;;  %v1634_v59 = vpop.f32.mrb[69].mxu0 }
 0x18d   : > { %v3853_v53 = vpop.f32.mrb[68].mxu1  ;;  %v1635_v44 = vadd.f32 %v5175_v54, %v1634_v59  ;;  %v4054_v39 = vpop.f32.mrb[70].mxu0 }
 0x18e   : > { %v5322_v5 = vadd.f32 %v5236_v3, %v1643_v36  ;;  %v3854_v38 = vpop.f32.mrb[69].mxu1  ;;  %v1646_v13 = vadd.f32 %v4054_v39, %v5189_v11  ;;  %v1637_v21 = vpop.f32.mrb[71].mxu0 }
 0x18f   : > { %v5326_v41 = vadd.f32 %v5223_v50, %v1635_v44  ;;  %v3855_v19 = vadd.f32 %v3854_v38, %v3853_v53  ;;  %v3856_v52 = vpop.f32.mrb[70].mxu1  ;;  %v1638_v29 = vadd.f32 %v5178_v2, %v1637_v21 }
 0x190   : > { %v5330_v10 = vadd.f32 %v5243_v37, %v1646_v13  ;;  %v3857_v63 = vpop.f32.mrb[71].mxu1 }
 0x191   : > { %v5333_v54 = vadd.f32 %v3855_v19, %v5273_v22  ;;  %v5336_v3 = vadd.f32 %v5228_v25, %v1638_v29  ;;  %v3858_v0 = vadd.f32 %v3857_v63, %v3856_v52 }
 0x193   : > { %v5339_v11 = vadd.f32 %v3858_v0, %v5275_v32  ;;  %v4057_v50 = vpop.f32.mrb[72].mxu0 }
 0x194   : > { %v1659_v8 = vadd.f32 %v4057_v50, %v5207_v27  ;;  %v1650_v17 = vpop.f32.mrb[73].mxu0 }
 0x195   : > { %v3859_v47 = vpop.f32.mrb[72].mxu1  ;;  %v1651_v2 = vadd.f32 %v5195_v43, %v1650_v17  ;;  %v4058_v37 = vpop.f32.mrb[74].mxu0 }
 0x196   : > { %v5344_v58 = vadd.f32 %v5253_v42, %v1659_v8  ;;  %v3860_v22 = vpop.f32.mrb[73].mxu1  ;;  %v1662_v1 = vadd.f32 %v4058_v37, %v5212_v18  ;;  %v1653_v25 = vpop.f32.mrb[75].mxu0 }
 0x197   : > { %v5348_v20 = vadd.f32 %v5248_v23, %v1651_v2  ;;  %v3861_v32 = vadd.f32 %v3860_v22, %v3859_v47  ;;  %v3862_v36 = vpop.f32.mrb[74].mxu1  ;;  %v1654_v59 = vadd.f32 %v5199_v26, %v1653_v25 }
 0x198   : > { %v5352_v27 = vadd.f32 %v5255_v9, %v1662_v1  ;;  %v3863_v53 = vpop.f32.mrb[75].mxu1 }
 0x199   : > { %v5355_v43 = vadd.f32 %v3861_v32, %v5281_v45  ;;  %v1959_v42 = vadd.f32 %v5251_v56, %v1654_v59  ;;  %v3864_v44 = vadd.f32 %v3863_v53, %v3862_v36 }
 0x19b   : > { %v5359_v18 = vadd.f32 %v3864_v44, %v5283_v14  ;;  %v4061_v39 = vpop.f32.mrb[76].mxu0 }
 0x19c   : > { %v1675_v23 = vadd.f32 %v4061_v39, %v5233_v48  ;;  %v1666_v38 = vpop.f32.mrb[77].mxu0 }
 0x19d   : > { %v3865_v13 = vpop.f32.mrb[76].mxu1  ;;  %v1667_v26 = vadd.f32 %v5221_v24, %v1666_v38  ;;  %v4062_v21 = vpop.f32.mrb[78].mxu0 }
 0x19e   : > { %v5364_v9 = vadd.f32 %v5261_v30, %v1675_v23  ;;  %v3866_v19 = vpop.f32.mrb[77].mxu1  ;;  %v1678_v45 = vadd.f32 %v4062_v21, %v5238_v31  ;;  %v1669_v52 = vpop.f32.mrb[79].mxu0 }
 0x19f   : > { %v5368_v56 = vadd.f32 %v5257_v61, %v1667_v26  ;;  %v3867_v14 = vadd.f32 %v3866_v19, %v3865_v13  ;;  %v3868_v29 = vpop.f32.mrb[78].mxu1  ;;  %v1670_v63 = vadd.f32 %v5225_v7, %v1669_v52 }
 0x1a0   : > { %v5372_v48 = vadd.f32 %v5263_v55, %v1678_v45  ;;  %v3869_v0 = vpop.f32.mrb[79].mxu1 }
 0x1a1   : > { %v5375_v24 = vadd.f32 %v3867_v14, %v5289_v35  ;;  %v1975_v30 = vadd.f32 %v5259_v15, %v1670_v63  ;;  %v3870_v50 = vadd.f32 %v3869_v0, %v3868_v29 }
 0x1a3   : > { %v5379_v31 = vadd.f32 %v3870_v50, %v5291_v4  ;;  %v3911_v8 = vpop.f32.mrb[80].mxu0 }
 0x1a4   : > { %v3912_v61 = vpop.f32.mrb[81].mxu0 }
 0x1a5   : > { %v3913_v17 = vadd.f32 %v3912_v61, %v3911_v8  ;;  %v3914_v47 = vpop.f32.mrb[82].mxu0 }
 0x1a6   : > { %v3915_v2 = vpop.f32.mrb[83].mxu0 }
 0x1a7   : > { %v3916_v37 = vadd.f32 %v3915_v2, %v3914_v47  ;;  %v5382_v7 = vadd.f32 %v3913_v17, %v5304_v12 }
 0x1a9   : > { %v5385_v55 = vadd.f32 %v3916_v37, %v5314_v60 }
 0x1ab   : > { %v3917_v35 = vpop.f32.mrb[84].mxu0 }
 0x1ac   : > { %v3918_v22 = vpop.f32.mrb[85].mxu0 }
 0x1ad   : > { %v3919_v1 = vadd.f32 %v3918_v22, %v3917_v35  ;;  %v3920_v15 = vpop.f32.mrb[86].mxu0 }
 0x1ae   : > { %v3921_v25 = vpop.f32.mrb[87].mxu0 }
 0x1af   : > { %v3922_v32 = vadd.f32 %v3921_v25, %v3920_v15  ;;  %v4193_v4 = vadd.f32 %v3919_v1, %v5300_v28 }
 0x1b1   : > { %v4201_v36 = vadd.f32 %v3922_v32, %v5308_v34 }
 0x1b3   : > { %v3923_v59 = vpop.f32.mrb[88].mxu0 }
 0x1b4   : > { %v3924_v53 = vpop.f32.mrb[89].mxu0 }
 0x1b5   : > { %v3925_v44 = vadd.f32 %v3924_v53, %v3923_v59  ;;  %v3926_v39 = vpop.f32.mrb[90].mxu0 }
 0x1b6   : > { %v3927_v23 = vpop.f32.mrb[91].mxu0 }
 0x1b7   : > { %v3928_v12 = vadd.f32 %v3927_v23, %v3926_v39  ;;  %v5390_v38 = vadd.f32 %v3925_v44, %v5326_v41 }
 0x1b9   : > { %v5393_v60 = vadd.f32 %v3928_v12, %v5336_v3 }
 0x1bb   : > { %v3929_v13 = vpop.f32.mrb[92].mxu0 }
 0x1bc   : > { %v3930_v26 = vpop.f32.mrb[93].mxu0 }
 0x1bd   : > { %v3931_v21 = vadd.f32 %v3930_v26, %v3929_v13  ;;  %v3932_v19 = vpop.f32.mrb[94].mxu0 }
 0x1be   : > { %v3933_v45 = vpop.f32.mrb[95].mxu0 }
 0x1bf   : > { %v3934_v28 = vadd.f32 %v3933_v45, %v3932_v19  ;;  %v5396_v34 = vadd.f32 %v3931_v21, %v5322_v5 }
 0x1c1   : > { %v5399_v52 = vadd.f32 %v3934_v28, %v5330_v10 }
 0x1c3   : > { %v3935_v14 = vpop.f32.mrb[96].mxu0 }
 0x1c4   : > { %v3936_v29 = vpop.f32.mrb[97].mxu0 }
 0x1c5   : > { %v3937_v63 = vadd.f32 %v3936_v29, %v3935_v14  ;;  %v3938_v41 = vpop.f32.mrb[98].mxu0 }
 0x1c6   : > { %v3939_v0 = vpop.f32.mrb[99].mxu0 }
 0x1c7   : > { %v3940_v50 = vadd.f32 %v3939_v0, %v3938_v41  ;;  %v5402_v3 = vadd.f32 %v3937_v63, %v5348_v20 }
 0x1c9   : > { %v5404_v8 = vadd.f32 %v3940_v50, %v1959_v42 }
 0x1cb   : > { %v3941_v61 = vpop.f32.mrb[100].mxu0 }
 0x1cc   : > { %v3942_v17 = vpop.f32.mrb[101].mxu0 }
 0x1cd   : > { %v3943_v47 = vadd.f32 %v3942_v17, %v3941_v61  ;;  %v3944_v2 = vpop.f32.mrb[102].mxu0 }
 0x1ce   : > { %v3945_v5 = vpop.f32.mrb[103].mxu0 }
 0x1cf   : > { %v3946_v37 = vadd.f32 %v3945_v5, %v3944_v2  ;;  %v5407_v10 = vadd.f32 %v3943_v47, %v5344_v58 }
 0x1d1   : > { %v5410_v35 = vadd.f32 %v3946_v37, %v5352_v27 }
 0x1d3   : > { %v3947_v22 = vpop.f32.mrb[104].mxu0 }
 0x1d4   : > { %v3948_v1 = vpop.f32.mrb[105].mxu0 }
 0x1d5   : > { %v3949_v15 = vadd.f32 %v3948_v1, %v3947_v22  ;;  %v3950_v25 = vpop.f32.mrb[106].mxu0 }
 0x1d6   : > { %v3951_v20 = vpop.f32.mrb[107].mxu0 }
 0x1d7   : > { %v3952_v32 = vadd.f32 %v3951_v20, %v3950_v25  ;;  %v5413_v42 = vadd.f32 %v3949_v15, %v5368_v56 }
 0x1d9   : > { %v5415_v59 = vadd.f32 %v3952_v32, %v1975_v30 }
 0x1db   : > { %v3953_v53 = vpop.f32.mrb[108].mxu0 }
 0x1dc   : > { %v3954_v44 = vpop.f32.mrb[109].mxu0 }
 0x1dd   : > { %v3955_v39 = vadd.f32 %v3954_v44, %v3953_v53  ;;  %v3956_v58 = vpop.f32.mrb[110].mxu0 }
 0x1de   : > { %v3957_v23 = vpop.f32.mrb[111].mxu0 }
 0x1df   : > { %v3958_v12 = vadd.f32 %v3957_v23, %v3956_v58  ;;  %v5418_v27 = vadd.f32 %v3955_v39, %v5364_v9 }
 0x1e1   : > { %v5421_v13 = vadd.f32 %v3958_v12, %v5372_v48 }
 0x1e3   : > { %v3959_v26 = vpop.f32.mrb[112].mxu0 }
 0x1e4   : > { %v3960_v21 = vpop.f32.mrb[113].mxu0 }
 0x1e5   : > { %v4145_v19 = vpop.f32.mrb[80].mxu1  ;;  %v3961_v56 = vadd.f32 %v3960_v21, %v3959_v26  ;;  %v3962_v45 = vpop.f32.mrb[114].mxu0 }
 0x1e6   : > { %v4194_v30 = vadd.f32 %v4193_v4, %v4145_v19  ;;  %v2648_v28 = vpop.f32.mrb[81].mxu1  ;;  %v3963_v14 = vpop.f32.mrb[115].mxu0 }
 0x1e7   : > { %v4198_v29 = vadd.f32 %v5382_v7, %v2648_v28  ;;  %v4146_v63 = vpop.f32.mrb[82].mxu1  ;;  %v3964_v41 = vadd.f32 %v3963_v14, %v3962_v45  ;;  %v5426_v0 = vadd.f32 %v5269_v6, %v3961_v56  ;;  %v5514_v45 = vld [vmem:[#allocation3_spill] sm:$0xff] }
 0x1e8   : > { %v4202_v9 = vadd.f32 %v4201_v36, %v4146_v63  ;;  %v2651_v50 = vpop.f32.mrb[83].mxu1 }
 0x1e9   : > { %v4206_v48 = vadd.f32 %v5385_v55, %v2651_v50  ;;  %v5435_v4 = vadd.f32 %v5271_v62, %v3964_v41 }
 0x1ea   : > { %v2808_v7 = vpack.c.bf16 %v4202_v9, %v4194_v30 }
 0x1eb   : > { %v2807_v61 = vpack.c.bf16 %v4206_v48, %v4198_v29  ;;  %v3965_v17 = vpop.f32.mrb[116].mxu0 }
 0x1ec   : > { %3608 = vst [vmem:[%s5431_s18 + $0x8] sm:$0xff] %v2808_v7   ;;  %v3966_v6 = vpop.f32.mrb[117].mxu0  ;;  %v2969_v47 = vunpack.c.l.bf16 %v2808_v7  ;;  %v2970_v1 = vunpack.c.h.bf16 %v2808_v7 }
 0x1ed   : > { %3532 = vst [vmem:[%s5431_s18] sm:$0xff] %v2807_v61   ;;  %v2967_v36 = vunpack.c.l.bf16 %v2807_v61  ;;  %v2968_v2 = vunpack.c.h.bf16 %v2807_v61  ;;  %v4149_v5 = vpop.f32.mrb[84].mxu1  ;;  %v3967_v37 = vadd.f32 %v3966_v6, %v3965_v17  ;;  %v3968_v22 = vpop.f32.mrb[118].mxu0 }
 0x1ee   : > { %v4210_v15 = vadd.f32 %v5396_v34, %v4149_v5  ;;  %v2664_v25 = vpop.f32.mrb[85].mxu1  ;;  %v3969_v55 = vpop.f32.mrb[119].mxu0  ;;  %v3038_v26 = vmul.f32 %v2969_v47, %v2969_v47 }
 0x1ef   : > { %v2999_v20 = vadd.f32 %v2968_v2, %v2967_v36  ;;  %v3036_v62 = vmul.f32 %v2967_v36, %v2967_v36  ;;  %v3037_v32 = vmul.f32 %v2968_v2, %v2968_v2  ;;  %v4214_v53 = vadd.f32 %v5390_v38, %v2664_v25  ;;  %v4150_v44 = vpop.f32.mrb[86].mxu1 }
 0x1f0   : > { %v4218_v39 = vadd.f32 %v5399_v52, %v4150_v44  ;;  %v3970_v58 = vadd.f32 %v3969_v55, %v3968_v22  ;;  %v2667_v23 = vpop.f32.mrb[87].mxu1  ;;  %v5443_v12 = vadd.f32 %v5277_v40, %v3967_v37  ;;  %v3039_v38 = vmul.f32 %v2970_v1, %v2970_v1 }
 0x1f1   : > { %v3000_v21 = vadd.f32 %v2999_v20, %v2969_v47  ;;  %v3068_v34 = vadd.f32 %v3037_v32, %v3036_v62  ;;  %v4222_v19 = vadd.f32 %v5393_v60, %v2667_v23 }
 0x1f2   : > { %v2810_v56 = vpack.c.bf16 %v4218_v39, %v4210_v15  ;;  %v5447_v30 = vadd.f32 %v5514_v45, %v3970_v58 }
 0x1f3   : > { %v3069_v28 = vadd.f32 %v3068_v34, %v3038_v26  ;;  %v2809_v14 = vpack.c.bf16 %v4222_v19, %v4214_v53  ;;  %v3001_v29 = vadd.f32 %v3000_v21, %v2970_v1  ;;  %v3971_v52 = vpop.f32.mrb[120].mxu0 }
 0x1f4   : > { %3610 = vst [vmem:[%s5431_s18 + $0x18] sm:$0xff] %v2810_v56   ;;  %v3972_v63 = vpop.f32.mrb[121].mxu0  ;;  %v2973_v6 = vunpack.c.l.bf16 %v2810_v56  ;;  %v2974_v37 = vunpack.c.h.bf16 %v2810_v56 }
 0x1f5   : > { %3609 = vst [vmem:[%s5431_s18 + $0x10] sm:$0xff] %v2809_v14   ;;  %v2971_v41 = vunpack.c.l.bf16 %v2809_v14  ;;  %v2972_v40 = vunpack.c.h.bf16 %v2809_v14  ;;  %v3070_v9 = vadd.f32 %v3069_v28, %v3039_v38  ;;  %v4153_v50 = vpop.f32.mrb[88].mxu1  ;;  %v3973_v48 = vadd.f32 %v3972_v63, %v3971_v52  ;;  %v3974_v7 = vpop.f32.mrb[122].mxu0 }
 0x1f6   : > { %v4226_v60 = vadd.f32 %v5407_v10, %v4153_v50  ;;  %v2680_v61 = vpop.f32.mrb[89].mxu1  ;;  %v3975_v17 = vpop.f32.mrb[123].mxu0  ;;  %v3043_v23 = vmul.f32 %v2974_v37, %v2974_v37 }
 0x1f7   : > { %v3002_v47 = vadd.f32 %v3001_v29, %v2971_v41  ;;  %v3040_v36 = vmul.f32 %v2971_v41, %v2971_v41  ;;  %v4230_v2 = vadd.f32 %v5402_v3, %v2680_v61  ;;  %v4154_v5 = vpop.f32.mrb[90].mxu1  ;;  %v3976_v1 = vadd.f32 %v3975_v17, %v3974_v7 }
 0x1f8   : > { %v4234_v22 = vadd.f32 %v5410_v35, %v4154_v5  ;;  %v2683_v15 = vpop.f32.mrb[91].mxu1  ;;  %v5455_v25 = vadd.f32 %v5285_v46, %v3973_v48  ;;  %v3041_v10 = vmul.f32 %v2972_v40, %v2972_v40  ;;  %v3042_v3 = vmul.f32 %v2973_v6, %v2973_v6 }
 0x1f9   : > { %v3003_v55 = vadd.f32 %v3002_v47, %v2972_v40  ;;  %v3071_v20 = vadd.f32 %v3070_v9, %v3040_v36  ;;  %v4238_v62 = vadd.f32 %v5404_v8, %v2683_v15  ;;  %v5459_v53 = vadd.f32 %v5287_v57, %v3976_v1 }
 0x1fa   : > { %v2812_v32 = vpack.c.bf16 %v4234_v22, %v4226_v60 }
 0x1fb   : > { %v3004_v44 = vadd.f32 %v3003_v55, %v2973_v6  ;;  %v3072_v39 = vadd.f32 %v3071_v20, %v3041_v10  ;;  %v2811_v35 = vpack.c.bf16 %v4238_v62, %v4230_v2  ;;  %v3977_v58 = vpop.f32.mrb[124].mxu0 }
 0x1fc   : > { %3612 = vst [vmem:[%s5431_s18 + $0x28] sm:$0xff] %v2812_v32   ;;  %v3978_v26 = vpop.f32.mrb[125].mxu0  ;;  %v2977_v8 = vunpack.c.l.bf16 %v2812_v32  ;;  %v2978_v29 = vunpack.c.h.bf16 %v2812_v32 }
 0x1fd   : > { %v3073_v46 = vadd.f32 %v3072_v39, %v3042_v3  ;;  %3611 = vst [vmem:[%s5431_s18 + $0x20] sm:$0xff] %v2811_v35   ;;  %v2975_v21 = vunpack.c.l.bf16 %v2811_v35  ;;  %v2976_v34 = vunpack.c.h.bf16 %v2811_v35  ;;  %v3005_v19 = vadd.f32 %v3004_v44, %v2974_v37  ;;  %v4157_v56 = vpop.f32.mrb[92].mxu1  ;;  %v3980_v45 = vpop.f32.mrb[126].mxu0 }
 0x1fe   : > { %v4242_v38 = vadd.f32 %v5418_v27, %v4157_v56  ;;  %v3979_v57 = vadd.f32 %v3978_v26, %v3977_v58  ;;  %v2696_v28 = vpop.f32.mrb[93].mxu1  ;;  %v3981_v14 = vpop.f32.mrb[127].mxu0  ;;  %v3046_v2 = vmul.f32 %v2977_v8, %v2977_v8  ;;  %v3047_v22 = vmul.f32 %v2978_v29, %v2978_v29 }
 0x1ff   : > { %v3006_v52 = vadd.f32 %v3005_v19, %v2975_v21  ;;  %v3044_v63 = vmul.f32 %v2975_v21, %v2975_v21  ;;  %v3074_v41 = vadd.f32 %v3073_v46, %v3043_v23  ;;  %v4158_v40 = vpop.f32.mrb[94].mxu1  ;;  %v4246_v9 = vadd.f32 %v5413_v42, %v2696_v28 }
 0x200   : > { %v4250_v50 = vadd.f32 %v5421_v13, %v4158_v40  ;;  %v3982_v48 = vadd.f32 %v3981_v14, %v3980_v45  ;;  %v2699_v7 = vpop.f32.mrb[95].mxu1  ;;  %v4268_v60 = vadd.f32 %v5293_v16, %v3979_v57  ;;  %v3045_v27 = vmul.f32 %v2976_v34, %v2976_v34 }
 0x201   : > { %v3007_v61 = vadd.f32 %v3006_v52, %v2976_v34  ;;  %v3075_v17 = vadd.f32 %v3074_v41, %v3044_v63  ;;  %v4254_v6 = vadd.f32 %v5415_v59, %v2699_v7 }
 0x202   : > { %v2814_v47 = vpack.c.bf16 %v4250_v50, %v4242_v38  ;;  %v5469_v36 = vadd.f32 %v5295_v33, %v3982_v48 }
 0x203   : > { %v3008_v5 = vadd.f32 %v3007_v61, %v2977_v8  ;;  %v3076_v42 = vadd.f32 %v3075_v17, %v3045_v27  ;;  %v2813_v37 = vpack.c.bf16 %v4254_v6, %v4246_v9  ;;  %v3983_v13 = vpop.f32.mrb[128].mxu0 }
 0x204   : > { %3614 = vst [vmem:[%s5431_s18 + $0x38] sm:$0xff] %v2814_v47   ;;  %v3984_v1 = vpop.f32.mrb[129].mxu0  ;;  %v2981_v59 = vunpack.c.l.bf16 %v2814_v47  ;;  %v2982_v39 = vunpack.c.h.bf16 %v2814_v47 }
 0x205   : > { %v3077_v15 = vadd.f32 %v3076_v42, %v3046_v2  ;;  %3613 = vst [vmem:[%s5431_s18 + $0x30] sm:$0xff] %v2813_v37   ;;  %v2979_v16 = vunpack.c.l.bf16 %v2813_v37  ;;  %v2980_v55 = vunpack.c.h.bf16 %v2813_v37  ;;  %v3009_v10 = vadd.f32 %v3008_v5, %v2978_v29  ;;  %v4161_v20 = vpop.f32.mrb[0].mxu1  ;;  %v3986_v62 = vpop.f32.mrb[130].mxu0 }
 0x206   : > { %v4257_v32 = vadd.f32 %v5443_v12, %v4161_v20  ;;  %v3985_v33 = vadd.f32 %v3984_v1, %v3983_v13  ;;  %v2712_v3 = vpop.f32.mrb[1].mxu1  ;;  %v3987_v44 = vpop.f32.mrb[131].mxu0  ;;  %v3050_v14 = vmul.f32 %v2981_v59, %v2981_v59  ;;  %v3051_v63 = vmul.f32 %v2982_v39, %v2982_v39 }
 0x207   : > { %v3010_v35 = vadd.f32 %v3009_v10, %v2979_v16  ;;  %v3048_v58 = vmul.f32 %v2979_v16, %v2979_v16  ;;  %v3078_v23 = vadd.f32 %v3077_v15, %v3047_v22  ;;  %v4162_v26 = vpop.f32.mrb[2].mxu1  ;;  %v4260_v46 = vadd.f32 %v5426_v0, %v2712_v3 }
 0x208   : > { %v4263_v21 = vadd.f32 %v5447_v30, %v4162_v26  ;;  %v3988_v34 = vadd.f32 %v3987_v44, %v3986_v62  ;;  %v2715_v19 = vpop.f32.mrb[3].mxu1  ;;  %v5477_v56 = vadd.f32 %v5311_v49, %v3985_v33  ;;  %v3049_v45 = vmul.f32 %v2980_v55, %v2980_v55 }
 0x209   : > { %v3011_v12 = vadd.f32 %v3010_v35, %v2980_v55  ;;  %v3079_v8 = vadd.f32 %v3078_v23, %v3048_v58  ;;  %v4266_v38 = vadd.f32 %v5435_v4, %v2715_v19 }
 0x20a   : > { %v2816_v57 = vpack.c.bf16 %v4263_v21, %v4257_v32  ;;  %v5481_v28 = vadd.f32 %v5317_v51, %v3988_v34 }
 0x20b   : > { %v3012_v0 = vadd.f32 %v3011_v12, %v2981_v59  ;;  %v3080_v29 = vadd.f32 %v3079_v8, %v3049_v45  ;;  %v2815_v30 = vpack.c.bf16 %v4266_v38, %v4260_v46  ;;  %v3989_v52 = vpop.f32.mrb[132].mxu0 }
 0x20c   : > { %3616 = vst [vmem:[%s5431_s18 + $0x48] sm:$0xff] %v2816_v57   ;;  %v3990_v41 = vpop.f32.mrb[133].mxu0  ;;  %v2985_v4 = vunpack.c.l.bf16 %v2816_v57  ;;  %v2986_v6 = vunpack.c.h.bf16 %v2816_v57 }
 0x20d   : > { %v3081_v49 = vadd.f32 %v3080_v29, %v3050_v14  ;;  %3615 = vst [vmem:[%s5431_s18 + $0x40] sm:$0xff] %v2815_v30   ;;  %v2983_v40 = vunpack.c.l.bf16 %v2815_v30  ;;  %v2984_v9 = vunpack.c.h.bf16 %v2815_v30  ;;  %v3013_v50 = vadd.f32 %v3012_v0, %v2982_v39  ;;  %v4165_v48 = vpop.f32.mrb[4].mxu1  ;;  %v3992_v7 = vpop.f32.mrb[134].mxu0 }
 0x20e   : > { %v4269_v61 = vadd.f32 %v4268_v60, %v4165_v48  ;;  %v3991_v27 = vadd.f32 %v3990_v41, %v3989_v52  ;;  %v2728_v51 = vpop.f32.mrb[5].mxu1  ;;  %v3993_v17 = vpop.f32.mrb[135].mxu0  ;;  %v3054_v59 = vmul.f32 %v2985_v4, %v2985_v4 }
 0x20f   : > { %v3014_v47 = vadd.f32 %v3013_v50, %v2983_v40  ;;  %v3052_v2 = vmul.f32 %v2983_v40, %v2983_v40  ;;  %v3082_v5 = vadd.f32 %v3081_v49, %v3051_v63  ;;  %v4166_v42 = vpop.f32.mrb[6].mxu1  ;;  %v4272_v37 = vadd.f32 %v5455_v25, %v2728_v51 }
 0x210   : > { %v4275_v13 = vadd.f32 %v5469_v36, %v4166_v42  ;;  %v3994_v22 = vadd.f32 %v3993_v17, %v3992_v7  ;;  %v2731_v1 = vpop.f32.mrb[7].mxu1  ;;  %v4280_v15 = vadd.f32 %v5333_v54, %v3991_v27  ;;  %v3053_v60 = vmul.f32 %v2984_v9, %v2984_v9 }
 0x211   : > { %v3015_v16 = vadd.f32 %v3014_v47, %v2984_v9  ;;  %v3083_v55 = vadd.f32 %v3082_v5, %v3052_v2  ;;  %v4278_v10 = vadd.f32 %v5459_v53, %v2731_v1  ;;  %v3055_v36 = vmul.f32 %v2986_v6, %v2986_v6 }
 0x212   : > { %v2818_v20 = vpack.c.bf16 %v4275_v13, %v4269_v61  ;;  %v4286_v62 = vadd.f32 %v5339_v11, %v3994_v22 }
 0x213   : > { %v3016_v32 = vadd.f32 %v3015_v16, %v2985_v4  ;;  %v3084_v33 = vadd.f32 %v3083_v55, %v3053_v60  ;;  %v2817_v25 = vpack.c.bf16 %v4278_v10, %v4272_v37  ;;  %v3995_v3 = vpop.f32.mrb[136].mxu0 }
 0x214   : > { %3618 = vst [vmem:[%s5431_s18 + $0x58] sm:$0xff] %v2818_v20   ;;  %v3996_v44 = vpop.f32.mrb[137].mxu0  ;;  %v2989_v46 = vunpack.c.l.bf16 %v2818_v20  ;;  %v2990_v19 = vunpack.c.h.bf16 %v2818_v20 }
 0x215   : > { %v3085_v39 = vadd.f32 %v3084_v33, %v3054_v59  ;;  %3617 = vst [vmem:[%s5431_s18 + $0x50] sm:$0xff] %v2817_v25   ;;  %v2987_v54 = vunpack.c.l.bf16 %v2817_v25  ;;  %v2988_v35 = vunpack.c.h.bf16 %v2817_v25  ;;  %v3017_v58 = vadd.f32 %v3016_v32, %v2986_v6  ;;  %v4169_v23 = vpop.f32.mrb[8].mxu1  ;;  %v3998_v26 = vpop.f32.mrb[138].mxu0 }
 0x216   : > { %v4281_v53 = vadd.f32 %v4280_v15, %v4169_v23  ;;  %v3997_v21 = vadd.f32 %v3996_v44, %v3995_v3  ;;  %v2744_v34 = vpop.f32.mrb[9].mxu1  ;;  %v3999_v11 = vpop.f32.mrb[139].mxu0  ;;  %v3058_v50 = vmul.f32 %v2989_v46, %v2989_v46  ;;  %v3059_v61 = vmul.f32 %v2990_v19, %v2990_v19 }
 0x217   : > { %v3018_v12 = vadd.f32 %v3017_v58, %v2987_v54  ;;  %v3056_v45 = vmul.f32 %v2987_v54, %v2987_v54  ;;  %v3086_v8 = vadd.f32 %v3085_v39, %v3055_v36  ;;  %v4170_v38 = vpop.f32.mrb[10].mxu1  ;;  %v4284_v57 = vadd.f32 %v5477_v56, %v2744_v34 }
 0x218   : > { %v4287_v14 = vadd.f32 %v4286_v62, %v4170_v38  ;;  %v4000_v0 = vadd.f32 %v3999_v11, %v3998_v26  ;;  %v2747_v29 = vpop.f32.mrb[11].mxu1  ;;  %v4295_v30 = vadd.f32 %v5355_v43, %v3997_v21  ;;  %v3057_v63 = vmul.f32 %v2988_v35, %v2988_v35 }
 0x219   : > { %v3019_v52 = vadd.f32 %v3018_v12, %v2988_v35  ;;  %v3087_v41 = vadd.f32 %v3086_v8, %v3056_v45  ;;  %v4290_v49 = vadd.f32 %v5481_v28, %v2747_v29 }
 0x21a   : > { %v2820_v40 = vpack.c.bf16 %v4287_v14, %v4281_v53  ;;  %v4301_v9 = vadd.f32 %v5359_v18, %v4000_v0 }
 0x21b   : > { %v3020_v48 = vadd.f32 %v3019_v52, %v2989_v46  ;;  %v3088_v7 = vadd.f32 %v3087_v41, %v3057_v63  ;;  %v2819_v4 = vpack.c.bf16 %v4290_v49, %v4284_v57  ;;  %v4001_v56 = vpop.f32.mrb[140].mxu0 }
 0x21c   : > { %3620 = vst [vmem:[%s5431_s18 + $0x68] sm:$0xff] %v2820_v40   ;;  %v4002_v27 = vpop.f32.mrb[141].mxu0  ;;  %v2993_v37 = vunpack.c.l.bf16 %v2820_v40  ;;  %v2994_v15 = vunpack.c.h.bf16 %v2820_v40 }
 0x21d   : > { %v3089_v51 = vadd.f32 %v3088_v7, %v3058_v50  ;;  %3619 = vst [vmem:[%s5431_s18 + $0x60] sm:$0xff] %v2819_v4   ;;  %v2991_v43 = vunpack.c.l.bf16 %v2819_v4  ;;  %v2992_v17 = vunpack.c.h.bf16 %v2819_v4  ;;  %v3021_v6 = vadd.f32 %v3020_v48, %v2990_v19  ;;  %v4173_v47 = vpop.f32.mrb[12].mxu1  ;;  %v4004_v2 = vpop.f32.mrb[142].mxu0 }
 0x21e   : > { %v4003_v5 = vadd.f32 %v4002_v27, %v4001_v56  ;;  %v2760_v28 = vpop.f32.mrb[13].mxu1  ;;  %v4005_v42 = vpop.f32.mrb[143].mxu0  ;;  %v3062_v3 = vmul.f32 %v2993_v37, %v2993_v37  ;;  %v3063_v54 = vmul.f32 %v2994_v15, %v2994_v15 }
 0x21f   : > { %v3022_v18 = vadd.f32 %v3021_v6, %v2991_v43  ;;  %v3060_v13 = vmul.f32 %v2991_v43, %v2991_v43  ;;  %v3090_v22 = vadd.f32 %v3089_v51, %v3059_v61  ;;  %v4174_v1 = vpop.f32.mrb[14].mxu1  ;;  %v4296_v60 = vadd.f32 %v4295_v30, %v2760_v28 }
 0x220   : > { %v4292_v16 = vadd.f32 %v5375_v24, %v4003_v5  ;;  %v4006_v55 = vadd.f32 %v4005_v42, %v4004_v2  ;;  %v2763_v10 = vpop.f32.mrb[15].mxu1  ;;  %v3061_v62 = vmul.f32 %v2992_v17, %v2992_v17 }
 0x221   : > { %v3023_v20 = vadd.f32 %v3022_v18, %v2992_v17  ;;  %v3091_v59 = vadd.f32 %v3090_v22, %v3060_v13  ;;  %v4302_v32 = vadd.f32 %v4301_v9, %v2763_v10 }
 0x222   : > { %v4293_v33 = vadd.f32 %v4292_v16, %v4173_v47  ;;  %v4298_v25 = vadd.f32 %v5379_v31, %v4006_v55 }
 0x223   : > { %v3024_v36 = vadd.f32 %v3023_v20, %v2993_v37  ;;  %v3092_v44 = vadd.f32 %v3091_v59, %v3061_v62  ;;  %v2821_v39 = vpack.c.bf16 %v4302_v32, %v4296_v60 }
 0x224   : > { %v4299_v35 = vadd.f32 %v4298_v25, %v4174_v1 }
 0x225   : > { %v3093_v58 = vadd.f32 %v3092_v44, %v3062_v3  ;;  %3621 = vst [vmem:[%s5431_s18 + $0x70] sm:$0xff] %v2821_v39   ;;  %v2995_v24 = vunpack.c.l.bf16 %v2821_v39  ;;  %v2996_v23 = vunpack.c.h.bf16 %v2821_v39  ;;  %v3025_v26 = vadd.f32 %v3024_v36, %v2994_v15 }
 0x226   : > { %v2822_v46 = vpack.c.bf16 %v4299_v35, %v4293_v33 }
 0x227   : > { %v3026_v53 = vadd.f32 %v3025_v26, %v2995_v24  ;;  %v3064_v21 = vmul.f32 %v2995_v24, %v2995_v24  ;;  %v3094_v34 = vadd.f32 %v3093_v58, %v3063_v54  ;;  %v3065_v12 = vmul.f32 %v2996_v23, %v2996_v23 }
 0x228   : > { %3622 = vst [vmem:[%s5431_s18 + $0x78] sm:$0xff] %v2822_v46   ;;  %v2997_v11 = vunpack.c.l.bf16 %v2822_v46  ;;  %v2998_v19 = vunpack.c.h.bf16 %v2822_v46 }
 0x229   : > { %v3027_v31 = vadd.f32 %v3026_v53, %v2996_v23  ;;  %v3095_v45 = vadd.f32 %v3094_v34, %v3064_v21 }
 0x22a   : > { %v3066_v8 = vmul.f32 %v2997_v11, %v2997_v11  ;;  %v3067_v14 = vmul.f32 %v2998_v19, %v2998_v19 }
 0x22b   : > { %v3028_v38 = vadd.f32 %v3027_v31, %v2997_v11  ;;  %v3096_v57 = vadd.f32 %v3095_v45, %v3065_v12 }
 0x22d   : > { %v3029_v0 = vadd.f32 %v3028_v38, %v2998_v19  ;;  %v3097_v29 = vadd.f32 %v3096_v57, %v3066_v8 }
 0x22f   : > { %v3030_v30 = vrot.slane %v3029_v0, 4  ;;  %v3098_v52 = vadd.f32 %v3097_v29, %v3067_v14 }
 0x231   : > { %v3031_v63 = vadd.f32 %v3030_v30, %v3029_v0  ;;  %v3099_v41 = vrot.slane %v3098_v52, 4 }
 0x233   : > { %v3032_v49 = vrot.slane %v3031_v63, 2  ;;  %v3100_v40 = vadd.f32 %v3099_v41, %v3098_v52 }
 0x235   : > { %v3033_v9 = vadd.f32 %v3032_v49, %v3031_v63  ;;  %v3101_v50 = vrot.slane %v3100_v40, 2 }
 0x237   : > { %v3034_v48 = vrot.slane %v3033_v9, 1  ;;  %v3102_v7 = vadd.f32 %v3101_v50, %v3100_v40 }
 0x239   : > { %v3103_v4 = vrot.slane %v3102_v7, 1  ;;  %v3035_v56 = vadd.f32 %v3034_v48, %v3033_v9 }
 0x23b   : > { %v3104_v61 = vadd.f32 %v3103_v4, %v3102_v7 }
 0x23d   : > { %v3106_v27 = vsel %vm3105_vm2, %v3035_v56, %v3104_v61 }
 0x23e   : > { %3107 = vst [vmem:[%s181_s22] sm:$0x3] %v3106_v27 }
 0x23f PF: > { %s14_s12 = sadd.s32 1, %s4531_s12  }
 0x240   : > { %p11_p4 = scmp.ge.s32.totalorder %s14_s12, 4  }
 0x242   :  { %13 = sbr.rel (!%p11_p4) target bundleno = 1 (0x1), region = 74 }

</bundles_post_ra>
